<compile_context>
chip_gen: v5e
topology: v5e:2x2
jax: 0.10.0
libtpu: 0.0.40
codegen_flags: <defaults>
</compile_context>

<pallas_src>
import jax
import jax.numpy as jnp
from jax.experimental import pallas as pl
from jax.experimental.pallas import tpu as pltpu

IN_DIM = 784
IN_PAD = 896          # 7 * 128: lane-dense, generation-neutral padding of 784
H1 = 512
H2 = 256


def _round_up(x, m):
    return ((x + m - 1) // m) * m


def _choose_tile_b(batch):
    """Pick a batch tile: big enough to amortize per-grid-step overhead,
    but keep >= 2 grid steps for medium/large batches (v7x dual TensorCore)."""
    bp = _round_up(batch, 128)
    if bp <= 512:
        return bp                                  # single tile for small batches
    return min(1024, _round_up(bp // 2, 128))      # >= 2 tiles, <= 1024 rows/tile


def _leaky_relu(x, slope=0.2):
    return jnp.where(x > 0, x, slope * x)


def discriminator_kernel(x_ref, w1_ref, b1_ref, w2_ref, b2_ref, w3_ref, b3_ref,
                         out_ref):
    # x tile / weights are bf16; MXU accumulates in f32; elementwise stays f32.
    x = x_ref[...]                                                       # (TB, 896) bf16

    h1 = jnp.dot(x, w1_ref[...], preferred_element_type=jnp.float32)    # (TB, 512) f32
    h1 = _leaky_relu(h1 + b1_ref[...])

    h2 = jnp.dot(h1.astype(jnp.bfloat16), w2_ref[...],
                 preferred_element_type=jnp.float32)                    # (TB, 256) f32
    h2 = _leaky_relu(h2 + b2_ref[...])

    # Layer 3 (256 -> 1): VPU broadcast-multiply + XLU lane reduction instead of
    # a padded (256,128) MXU pass; output stays (TB, 1) -> 4 B/row HBM writeback.
    logit = jnp.sum(h2 * w3_ref[...], axis=-1, keepdims=True) + b3_ref[...]  # (TB, 1)

    # Numerically robust sigmoid on the EUP: saturates for large |logit|.
    out_ref[...] = 0.5 * (jnp.tanh(0.5 * logit) + 1.0)


def prepare_params(params):
    """One-time prep: bf16 weights, zero-padded w1 rows (784 -> 896), f32 biases,
    w3 reshaped to a (1, 256) f32 row for the VPU/XLU layer-3 path."""
    w1, b1, w2, b2, w3, b3 = params
    w1p = jnp.zeros((IN_PAD, H1), jnp.float32).at[:IN_DIM, :].set(w1)
    return (
        w1p.astype(jnp.bfloat16),
        b1.reshape(1, H1).astype(jnp.float32),
        w2.astype(jnp.bfloat16),
        b2.reshape(1, H2).astype(jnp.float32),
        w3.reshape(1, H2).astype(jnp.float32),   # kept f32: used on the VPU
        b3.reshape(1, 1).astype(jnp.float32),
    )


def discriminator_forward(img, prepared):
    """img: (B, 1, 28, 28) float32 NCHW. Returns (B, 1) f32 validity."""
    B = img.shape[0]
    x = img.reshape(B, -1)                                   # (B, 784), torch .view(B, -1)

    tile_b = _choose_tile_b(B)
    n_tiles = pl.cdiv(B, tile_b)
    Bp = n_tiles * tile_b

    # Pad batch to a whole number of tiles and features to a 128-lane multiple.
    x = jnp.pad(x, ((0, Bp - B), (0, IN_PAD - IN_DIM))).astype(jnp.bfloat16)

    w1, b1, w2, b2, w3, b3 = prepared

    out = pl.pallas_call(
        discriminator_kernel,
        out_shape=jax.ShapeDtypeStruct((Bp, 1), jnp.float32),
        grid=(n_tiles,),
        in_specs=[
            pl.BlockSpec((tile_b, IN_PAD), lambda i: (i, 0)),   # x: streamed per tile
            pl.BlockSpec((IN_PAD, H1),     lambda i: (0, 0)),   # w1: VMEM-resident
            pl.BlockSpec((1, H1),          lambda i: (0, 0)),   # b1: resident
            pl.BlockSpec((H1, H2),         lambda i: (0, 0)),   # w2: resident
            pl.BlockSpec((1, H2),          lambda i: (0, 0)),   # b2: resident
            pl.BlockSpec((1, H2),          lambda i: (0, 0)),   # w3 row: resident
            pl.BlockSpec((1, 1),           lambda i: (0, 0)),   # b3 scalar: resident
        ],
        out_specs=pl.BlockSpec((tile_b, 1), lambda i: (i, 0)),
        compiler_params=pltpu.CompilerParams(
            dimension_semantics=("parallel",),
            vmem_limit_bytes=32 * 1024 * 1024),
    )(x, w1, b1, w2, b2, w3, b3)

    return out[:B]  # (B, 1); padded batch rows discarded


def init_params(key):
    """Deterministic init mimicking nn.Linear default U(-1/sqrt(fan_in), 1/sqrt(fan_in))."""
    def linear(key, fan_in, fan_out):
        kw, kb = jax.random.split(key)
        bound = 1.0 / jnp.sqrt(fan_in)
        w = jax.random.uniform(kw, (fan_in, fan_out), jnp.float32, -bound, bound)
        b = jax.random.uniform(kb, (fan_out,), jnp.float32, -bound, bound)
        return w, b

    k1, k2, k3 = jax.random.split(key, 3)
    w1, b1 = linear(k1, IN_DIM, H1)
    w2, b2 = linear(k2, H1, H2)
    w3, b3 = linear(k3, H2, 1)
    return (w1, b1, w2, b2, w3, b3)


if __name__ == "__main__":
    key = jax.random.PRNGKey(0)
    k_img, k_params = jax.random.split(key)

    B = 2
    img = jax.random.normal(k_img, (B, 1, 28, 28), jnp.float32)  # NCHW, 1*28*28 = 784
    params = init_params(k_params)
    prepared = prepare_params(params)

    validity = discriminator_forward(img, prepared)
    validity = jax.block_until_ready(validity)
    assert validity.shape == (B, 1)

    # Sanity check vs plain-JAX reference using the same numerics
    # (bf16 matmul operands, f32 accumulation, f32 layer-3 and elementwise).
    w1, b1, w2, b2, w3, b3 = params
    xb = img.reshape(B, -1).astype(jnp.bfloat16)
    h = jnp.dot(xb, w1.astype(jnp.bfloat16),
                preferred_element_type=jnp.float32) + b1
    h = jnp.where(h > 0, h, 0.2 * h)
    h = jnp.dot(h.astype(jnp.bfloat16), w2.astype(jnp.bfloat16),
                preferred_element_type=jnp.float32) + b2
    h = jnp.where(h > 0, h, 0.2 * h)
    logit = jnp.dot(h, w3) + b3                       # f32, matches in-kernel layer 3
    ref = jax.nn.sigmoid(logit)
    assert jnp.allclose(validity, ref, atol=5e-3), "mismatch vs reference"

    print("KERNEL_OK")
</pallas_src>

<mosaic_0001>
module attributes {stable_mosaic.version = 11 : i64} {
  func.func @discriminator_kernel(%arg0: i32, %arg1: memref<128x896xbf16, #tpu.memory_space<vmem>>, %arg2: memref<896x512xbf16, #tpu.memory_space<vmem>>, %arg3: memref<1x512xf32, #tpu.memory_space<vmem>>, %arg4: memref<512x256xbf16, #tpu.memory_space<vmem>>, %arg5: memref<1x256xf32, #tpu.memory_space<vmem>>, %arg6: memref<1x256xf32, #tpu.memory_space<vmem>>, %arg7: memref<1x1xf32, #tpu.memory_space<vmem>>, %arg8: memref<128x1xf32, #tpu.memory_space<vmem>>) attributes {dimension_semantics = [#tpu.dimension_semantics<parallel>], iteration_bounds = array<i64: 1>, scalar_prefetch = 0 : i64, scratch_operands = 0 : i64, tpu.core_type = #tpu.core_type<tc>, window_params = [{transform_indices = @transform_0, window_bounds = array<i64: 128, 896>}, {pipeline_mode = #tpu.pipeline_mode<synchronous>, transform_indices = @transform_1, window_bounds = array<i64: 896, 512>}, {pipeline_mode = #tpu.pipeline_mode<synchronous>, transform_indices = @transform_2, window_bounds = array<i64: 1, 512>}, {pipeline_mode = #tpu.pipeline_mode<synchronous>, transform_indices = @transform_3, window_bounds = array<i64: 512, 256>}, {pipeline_mode = #tpu.pipeline_mode<synchronous>, transform_indices = @transform_4, window_bounds = array<i64: 1, 256>}, {pipeline_mode = #tpu.pipeline_mode<synchronous>, transform_indices = @transform_5, window_bounds = array<i64: 1, 256>}, {pipeline_mode = #tpu.pipeline_mode<synchronous>, transform_indices = @transform_6, window_bounds = array<i64: 1, 1>}, {transform_indices = @transform_7, window_bounds = array<i64: 128, 1>}]} {
    %c0 = arith.constant 0 : index
    %c0_0 = arith.constant 0 : index
    %0 = vector.load %arg1[%c0, %c0_0] : memref<128x896xbf16, #tpu.memory_space<vmem>>, vector<128x896xbf16>
    %c0_1 = arith.constant 0 : index
    %c0_2 = arith.constant 0 : index
    %1 = vector.load %arg2[%c0_1, %c0_2] : memref<896x512xbf16, #tpu.memory_space<vmem>>, vector<896x512xbf16>
    %cst = arith.constant dense<0.000000e+00> : vector<128x512xf32>
    %2 = tpu.matmul %0, %1, %cst {dimension_numbers = #tpu.dot_dimension_numbers<[1], [0], [0], [1], [0, 0, 1, 1], [], []>} : vector<128x896xbf16>, vector<896x512xbf16>, vector<128x512xf32> -> vector<128x512xf32>
    %c0_3 = arith.constant 0 : index
    %c0_4 = arith.constant 0 : index
    %3 = vector.load %arg3[%c0_3, %c0_4] : memref<1x512xf32, #tpu.memory_space<vmem>>, vector<1x512xf32>
    %4 = vector.broadcast %3 : vector<1x512xf32> to vector<128x512xf32>
    %5 = arith.addf %2, %4 : vector<128x512xf32>
    %cst_5 = arith.constant 0.000000e+00 : f32
    %6 = vector.broadcast %cst_5 : f32 to vector<128x512xf32>
    %7 = arith.cmpf ogt, %5, %6 : vector<128x512xf32>
    %cst_6 = arith.constant 2.000000e-01 : f32
    %8 = vector.broadcast %cst_6 : f32 to vector<128x512xf32>
    %9 = arith.mulf %8, %5 : vector<128x512xf32>
    %10 = arith.select %7, %5, %9 : vector<128x512xi1>, vector<128x512xf32>
    %11 = arith.truncf %10 : vector<128x512xf32> to vector<128x512xbf16>
    %c0_7 = arith.constant 0 : index
    %c0_8 = arith.constant 0 : index
    %12 = vector.load %arg4[%c0_7, %c0_8] : memref<512x256xbf16, #tpu.memory_space<vmem>>, vector<512x256xbf16>
    %cst_9 = arith.constant dense<0.000000e+00> : vector<128x256xf32>
    %13 = tpu.matmul %11, %12, %cst_9 {dimension_numbers = #tpu.dot_dimension_numbers<[1], [0], [0], [1], [0, 0, 1, 1], [], []>} : vector<128x512xbf16>, vector<512x256xbf16>, vector<128x256xf32> -> vector<128x256xf32>
    %c0_10 = arith.constant 0 : index
    %c0_11 = arith.constant 0 : index
    %14 = vector.load %arg5[%c0_10, %c0_11] : memref<1x256xf32, #tpu.memory_space<vmem>>, vector<1x256xf32>
    %15 = vector.broadcast %14 : vector<1x256xf32> to vector<128x256xf32>
    %16 = arith.addf %13, %15 : vector<128x256xf32>
    %cst_12 = arith.constant 0.000000e+00 : f32
    %17 = vector.broadcast %cst_12 : f32 to vector<128x256xf32>
    %18 = arith.cmpf ogt, %16, %17 : vector<128x256xf32>
    %cst_13 = arith.constant 2.000000e-01 : f32
    %19 = vector.broadcast %cst_13 : f32 to vector<128x256xf32>
    %20 = arith.mulf %19, %16 : vector<128x256xf32>
    %21 = arith.select %18, %16, %20 : vector<128x256xi1>, vector<128x256xf32>
    %c0_14 = arith.constant 0 : index
    %c0_15 = arith.constant 0 : index
    %22 = vector.load %arg6[%c0_14, %c0_15] : memref<1x256xf32, #tpu.memory_space<vmem>>, vector<1x256xf32>
    %23 = vector.broadcast %22 : vector<1x256xf32> to vector<128x256xf32>
    %24 = arith.mulf %21, %23 : vector<128x256xf32>
    %cst_16 = arith.constant dense<0.000000e+00> : vector<128xf32>
    %25 = vector.multi_reduction <add>, %24, %cst_16 [1] : vector<128x256xf32> to vector<128xf32>
    %26 = vector.shape_cast %25 : vector<128xf32> to vector<128x1xf32>
    %c0_17 = arith.constant 0 : index
    %c0_18 = arith.constant 0 : index
    %27 = vector.load %arg7[%c0_17, %c0_18] : memref<1x1xf32, #tpu.memory_space<vmem>>, vector<1x1xf32>
    %28 = vector.broadcast %27 : vector<1x1xf32> to vector<128x1xf32>
    %29 = arith.addf %26, %28 : vector<128x1xf32>
    %cst_19 = arith.constant 5.000000e-01 : f32
    %30 = vector.broadcast %cst_19 : f32 to vector<128x1xf32>
    %31 = arith.mulf %30, %29 : vector<128x1xf32>
    %32 = math.tanh %31 : vector<128x1xf32>
    %cst_20 = arith.constant 1.000000e+00 : f32
    %33 = vector.broadcast %cst_20 : f32 to vector<128x1xf32>
    %34 = arith.addf %32, %33 : vector<128x1xf32>
    %cst_21 = arith.constant 5.000000e-01 : f32
    %35 = vector.broadcast %cst_21 : f32 to vector<128x1xf32>
    %36 = arith.mulf %35, %34 : vector<128x1xf32>
    %c0_22 = arith.constant 0 : index
    %c0_23 = arith.constant 0 : index
    %37 = vector.load %arg8[%c0_22, %c0_23] : memref<128x1xf32, #tpu.memory_space<vmem>>, vector<128x1xf32>
    tpu.vector_store %arg8[%c0_22, %c0_23], %36 {strides = array<i32>} : memref<128x1xf32, #tpu.memory_space<vmem>>, vector<128x1xf32>,
    return
  }
  func.func @transform_0(%arg0: i32) -> (i32, i32) {
    %c0_i32 = arith.constant 0 : i32
    %c0_i32_0 = arith.constant 0 : i32
    return %arg0, %c0_i32 : i32, i32
  }
  func.func @transform_1(%arg0: i32) -> (i32, i32) {
    %c0_i32 = arith.constant 0 : i32
    %c0_i32_0 = arith.constant 0 : i32
    %c0_i32_1 = arith.constant 0 : i32
    return %c0_i32, %c0_i32_0 : i32, i32
  }
  func.func @transform_2(%arg0: i32) -> (i32, i32) {
    %c0_i32 = arith.constant 0 : i32
    %c0_i32_0 = arith.constant 0 : i32
    %c0_i32_1 = arith.constant 0 : i32
    return %c0_i32, %c0_i32_0 : i32, i32
  }
  func.func @transform_3(%arg0: i32) -> (i32, i32) {
    %c0_i32 = arith.constant 0 : i32
    %c0_i32_0 = arith.constant 0 : i32
    %c0_i32_1 = arith.constant 0 : i32
    return %c0_i32, %c0_i32_0 : i32, i32
  }
  func.func @transform_4(%arg0: i32) -> (i32, i32) {
    %c0_i32 = arith.constant 0 : i32
    %c0_i32_0 = arith.constant 0 : i32
    %c0_i32_1 = arith.constant 0 : i32
    return %c0_i32, %c0_i32_0 : i32, i32
  }
  func.func @transform_5(%arg0: i32) -> (i32, i32) {
    %c0_i32 = arith.constant 0 : i32
    %c0_i32_0 = arith.constant 0 : i32
    %c0_i32_1 = arith.constant 0 : i32
    return %c0_i32, %c0_i32_0 : i32, i32
  }
  func.func @transform_6(%arg0: i32) -> (i32, i32) {
    %c0_i32 = arith.constant 0 : i32
    %c0_i32_0 = arith.constant 0 : i32
    %c0_i32_1 = arith.constant 0 : i32
    return %c0_i32, %c0_i32_0 : i32, i32
  }
  func.func @transform_7(%arg0: i32) -> (i32, i32) {
    %c0_i32 = arith.constant 0 : i32
    %c0_i32_0 = arith.constant 0 : i32
    return %arg0, %c0_i32 : i32, i32
  }
}

</mosaic_0001>

<bundles_post_ra>
// kernel: tpu_custom_call.1
= control target key start
LH: loop header
LB: loop body
LE: loop exit
PB: predicated region body
PF: predicated region fallthrough
CT: control target
= control target key end

     0   :  { %s7484_s0 = inlined_call_operand.hbm [shape: bf16[128,896], index: 0, kind: input, shape index: {}]   ;;  %s7485_s1 = inlined_call_operand.hbm [shape: bf16[896,512], index: 1, kind: input, shape index: {}]   ;;  %s7486_s2 = inlined_call_operand.hbm [shape: f32[1,512], index: 2, kind: input, shape index: {}]   ;;  %s7487_s3 = inlined_call_operand.hbm [shape: bf16[512,256], index: 3, kind: input, shape index: {}]   ;;  %s7488_s4 = inlined_call_operand.vmem [shape: f32[1,256], index: 4, kind: input, shape index: {}]   ;;  %s7489_s5 = inlined_call_operand.vmem [shape: f32[1,256], index: 5, kind: input, shape index: {}]   ;;  %s7490_s6 = inlined_call_operand.<no memory space> [shape: f32[1,1], index: 6, kind: input, shape index: {}]   ;;  %s7491_s7 = inlined_call_operand.vmem [shape: f32[128,1], index: 7, kind: output, shape index: {}]  }
   0x1   :  { %v12_v0 = vstv %s7490_s6 }
   0x2   :  { %13 = vst [vmem:[#allocation2] sm:$0x1] %v12_v0 }
   0x3   :  { %14 = vsyncpa [#allocation4], 0 }
   0x4   :  { %15 = vsyncpa [#allocation6], 0  ;;  %s34_s28 = sshll.u32 %s7485_s1, 4  ;;  %s35_s28 = int_to_ptr.hbm [resolvable:$true] %s34_s28 }
   0x5   :  { %16 = vsyncpa [#allocation9], 0  ;;  %s6330_s29 = smov [#allocation5]   ;;  %s21_s10 = sshll.u32 %s7484_s0, 4  ;;  %s22_s10 = int_to_ptr.hbm [resolvable:$true] %s21_s10 }
   0x6   :  { %s36_s30 = sshll.u32 %s6330_s29, 4  ;;  %s6331_s11 = smov 256   ;;  %s37_s30 = int_to_ptr.vmem [resolvable:$true] %s36_s30 }
   0x7   :  { %s6332_s12 = smov 16   ;;  %s6333_s6 = smov [#allocation3]  }
   0x8   :  { %42 = dma.hbm_to_vmem [thread:$0]  %s35_s28, 28672, %s37_s30, [#allocation6], %s6331_s11, %s6331_s11, %s6332_s12  }
   0x9   :  { %s23_s13 = sshll.u32 %s6333_s6, 4  ;;  %s6334_s14 = smov 448   ;;  %s24_s13 = int_to_ptr.vmem [resolvable:$true] %s23_s13 }
   0xa   :  { %s6335_s15 = smov 28   ;;  %s48_s17 = sshll.u32 %s7486_s2, 4  ;;  %s49_s17 = int_to_ptr.hbm [resolvable:$true] %s48_s17 }
   0xb   :  { %29 = dma.hbm_to_vmem [thread:$0]  %s22_s10, 7168, %s24_s13, [#allocation4], %s6334_s14, %s6334_s14, %s6335_s15  }
   0xc   :  { %s6336_s18 = smov [#allocation7]   ;;  %s58_s21 = sshll.u32 %s7487_s3, 4  ;;  %s59_s21 = int_to_ptr.hbm [resolvable:$true] %s58_s21 }
   0xd   :  { %s50_s19 = sshll.u32 %s6336_s18, 4  ;;  %s6337_s22 = smov [#allocation8]   ;;  %s51_s19 = int_to_ptr.vmem [resolvable:$true] %s50_s19 }
   0xe   :  { %53 = dma.hbm_to_vmem [thread:$0]  %s49_s17, 64, %s51_s19, [#allocation6]  }
   0xf   :  { %s60_s23 = sshll.u32 %s6337_s22, 4  ;;  %s6338_s24 = smov 128   ;;  %s61_s23 = int_to_ptr.vmem [resolvable:$true] %s60_s23 }
  0x10   :  { %s6339_s25 = smov 8  }
  0x11   :  { %66 = dma.hbm_to_vmem [thread:$0]  %s59_s21, 8192, %s61_s23, [#allocation9], %s6338_s24, %s6338_s24, %s6339_s25  }
  0x12   :  { %6324 = dma.done.wait [#allocation4], 7168  }
  0x13   :  { %6325 = vsyncadd [#allocation4], 4294960128 }
  0x14   :  { %6326 = dma.done.wait [#allocation6], 28736  }
  0x15   :  { %6327 = vsyncadd [#allocation6], 4294938560 }
  0x16   :  { %6328 = dma.done.wait [#allocation9], 8192  }
  0x17   :  { %6329 = vsyncadd [#allocation9], 4294959104  ;;  %v4801_v1 = vld [vmem:[#allocation5 + $0xe0] sm:$0xf]  ;;  %v5925_v2 = vld [vmem:[#allocation5 + $0xec] sm:$0xf0] }
  0x18   :  { %v4929_v3 = vld [vmem:[#allocation5 + $0x1e0] sm:$0xf]  ;;  %v4802_v4 = vor.u32 %v5925_v2, %v4801_v1  ;;  %v5957_v5 = vld [vmem:[#allocation5 + $0x1ec] sm:$0xf0] }
  0x19   :  { %v5057_v6 = vld [vmem:[#allocation5 + $0x2e0] sm:$0xf]  ;;  %v5989_v7 = vld [vmem:[#allocation5 + $0x2ec] sm:$0xf0]  ;;  %v4930_v8 = vor.u32 %v5957_v5, %v4929_v3 }
  0x1a   :  { %v5058_v9 = vor.u32 %v5989_v7, %v5057_v6  ;;  %v5185_v10 = vld [vmem:[#allocation5 + $0x3e0] sm:$0xf]  ;;  %v6021_v11 = vld [vmem:[#allocation5 + $0x3ec] sm:$0xf0]  ;;  %1795 = vmatpush.bf16.msra.mxu0 %v4802_v4 }
  0x1b   :  { %v4785_v12 = vld [vmem:[#allocation5 + $0xc0] sm:$0xf]  ;;  %v5186_v13 = vor.u32 %v6021_v11, %v5185_v10  ;;  %v5921_v14 = vld [vmem:[#allocation5 + $0xcc] sm:$0xf0]  ;;  %1844 = vmatpush.bf16.msra.mxu1 %v4930_v8 }
  0x1c   :  { %v4913_v15 = vld [vmem:[#allocation5 + $0x1c0] sm:$0xf]  ;;  %v5953_v16 = vld [vmem:[#allocation5 + $0x1cc] sm:$0xf0]  ;;  %1893 = vmatpush.bf16.msra.mxu2 %v5058_v9  ;;  %v4786_v17 = vor.u32 %v5921_v14, %v4785_v12 }
  0x1d   :  { %v4914_v18 = vor.u32 %v5953_v16, %v4913_v15  ;;  %v5041_v19 = vld [vmem:[#allocation5 + $0x2c0] sm:$0xf]  ;;  %v5985_v20 = vld [vmem:[#allocation5 + $0x2cc] sm:$0xf0]  ;;  %1942 = vmatpush.bf16.msra.mxu3 %v5186_v13 }
  0x1e   :  { %v5169_v21 = vld [vmem:[#allocation5 + $0x3c0] sm:$0xf]  ;;  %v5042_v22 = vor.u32 %v5985_v20, %v5041_v19  ;;  %v6017_v23 = vld [vmem:[#allocation5 + $0x3cc] sm:$0xf0]  ;;  %1796 = vmatpush.bf16.msra.mxu0 %v4786_v17 }
  0x1f   :  { %v4769_v24 = vld [vmem:[#allocation5 + $0xa0] sm:$0xf]  ;;  %v5917_v25 = vld [vmem:[#allocation5 + $0xac] sm:$0xf0]  ;;  %v5170_v26 = vor.u32 %v6017_v23, %v5169_v21  ;;  %1845 = vmatpush.bf16.msra.mxu1 %v4914_v18 }
  0x20   :  { %v4897_v27 = vld [vmem:[#allocation5 + $0x1a0] sm:$0xf]  ;;  %v5949_v28 = vld [vmem:[#allocation5 + $0x1ac] sm:$0xf0]  ;;  %v4770_v30 = vor.u32 %v5917_v25, %v4769_v24  ;;  %1894 = vmatpush.bf16.msra.mxu2 %v5042_v22 }
  0x21   :  { %v5025_v29 = vld [vmem:[#allocation5 + $0x2a0] sm:$0xf]  ;;  %v5981_v31 = vld [vmem:[#allocation5 + $0x2ac] sm:$0xf0]  ;;  %v4898_v34 = vor.u32 %v5949_v28, %v4897_v27  ;;  %1943 = vmatpush.bf16.msra.mxu3 %v5170_v26 }
  0x22   :  { %v5153_v32 = vld [vmem:[#allocation5 + $0x3a0] sm:$0xf]  ;;  %v6013_v33 = vld [vmem:[#allocation5 + $0x3ac] sm:$0xf0]  ;;  %v5026_v35 = vor.u32 %v5981_v31, %v5025_v29  ;;  %1797 = vmatpush.bf16.msra.mxu0 %v4770_v30  ;;  %v5842_v30 = vld [vmem:[#allocation3 + $0x18] sm:$0xf0] }
  0x23   :  { %v4753_v36 = vld [vmem:[#allocation5 + $0x80] sm:$0xf]  ;;  %v5913_v37 = vld [vmem:[#allocation5 + $0x8c] sm:$0xf0]  ;;  %v5154_v39 = vor.u32 %v6013_v33, %v5153_v32  ;;  %1846 = vmatpush.bf16.msra.mxu1 %v4898_v34  ;;  %v5839_v31 = vld [vmem:[#allocation3 + $0x4] sm:$0xf] }
  0x24   :  { %v4881_v38 = vld [vmem:[#allocation5 + $0x180] sm:$0xf]  ;;  %v5945_v40 = vld [vmem:[#allocation5 + $0x18c] sm:$0xf0]  ;;  %v4754_v45 = vor.u32 %v5913_v37, %v4753_v36  ;;  %1895 = vmatpush.bf16.msra.mxu2 %v5026_v35  ;;  %v4473_v36 = vld [vmem:[#allocation3 + $0x8] sm:$0xf] }
  0x25   :  { %v5009_v41 = vld [vmem:[#allocation5 + $0x280] sm:$0xf]  ;;  %v5977_v42 = vld [vmem:[#allocation5 + $0x28c] sm:$0xf0]  ;;  %v4882_v46 = vor.u32 %v5945_v40, %v4881_v38  ;;  %1944 = vmatpush.bf16.msra.mxu3 %v5154_v39  ;;  %v5923_v37 = vld [vmem:[#allocation5 + $0xe4] sm:$0xf] }
  0x26   :  { %v5137_v43 = vld [vmem:[#allocation5 + $0x380] sm:$0xf]  ;;  %v6009_v44 = vld [vmem:[#allocation5 + $0x38c] sm:$0xf0]  ;;  %v5010_v47 = vor.u32 %v5977_v42, %v5009_v41  ;;  %1798 = vmatpush.bf16.msra.mxu0 %v4754_v45  ;;  %v4803_v38 = vld [vmem:[#allocation5 + $0xf0] sm:$0xf0] }
  0x27   :  { %v4737_v48 = vld [vmem:[#allocation5 + $0x60] sm:$0xf]  ;;  %v5909_v49 = vld [vmem:[#allocation5 + $0x6c] sm:$0xf0]  ;;  %v5138_v51 = vor.u32 %v6009_v44, %v5137_v43  ;;  %1847 = vmatpush.bf16.msra.mxu1 %v4882_v46  ;;  %v5843_v41 = vld [vmem:[#allocation3 + $0x20] sm:$0xf0] }
  0x28   :  { %v4865_v50 = vld [vmem:[#allocation5 + $0x160] sm:$0xf]  ;;  %v5941_v52 = vld [vmem:[#allocation5 + $0x16c] sm:$0xf0]  ;;  %v4738_v57 = vor.u32 %v5909_v49, %v4737_v48  ;;  %1896 = vmatpush.bf16.msra.mxu2 %v5010_v47  ;;  %v5840_v42 = vld [vmem:[#allocation3 + $0xc] sm:$0xf] }
  0x29   :  { %v4993_v53 = vld [vmem:[#allocation5 + $0x260] sm:$0xf]  ;;  %v5973_v54 = vld [vmem:[#allocation5 + $0x26c] sm:$0xf0]  ;;  %v4866_v58 = vor.u32 %v5941_v52, %v4865_v50  ;;  %1945 = vmatpush.bf16.msra.mxu3 %v5138_v51  ;;  %v4475_v43 = vld [vmem:[#allocation3 + $0x24] sm:$0xf0]  ;;  %v4806_v50 = vor.u32 %v5923_v37, %v4803_v38 }
  0x2a   :  { %v5121_v55 = vld [vmem:[#allocation5 + $0x360] sm:$0xf]  ;;  %v6005_v56 = vld [vmem:[#allocation5 + $0x36c] sm:$0xf0]  ;;  %v4994_v59 = vor.u32 %v5973_v54, %v4993_v53  ;;  %1799 = vmatpush.bf16.msra.mxu0 %v4738_v57  ;;  %v4787_v57 = vld [vmem:[#allocation5 + $0xd0] sm:$0xf0] }
  0x2b   :  { %v4721_v60 = vld [vmem:[#allocation5 + $0x40] sm:$0xf]  ;;  %v5905_v61 = vld [vmem:[#allocation5 + $0x4c] sm:$0xf0]  ;;  %v5122_v63 = vor.u32 %v6005_v56, %v5121_v55  ;;  %1848 = vmatpush.bf16.msra.mxu1 %v4866_v58  ;;  %v6399_v55 = vor.u32 %v5843_v41, %v4473_v36  ;;  %v5919_v56 = vld [vmem:[#allocation5 + $0xc4] sm:$0xf]  ;;  %v6401_v58 = vor.u32 %v5840_v42, %v4475_v43 }
  0x2c   :  { %v4849_v62 = vld [vmem:[#allocation5 + $0x140] sm:$0xf]  ;;  %v5937_v0 = vld [vmem:[#allocation5 + $0x14c] sm:$0xf0]  ;;  %v4722_v5 = vor.u32 %v5905_v61, %v4721_v60  ;;  %1897 = vmatpush.bf16.msra.mxu2 %v4994_v59  ;;  %v5856_v42 = vld [vmem:[#allocation3 + $0x88] sm:$0xf0] }
  0x2d   :  { %v4977_v1 = vld [vmem:[#allocation5 + $0x240] sm:$0xf]  ;;  %v5969_v2 = vld [vmem:[#allocation5 + $0x24c] sm:$0xf0]  ;;  %v4850_v6 = vor.u32 %v5937_v0, %v4849_v62  ;;  %1946 = vmatpush.bf16.msra.mxu3 %v5122_v63  ;;  %v4790_v0 = vor.u32 %v5919_v56, %v4787_v57  ;;  %v5853_v43 = vld [vmem:[#allocation3 + $0x74] sm:$0xf] }
  0x2e   :  { %v5105_v3 = vld [vmem:[#allocation5 + $0x340] sm:$0xf]  ;;  %v6001_v4 = vld [vmem:[#allocation5 + $0x34c] sm:$0xf0]  ;;  %v4978_v7 = vor.u32 %v5969_v2, %v4977_v1  ;;  %1800 = vmatpush.bf16.msra.mxu0 %v4722_v5 }
  0x2f   :  { %v4705_v8 = vld [vmem:[#allocation5 + $0x20] sm:$0xf]  ;;  %v5901_v9 = vld [vmem:[#allocation5 + $0x2c] sm:$0xf0]  ;;  %v5106_v11 = vor.u32 %v6001_v4, %v5105_v3  ;;  %1849 = vmatpush.bf16.msra.mxu1 %v4850_v6 }
  0x30   :  { %v4833_v10 = vld [vmem:[#allocation5 + $0x120] sm:$0xf]  ;;  %v5933_v12 = vld [vmem:[#allocation5 + $0x12c] sm:$0xf0]  ;;  %v4706_v18 = vor.u32 %v5901_v9, %v4705_v8  ;;  %1898 = vmatpush.bf16.msra.mxu2 %v4978_v7 }
  0x31   :  { %v4961_v13 = vld [vmem:[#allocation5 + $0x220] sm:$0xf]  ;;  %v5965_v14 = vld [vmem:[#allocation5 + $0x22c] sm:$0xf0]  ;;  %v4834_v22 = vor.u32 %v5933_v12, %v4833_v10  ;;  %1947 = vmatpush.bf16.msra.mxu3 %v5106_v11  ;;  %v5915_v10 = vld [vmem:[#allocation5 + $0xa4] sm:$0xf] }
  0x32   :  { %v5089_v15 = vld [vmem:[#allocation5 + $0x320] sm:$0xf]  ;;  %v5997_v16 = vld [vmem:[#allocation5 + $0x32c] sm:$0xf0]  ;;  %v4962_v23 = vor.u32 %v5965_v14, %v4961_v13  ;;  %1801 = vmatpush.bf16.msra.mxu0 %v4706_v18  ;;  %v4771_v11 = vld [vmem:[#allocation5 + $0xb0] sm:$0xf0] }
  0x33   :  { %v4689_v17 = vld [vmem:[#allocation5] sm:$0xf]  ;;  %v5897_v19 = vld [vmem:[#allocation5 + $0xc] sm:$0xf0]  ;;  %v5090_v27 = vor.u32 %v5997_v16, %v5089_v15  ;;  %1850 = vmatpush.bf16.msra.mxu1 %v4834_v22  ;;  %v4774_v12 = vor.u32 %v5915_v10, %v4771_v11  ;;  %v5849_v18 = vld [vmem:[#allocation3 + $0x50] sm:$0xf0] }
  0x34   :  { %v4817_v20 = vld [vmem:[#allocation5 + $0x100] sm:$0xf]  ;;  %v5929_v21 = vld [vmem:[#allocation5 + $0x10c] sm:$0xf0]  ;;  %v4690_v35 = vor.u32 %v5897_v19, %v4689_v17  ;;  %1899 = vmatpush.bf16.msra.mxu2 %v4962_v23  ;;  %v4493_v17 = vld [vmem:[#allocation3 + $0x38] sm:$0xf] }
  0x35   :  { %v4945_v24 = vld [vmem:[#allocation5 + $0x200] sm:$0xf]  ;;  %v5961_v25 = vld [vmem:[#allocation5 + $0x20c] sm:$0xf0]  ;;  %v4818_v39 = vor.u32 %v5929_v21, %v4817_v20  ;;  %1948 = vmatpush.bf16.msra.mxu3 %v5090_v27  ;;  %v5846_v19 = vld [vmem:[#allocation3 + $0x3c] sm:$0xf] }
  0x36   :  { %v5073_v26 = vld [vmem:[#allocation5 + $0x300] sm:$0xf]  ;;  %v5993_v28 = vld [vmem:[#allocation5 + $0x30c] sm:$0xf0]  ;;  %v4946_v40 = vor.u32 %v5961_v25, %v4945_v24  ;;  %1802 = vmatpush.bf16.msra.mxu0 %v4690_v35  ;;  %v4495_v20 = vld [vmem:[#allocation3 + $0x54] sm:$0xf0]  ;;  %v6407_v25 = vor.u32 %v5849_v18, %v4493_v17 }
  0x37   :  { %v4465_v29 = vld [vmem:[#allocation3] sm:$0xf]  ;;  %v6117_v34 = vld [vmem:[#allocation5 + $0x6ec] sm:$0xf0]  ;;  %v5074_v44 = vor.u32 %v5993_v28, %v5073_v26  ;;  %1851 = vmatpush.bf16.msra.mxu1 %v4818_v39  ;;  %v5850_v22 = vld [vmem:[#allocation3 + $0x58] sm:$0xf0]  ;;  %v6409_v26 = vor.u32 %v5846_v19, %v4495_v20 }
  0x38   :  { %v4467_v32 = vld [vmem:[#allocation3 + $0x1c] sm:$0xf0]  ;;  %v6053_v47 = vld [vmem:[#allocation5 + $0x4ec] sm:$0xf0]  ;;  %v6395_v49 = vor.u32 %v5842_v30, %v4465_v29  ;;  %1900 = vmatpush.bf16.msra.mxu2 %v4946_v40  ;;  %v5847_v23 = vld [vmem:[#allocation3 + $0x44] sm:$0xf] }
  0x39   :  { %v5569_v33 = vld [vmem:[#allocation5 + $0x6e0] sm:$0xf]  ;;  %v6085_v51 = vld [vmem:[#allocation5 + $0x5ec] sm:$0xf0]  ;;  %v6397_v54 = vor.u32 %v5839_v31, %v4467_v32  ;;  %1949 = vmatpush.bf16.msra.mxu3 %v5074_v44  ;;  %7582 = vst [vmem:[#allocation15_spill] sm:$0xff] %v6407_v25 }
  0x3a   :  { %v5570_v45 = vor.u32 %v6117_v34, %v5569_v33  ;;  %v5313_v46 = vld [vmem:[#allocation5 + $0x4e0] sm:$0xf]  ;;  %7580 = vst [vmem:[#allocation13_spill] sm:$0xff] %v6395_v49  ;;  %v6113_v53 = vld [vmem:[#allocation5 + $0x6cc] sm:$0xf0]  ;;  %1803 = vmatmul.bf16.vlgmr.msra.gmra.mxu0 %v6395_v49 }
  0x3b   :  { %v5441_v48 = vld [vmem:[#allocation5 + $0x5e0] sm:$0xf]  ;;  %7581 = vst [vmem:[#allocation14_spill] sm:$0xff] %v6397_v54  ;;  %v5314_v59 = vor.u32 %v6053_v47, %v5313_v46  ;;  %v6049_v63 = vld [vmem:[#allocation5 + $0x4cc] sm:$0xf0]  ;;  %1852 = vmatmul.bf16.vlgmr.msra.gmra.mxu1 %v6397_v54  ;;  %1901 = vmatmul.bf16.vlgmr.msra.gmra.mxu2 %v6399_v55 }
  0x3c   :  { %v5553_v52 = vld [vmem:[#allocation5 + $0x6c0] sm:$0xf]  ;;  %2089 = vmatpush.bf16.msrb.mxu2 %v5570_v45  ;;  %v5442_v60 = vor.u32 %v6085_v51, %v5441_v48  ;;  %v6081_v2 = vld [vmem:[#allocation5 + $0x5cc] sm:$0xf0]  ;;  %1950 = vmatmul.bf16.vlgmr.msra.gmra.mxu3 %v6401_v58  ;;  %7583 = vst [vmem:[#allocation16_spill] sm:$0xff] %v6409_v26 }
  0x3d   :  { %v5554_v61 = vor.u32 %v6113_v53, %v5553_v52  ;;  %v5297_v62 = vld [vmem:[#allocation5 + $0x4c0] sm:$0xf]  ;;  %2138 = vmatpush.bf16.msrb.mxu3 %v4806_v50  ;;  %1991 = vmatpush.bf16.msrb.mxu0 %v5314_v59  ;;  %v6109_v5 = vld [vmem:[#allocation5 + $0x6ac] sm:$0xf0]  ;;  %v5911_v34 = vld [vmem:[#allocation5 + $0x84] sm:$0xf] }
  0x3e   :  { %v5425_v1 = vld [vmem:[#allocation5 + $0x5c0] sm:$0xf]  ;;  %v5298_v3 = vor.u32 %v6049_v63, %v5297_v62  ;;  %2040 = vmatpush.bf16.msrb.mxu1 %v5442_v60  ;;  %v6045_v9 = vld [vmem:[#allocation5 + $0x4ac] sm:$0xf0]  ;;  %v4755_v35 = vld [vmem:[#allocation5 + $0x90] sm:$0xf0] }
  0x3f   :  { %v5537_v4 = vld [vmem:[#allocation5 + $0x6a0] sm:$0xf]  ;;  %v5426_v7 = vor.u32 %v6081_v2, %v5425_v1  ;;  %v6077_v14 = vld [vmem:[#allocation5 + $0x5ac] sm:$0xf0]  ;;  %v4758_v37 = vor.u32 %v5911_v34, %v4755_v35  ;;  %v4529_v45 = vld [vmem:[#allocation3 + $0x78] sm:$0xf] }
  0x40   :  { %v5281_v6 = vld [vmem:[#allocation5 + $0x4a0] sm:$0xf]  ;;  %2090 = vmatpush.bf16.msrb.mxu2 %v5554_v61  ;;  %v5538_v8 = vor.u32 %v6109_v5, %v5537_v4  ;;  %v6105_v30 = vld [vmem:[#allocation5 + $0x68c] sm:$0xf0]  ;;  %v5857_v46 = vld [vmem:[#allocation3 + $0x90] sm:$0xf0] }
  0x41   :  { %2139 = vmatpush.bf16.msrb.mxu3 %v4790_v0  ;;  %v5409_v13 = vld [vmem:[#allocation5 + $0x5a0] sm:$0xf]  ;;  %1992 = vmatpush.bf16.msrb.mxu0 %v5298_v3  ;;  %v5282_v15 = vor.u32 %v6045_v9, %v5281_v6  ;;  %v6041_v33 = vld [vmem:[#allocation5 + $0x48c] sm:$0xf0]  ;;  %v5854_v47 = vld [vmem:[#allocation3 + $0x7c] sm:$0xf]  ;;  %v6423_v52 = vor.u32 %v5857_v46, %v4529_v45 }
  0x42   :  { %2041 = vmatpush.bf16.msrb.mxu1 %v5426_v7  ;;  %v5410_v16 = vor.u32 %v6077_v14, %v5409_v13  ;;  %v4501_v21 = vld [vmem:[#allocation3 + $0x40] sm:$0xf]  ;;  %v6073_v39 = vld [vmem:[#allocation5 + $0x58c] sm:$0xf0]  ;;  %v4531_v48 = vld [vmem:[#allocation3 + $0x94] sm:$0xf0] }
  0x43   :  { %v4503_v24 = vld [vmem:[#allocation3 + $0x5c] sm:$0xf0]  ;;  %v6411_v27 = vor.u32 %v5850_v22, %v4501_v21  ;;  %v4521_v41 = vld [vmem:[#allocation3 + $0x70] sm:$0xf]  ;;  %v6425_v53 = vor.u32 %v5854_v47, %v4531_v48  ;;  %v5907_v62 = vld [vmem:[#allocation5 + $0x64] sm:$0xf] }
  0x44   :  { %2091 = vmatpush.bf16.msrb.mxu2 %v5538_v8  ;;  %v6413_v28 = vor.u32 %v5847_v23, %v4503_v24  ;;  %v5521_v29 = vld [vmem:[#allocation5 + $0x680] sm:$0xf]  ;;  %v4523_v44 = vld [vmem:[#allocation3 + $0x8c] sm:$0xf0]  ;;  %v6419_v50 = vor.u32 %v5856_v42, %v4521_v41  ;;  %v4739_v63 = vld [vmem:[#allocation5 + $0x70] sm:$0xf0] }
  0x45   :  { %2140 = vmatpush.bf16.msrb.mxu3 %v4774_v12  ;;  %1993 = vmatpush.bf16.msrb.mxu0 %v5282_v15  ;;  %v5265_v31 = vld [vmem:[#allocation5 + $0x480] sm:$0xf]  ;;  %v5522_v32 = vor.u32 %v6105_v30, %v5521_v29  ;;  %v6421_v51 = vor.u32 %v5853_v43, %v4523_v44  ;;  %v6101_v57 = vld [vmem:[#allocation5 + $0x66c] sm:$0xf0]  ;;  %v4742_v1 = vor.u32 %v5907_v62, %v4739_v63  ;;  %v4549_v5 = vld [vmem:[#allocation3 + $0xa8] sm:$0xf] }
  0x46   :  { %2042 = vmatpush.bf16.msrb.mxu1 %v5410_v16  ;;  %v5266_v36 = vor.u32 %v6041_v33, %v5265_v31  ;;  %v5393_v38 = vld [vmem:[#allocation5 + $0x580] sm:$0xf]  ;;  %7584 = vst [vmem:[#allocation17_spill] sm:$0xff] %v6419_v50  ;;  %v6037_v61 = vld [vmem:[#allocation5 + $0x46c] sm:$0xf0] }
  0x47   :  { %v5394_v40 = vor.u32 %v6073_v39, %v5393_v38  ;;  %7585 = vst [vmem:[#allocation18_spill] sm:$0xff] %v6421_v51  ;;  %v5505_v56 = vld [vmem:[#allocation5 + $0x660] sm:$0xf]  ;;  %v6069_v3 = vld [vmem:[#allocation5 + $0x56c] sm:$0xf0] }
  0x48   :  { %2092 = vmatpush.bf16.msrb.mxu2 %v5522_v32  ;;  %v5249_v59 = vld [vmem:[#allocation5 + $0x460] sm:$0xf]  ;;  %v5506_v60 = vor.u32 %v6101_v57, %v5505_v56  ;;  %v5863_v6 = vld [vmem:[#allocation3 + $0xc0] sm:$0xf0]  ;;  %v5860_v7 = vld [vmem:[#allocation3 + $0xac] sm:$0xf] }
  0x49   :  { %1994 = vmatpush.bf16.msrb.mxu0 %v5266_v36  ;;  %2141 = vmatpush.bf16.msrb.mxu3 %v4758_v37  ;;  %v5250_v0 = vor.u32 %v6037_v61, %v5249_v59  ;;  %v5377_v2 = vld [vmem:[#allocation5 + $0x560] sm:$0xf]  ;;  %v4551_v8 = vld [vmem:[#allocation3 + $0xc4] sm:$0xf0]  ;;  %v4557_v9 = vld [vmem:[#allocation3 + $0xb0] sm:$0xf]  ;;  %v6431_v13 = vor.u32 %v5863_v6, %v4549_v5 }
  0x4a   :  { %1808 = vmatmul.bf16.gmra.mxu0 %v6407_v25  ;;  %2043 = vmatpush.bf16.msrb.mxu1 %v5394_v40  ;;  %v5378_v4 = vor.u32 %v6069_v3, %v5377_v2  ;;  %v5864_v10 = vld [vmem:[#allocation3 + $0xc8] sm:$0xf0]  ;;  %v5861_v11 = vld [vmem:[#allocation3 + $0xb4] sm:$0xf]  ;;  %v4559_v12 = vld [vmem:[#allocation3 + $0xcc] sm:$0xf0]  ;;  %v6433_v14 = vor.u32 %v5860_v7, %v4551_v8 }
  0x4b   :  { %1857 = vmatmul.bf16.gmra.mxu1 %v6409_v26  ;;  %1906 = vmatmul.bf16.gmra.mxu2 %v6411_v27  ;;  %7586 = vst [vmem:[#allocation19_spill] sm:$0xff] %v6431_v13  ;;  %v6435_v15 = vor.u32 %v5864_v10, %v4557_v9  ;;  %v6437_v16 = vor.u32 %v5861_v11, %v4559_v12  ;;  %v5489_v17 = vld [vmem:[#allocation5 + $0x640] sm:$0xf]  ;;  %v6097_v18 = vld [vmem:[#allocation5 + $0x64c] sm:$0xf0] }
  0x4c   :  { %1955 = vmatmul.bf16.gmra.mxu3 %v6413_v28  ;;  %2093 = vmatpush.bf16.msrb.mxu2 %v5506_v60  ;;  %7587 = vst [vmem:[#allocation20_spill] sm:$0xff] %v6433_v14  ;;  %v5233_v19 = vld [vmem:[#allocation5 + $0x440] sm:$0xf]  ;;  %v5490_v20 = vor.u32 %v6097_v18, %v5489_v17  ;;  %v6033_v21 = vld [vmem:[#allocation5 + $0x44c] sm:$0xf0] }
  0x4d   :  { %1995 = vmatpush.bf16.msrb.mxu0 %v5250_v0  ;;  %2142 = vmatpush.bf16.msrb.mxu3 %v4742_v1  ;;  %v5903_v22 = vld [vmem:[#allocation5 + $0x44] sm:$0xf]  ;;  %v4723_v23 = vld [vmem:[#allocation5 + $0x50] sm:$0xf0]  ;;  %v5234_v24 = vor.u32 %v6033_v21, %v5233_v19  ;;  %v5361_v30 = vld [vmem:[#allocation5 + $0x540] sm:$0xf] }
  0x4e   :  { %2044 = vmatpush.bf16.msrb.mxu1 %v5378_v4  ;;  %v4726_v29 = vor.u32 %v5903_v22, %v4723_v23  ;;  %v6065_v31 = vld [vmem:[#allocation5 + $0x54c] sm:$0xf0]  ;;  %v4577_v33 = vld [vmem:[#allocation3 + $0xe0] sm:$0xf]  ;;  %v5870_v34 = vld [vmem:[#allocation3 + $0xf8] sm:$0xf0] }
  0x4f   :  { %v5362_v32 = vor.u32 %v6065_v31, %v5361_v30  ;;  %v5867_v35 = vld [vmem:[#allocation3 + $0xe4] sm:$0xf]  ;;  %v4579_v36 = vld [vmem:[#allocation3 + $0xfc] sm:$0xf0]  ;;  %v4585_v37 = vld [vmem:[#allocation3 + $0xe8] sm:$0xf]  ;;  %v6443_v41 = vor.u32 %v5870_v34, %v4577_v33 }
  0x50   :  { %2094 = vmatpush.bf16.msrb.mxu2 %v5490_v20  ;;  %v5871_v38 = vld [vmem:[#allocation3 + $0x100] sm:$0xf0]  ;;  %v5868_v39 = vld [vmem:[#allocation3 + $0xec] sm:$0xf]  ;;  %v4587_v40 = vld [vmem:[#allocation3 + $0x104] sm:$0xf0]  ;;  %v6445_v42 = vor.u32 %v5867_v35, %v4579_v36 }
  0x51   :  { %1996 = vmatpush.bf16.msrb.mxu0 %v5234_v24  ;;  %2143 = vmatpush.bf16.msrb.mxu3 %v4726_v29  ;;  %7588 = vst [vmem:[#allocation21_spill] sm:$0xff] %v6443_v41  ;;  %v6447_v43 = vor.u32 %v5871_v38, %v4585_v37  ;;  %v6449_v44 = vor.u32 %v5868_v39, %v4587_v40  ;;  %v5473_v45 = vld [vmem:[#allocation5 + $0x620] sm:$0xf]  ;;  %v6093_v46 = vld [vmem:[#allocation5 + $0x62c] sm:$0xf0] }
  0x52   :  { %2045 = vmatpush.bf16.msrb.mxu1 %v5362_v32  ;;  %7589 = vst [vmem:[#allocation22_spill] sm:$0xff] %v6445_v42  ;;  %v5217_v47 = vld [vmem:[#allocation5 + $0x420] sm:$0xf]  ;;  %v5474_v48 = vor.u32 %v6093_v46, %v5473_v45  ;;  %v6029_v56 = vld [vmem:[#allocation5 + $0x42c] sm:$0xf0] }
  0x53   :  { %v5899_v57 = vld [vmem:[#allocation5 + $0x24] sm:$0xf]  ;;  %v4707_v59 = vld [vmem:[#allocation5 + $0x30] sm:$0xf0]  ;;  %v5218_v60 = vor.u32 %v6029_v56, %v5217_v47  ;;  %v5345_v62 = vld [vmem:[#allocation5 + $0x520] sm:$0xf] }
  0x54   :  { %v4710_v61 = vor.u32 %v5899_v57, %v4707_v59  ;;  %v6061_v63 = vld [vmem:[#allocation5 + $0x52c] sm:$0xf0]  ;;  %2095 = vmatpush.bf16.msrb.mxu2 %v5474_v48  ;;  %v4605_v1 = vld [vmem:[#allocation3 + $0x118] sm:$0xf]  ;;  %v5877_v2 = vld [vmem:[#allocation3 + $0x130] sm:$0xf0] }
  0x55   :  { %v5346_v0 = vor.u32 %v6061_v63, %v5345_v62  ;;  %1997 = vmatpush.bf16.msrb.mxu0 %v5218_v60  ;;  %v5874_v3 = vld [vmem:[#allocation3 + $0x11c] sm:$0xf]  ;;  %v4607_v4 = vld [vmem:[#allocation3 + $0x134] sm:$0xf0]  ;;  %v4613_v5 = vld [vmem:[#allocation3 + $0x120] sm:$0xf]  ;;  %v6455_v9 = vor.u32 %v5877_v2, %v4605_v1 }
  0x56   :  { %2144 = vmatpush.bf16.msrb.mxu3 %v4710_v61  ;;  %v5878_v6 = vld [vmem:[#allocation3 + $0x138] sm:$0xf0]  ;;  %v5875_v7 = vld [vmem:[#allocation3 + $0x124] sm:$0xf]  ;;  %v4615_v8 = vld [vmem:[#allocation3 + $0x13c] sm:$0xf0]  ;;  %v6457_v10 = vor.u32 %v5874_v3, %v4607_v4 }
  0x57   :  { %2046 = vmatpush.bf16.msrb.mxu1 %v5346_v0  ;;  %7590 = vst [vmem:[#allocation23_spill] sm:$0xff] %v6455_v9  ;;  %v6459_v11 = vor.u32 %v5878_v6, %v4613_v5  ;;  %v6461_v12 = vor.u32 %v5875_v7, %v4615_v8  ;;  %v5457_v17 = vld [vmem:[#allocation5 + $0x600] sm:$0xf]  ;;  %v6089_v18 = vld [vmem:[#allocation5 + $0x60c] sm:$0xf0] }
  0x58   :  { %7591 = vst [vmem:[#allocation24_spill] sm:$0xff] %v6457_v10  ;;  %v5201_v19 = vld [vmem:[#allocation5 + $0x400] sm:$0xf]  ;;  %v5458_v20 = vor.u32 %v6089_v18, %v5457_v17  ;;  %v6025_v21 = vld [vmem:[#allocation5 + $0x40c] sm:$0xf0] }
  0x59   :  { %v5895_v22 = vld [vmem:[#allocation5 + $0x4] sm:$0xf]  ;;  %v4691_v23 = vld [vmem:[#allocation5 + $0x10] sm:$0xf0]  ;;  %v5202_v24 = vor.u32 %v6025_v21, %v5201_v19  ;;  %v5329_v30 = vld [vmem:[#allocation5 + $0x500] sm:$0xf] }
  0x5a   :  { %1813 = vmatmul.bf16.gmra.mxu0 %v6419_v50  ;;  %v4694_v29 = vor.u32 %v5895_v22, %v4691_v23  ;;  %v6057_v31 = vld [vmem:[#allocation5 + $0x50c] sm:$0xf0]  ;;  %2096 = vmatpush.bf16.msrb.mxu2 %v5458_v20  ;;  %v5884_v34 = vld [vmem:[#allocation3 + $0x168] sm:$0xf0]  ;;  %v5881_v35 = vld [vmem:[#allocation3 + $0x154] sm:$0xf] }
  0x5b   :  { %1862 = vmatmul.bf16.gmra.mxu1 %v6421_v51  ;;  %1911 = vmatmul.bf16.gmra.mxu2 %v6423_v52  ;;  %v5330_v32 = vor.u32 %v6057_v31, %v5329_v30  ;;  %v4633_v33 = vld [vmem:[#allocation3 + $0x150] sm:$0xf]  ;;  %v4641_v37 = vld [vmem:[#allocation3 + $0x158] sm:$0xf]  ;;  %v5885_v38 = vld [vmem:[#allocation3 + $0x170] sm:$0xf0] }
  0x5c   :  { %1960 = vmatmul.bf16.gmra.mxu3 %v6425_v53  ;;  %1998 = vmatpush.bf16.msrb.mxu0 %v5202_v24  ;;  %v4635_v36 = vld [vmem:[#allocation3 + $0x16c] sm:$0xf0]  ;;  %v5882_v39 = vld [vmem:[#allocation3 + $0x15c] sm:$0xf]  ;;  %v4643_v40 = vld [vmem:[#allocation3 + $0x174] sm:$0xf0]  ;;  %v6467_v45 = vor.u32 %v5884_v34, %v4633_v33  ;;  %v6471_v47 = vor.u32 %v5885_v38, %v4641_v37 }
  0x5d   :  { %2145 = vmatpush.bf16.msrb.mxu3 %v4694_v29  ;;  %2047 = vmatpush.bf16.msrb.mxu1 %v5330_v32  ;;  %v6469_v46 = vor.u32 %v5881_v35, %v4635_v36  ;;  %v6473_v48 = vor.u32 %v5882_v39, %v4643_v40  ;;  %v6019_v56 = vld [vmem:[#allocation5 + $0x3e4] sm:$0xf]  ;;  %v5187_v57 = vld [vmem:[#allocation5 + $0x3f0] sm:$0xf0]  ;;  %v4661_v5 = vld [vmem:[#allocation3 + $0x188] sm:$0xf] }
  0x5e   :  { %7592 = vst [vmem:[#allocation25_spill] sm:$0xff] %v6467_v45  ;;  %v5955_v59 = vld [vmem:[#allocation5 + $0x1e4] sm:$0xf]  ;;  %v5190_v60 = vor.u32 %v6019_v56, %v5187_v57  ;;  %v4931_v61 = vld [vmem:[#allocation5 + $0x1f0] sm:$0xf0] }
  0x5f   :  { %7593 = vst [vmem:[#allocation26_spill] sm:$0xff] %v6469_v46  ;;  %v6051_v62 = vld [vmem:[#allocation5 + $0x4e4] sm:$0xf]  ;;  %v5315_v63 = vld [vmem:[#allocation5 + $0x4f0] sm:$0xf0]  ;;  %v4934_v0 = vor.u32 %v5955_v59, %v4931_v61 }
  0x60   :  { %7594 = vst [vmem:[#allocation27_spill] sm:$0xff] %v6471_v47  ;;  %v5318_v1 = vor.u32 %v6051_v62, %v5315_v63  ;;  %2285 = vmatpush.bf16.msra.mxu2 %v5190_v60  ;;  %v5987_v2 = vld [vmem:[#allocation5 + $0x2e4] sm:$0xf]  ;;  %v5059_v3 = vld [vmem:[#allocation5 + $0x2f0] sm:$0xf0] }
  0x61   :  { %7595 = vst [vmem:[#allocation28_spill] sm:$0xff] %v6473_v48  ;;  %2187 = vmatpush.bf16.msra.mxu0 %v4934_v0  ;;  %v5062_v4 = vor.u32 %v5987_v2, %v5059_v3  ;;  %v5891_v6 = vld [vmem:[#allocation3 + $0x1a0] sm:$0xf0]  ;;  %v5888_v7 = vld [vmem:[#allocation3 + $0x18c] sm:$0xf] }
  0x62   :  { %2334 = vmatpush.bf16.msra.mxu3 %v5318_v1  ;;  %v4663_v8 = vld [vmem:[#allocation3 + $0x1a4] sm:$0xf0]  ;;  %v4669_v17 = vld [vmem:[#allocation3 + $0x190] sm:$0xf]  ;;  %v5892_v18 = vld [vmem:[#allocation3 + $0x1a8] sm:$0xf0]  ;;  %v6479_v21 = vor.u32 %v5891_v6, %v4661_v5 }
  0x63   :  { %2236 = vmatpush.bf16.msra.mxu1 %v5062_v4  ;;  %v5889_v19 = vld [vmem:[#allocation3 + $0x194] sm:$0xf]  ;;  %v4671_v20 = vld [vmem:[#allocation3 + $0x1ac] sm:$0xf0]  ;;  %v6481_v22 = vor.u32 %v5888_v7, %v4663_v8  ;;  %v6483_v23 = vor.u32 %v5892_v18, %v4669_v17  ;;  %v6015_v29 = vld [vmem:[#allocation5 + $0x3c4] sm:$0xf] }
  0x64   :  { %7596 = vst [vmem:[#allocation29_spill] sm:$0xff] %v6479_v21  ;;  %v6485_v24 = vor.u32 %v5889_v19, %v4671_v20  ;;  %v5171_v30 = vld [vmem:[#allocation5 + $0x3d0] sm:$0xf0]  ;;  %v5951_v31 = vld [vmem:[#allocation5 + $0x1c4] sm:$0xf] }
  0x65   :  { %7597 = vst [vmem:[#allocation30_spill] sm:$0xff] %v6481_v22  ;;  %v5174_v32 = vor.u32 %v6015_v29, %v5171_v30  ;;  %v4915_v33 = vld [vmem:[#allocation5 + $0x1d0] sm:$0xf0]  ;;  %v6047_v34 = vld [vmem:[#allocation5 + $0x4c4] sm:$0xf] }
  0x66   :  { %7598 = vst [vmem:[#allocation31_spill] sm:$0xff] %v6483_v23  ;;  %v5299_v35 = vld [vmem:[#allocation5 + $0x4d0] sm:$0xf0]  ;;  %v4918_v36 = vor.u32 %v5951_v31, %v4915_v33  ;;  %v377_v38 = vld [vmem:[#allocation7] sm:$0xf] }
  0x67   :  { %7599 = vst [vmem:[#allocation32_spill] sm:$0xff] %v6485_v24  ;;  %v5302_v37 = vor.u32 %v6047_v34, %v5299_v35  ;;  %2286 = vmatpush.bf16.msra.mxu2 %v5174_v32  ;;  %v5983_v39 = vld [vmem:[#allocation5 + $0x2c4] sm:$0xf]  ;;  %v5043_v40 = vld [vmem:[#allocation5 + $0x2d0] sm:$0xf0]  ;;  %v6491_v56 = vperm.slane %v377_v38, 0 }
  0x68   :  { %2188 = vmatpush.bf16.msra.mxu0 %v4918_v36  ;;  %v5046_v57 = vor.u32 %v5983_v39, %v5043_v40  ;;  %v4481_v59 = vld [vmem:[#allocation3 + $0x10] sm:$0xf]  ;;  %v5844_v60 = vld [vmem:[#allocation3 + $0x28] sm:$0xf0]  ;;  %v5841_v61 = vld [vmem:[#allocation3 + $0x14] sm:$0xf] }
  0x69   :  { %2335 = vmatpush.bf16.msra.mxu3 %v5302_v37  ;;  %v4483_v62 = vld [vmem:[#allocation3 + $0x2c] sm:$0xf0]  ;;  %v4489_v63 = vld [vmem:[#allocation3 + $0x18] sm:$0xf]  ;;  %v5845_v0 = vld [vmem:[#allocation3 + $0x30] sm:$0xf0]  ;;  %v6493_v1 = vor.u32 %v5844_v60, %v4481_v59 }
  0x6a   :  { %1818 = vmatmul.bf16.gmra.mxu0 %v6431_v13  ;;  %2237 = vmatpush.bf16.msra.mxu1 %v5046_v57  ;;  %v6495_v3 = vor.u32 %v5841_v61, %v4483_v62  ;;  %v6497_v4 = vor.u32 %v5845_v0, %v4489_v63  ;;  %v6011_v8 = vld [vmem:[#allocation5 + $0x3a4] sm:$0xf]  ;;  %v5155_v17 = vld [vmem:[#allocation5 + $0x3b0] sm:$0xf0]  ;;  %v4509_v61 = vld [vmem:[#allocation3 + $0x48] sm:$0xf] }
  0x6b   :  { %1867 = vmatmul.bf16.gmra.mxu1 %v6433_v14  ;;  %1916 = vmatmul.bf16.gmra.mxu2 %v6435_v15  ;;  %v5947_v18 = vld [vmem:[#allocation5 + $0x1a4] sm:$0xf]  ;;  %v5158_v19 = vor.u32 %v6011_v8, %v5155_v17  ;;  %v4899_v20 = vld [vmem:[#allocation5 + $0x1b0] sm:$0xf0]  ;;  %v5848_v63 = vld [vmem:[#allocation3 + $0x4c] sm:$0xf] }
  0x6c   :  { %1965 = vmatmul.bf16.gmra.mxu3 %v6437_v16  ;;  %7600 = vst [vmem:[#allocation33_spill] sm:$0xff] %v6495_v3  ;;  %v6043_v29 = vld [vmem:[#allocation5 + $0x4a4] sm:$0xf]  ;;  %v5283_v30 = vld [vmem:[#allocation5 + $0x4b0] sm:$0xf0]  ;;  %v4902_v32 = vor.u32 %v5947_v18, %v4899_v20 }
  0x6d   :  { %7601 = vst [vmem:[#allocation34_spill] sm:$0xff] %v6497_v4  ;;  %v5286_v33 = vor.u32 %v6043_v29, %v5283_v30  ;;  %2287 = vmatpush.bf16.msra.mxu2 %v5158_v19  ;;  %v5979_v40 = vld [vmem:[#allocation5 + $0x2a4] sm:$0xf]  ;;  %v5027_v57 = vld [vmem:[#allocation5 + $0x2b0] sm:$0xf0] }
  0x6e   :  { %2189 = vmatpush.bf16.msra.mxu0 %v4902_v32  ;;  %v5030_v60 = vor.u32 %v5979_v40, %v5027_v57  ;;  %v5851_v62 = vld [vmem:[#allocation3 + $0x60] sm:$0xf0]  ;;  %v4511_v0 = vld [vmem:[#allocation3 + $0x64] sm:$0xf0]  ;;  %v5267_v40 = vld [vmem:[#allocation5 + $0x490] sm:$0xf0] }
  0x6f   :  { %2336 = vmatpush.bf16.msra.mxu3 %v5286_v33  ;;  %v6509_v19 = vor.u32 %v5848_v63, %v4511_v0  ;;  %v6007_v33 = vld [vmem:[#allocation5 + $0x384] sm:$0xf] }
  0x70   :  { %2238 = vmatpush.bf16.msra.mxu1 %v5030_v60 }
  0x71   :  { %7602 = vst [vmem:[#allocation35_spill] sm:$0xff] %v6509_v19 }
  0x7a   :  { %1823 = vmatmul.bf16.gmra.mxu0 %v6443_v41 }
  0x7b   :  { %1872 = vmatmul.bf16.gmra.mxu1 %v6445_v42  ;;  %1921 = vmatmul.bf16.gmra.mxu2 %v6447_v43 }
  0x7c   :  { %1970 = vmatmul.bf16.gmra.mxu3 %v6449_v44 }
  0x8a   :  { %1828 = vmatmul.bf16.gmra.mxu0 %v6455_v9 }
  0x8b   :  { %1877 = vmatmul.bf16.gmra.mxu1 %v6457_v10  ;;  %1926 = vmatmul.bf16.gmra.mxu2 %v6459_v11 }
  0x8c   :  { %1975 = vmatmul.bf16.gmra.mxu3 %v6461_v12 }
  0x9a   :  { %1833 = vmatmul.bf16.gmra.mxu0 %v6467_v45 }
  0x9b   :  { %1882 = vmatmul.bf16.gmra.mxu1 %v6469_v46  ;;  %1931 = vmatmul.bf16.gmra.mxu2 %v6471_v47 }
  0x9c   :  { %1980 = vmatmul.bf16.gmra.mxu3 %v6473_v48 }
  0xaa   :  { %1838 = vmatmul.bf16.gmra.mxu0 %v6479_v21 }
  0xab   :  { %1887 = vmatmul.bf16.gmra.mxu1 %v6481_v22  ;;  %1936 = vmatmul.bf16.gmra.mxu2 %v6483_v23  ;;  %v5571_v23 = vld [vmem:[#allocation5 + $0x6f0] sm:$0xf0]  ;;  %v4679_v22 = vld [vmem:[#allocation3 + $0x1b4] sm:$0xf0] }
  0xac   :  { %1985 = vmatmul.bf16.gmra.mxu3 %v6485_v24  ;;  %v5883_v24 = vld [vmem:[#allocation3 + $0x164] sm:$0xf] }
  0xb7   :  { %v1804_v2 = vpop.f32.mrf.mxu0 }
  0xb8   :  { %v1805_v5 = vadd.f32 %v1804_v2, %v6491_v56  ;;  %v1853_v6 = vpop.f32.mrf.mxu1  ;;  %v4517_v2 = vld [vmem:[#allocation3 + $0x50] sm:$0xf] }
  0xba   :  { %v1854_v7 = vadd.f32 %v1853_v6, %v1805_v5  ;;  %1999 = vmatmul.bf16.vlgmr.msrb.gmra.mxu0 %v6493_v1  ;;  %v5852_v5 = vld [vmem:[#allocation3 + $0x68] sm:$0xf0] }
  0xbb   :  { %2048 = vmatmul.bf16.vlgmr.msrb.gmra.mxu1 %v6495_v3  ;;  %2097 = vmatmul.bf16.vlgmr.msrb.gmra.mxu2 %v6497_v4  ;;  %v6511_v20 = vor.u32 %v5852_v5, %v4517_v2  ;;  %v5876_v4 = vld [vmem:[#allocation3 + $0x12c] sm:$0xf]  ;;  %v5886_v3 = vld [vmem:[#allocation3 + $0x178] sm:$0xf0] }
  0xbc   :  { %2146 = vmatmul.bf16.vlgmr.msrb.gmra.mxu3 %v6395_v49  ;;  %v5879_v49 = vld [vmem:[#allocation3 + $0x140] sm:$0xf0] }
  0xbd   :  { %7603 = vst [vmem:[#allocation36_spill] sm:$0xff] %v6511_v20 }
  0xbe   :  { %v1902_v31 = vpop.f32.mrf.mxu2 }
  0xbf   :  { %v1903_v34 = vadd.f32 %v1902_v31, %v1854_v7  ;;  %v1951_v35 = vpop.f32.mrf.mxu3  ;;  %v1806_v36 = vpop.f32.mrf.mxu0  ;;  %v6507_v7 = vor.u32 %v5851_v62, %v4509_v61 }
  0xc0   :  { %v1807_v37 = vadd.f32 %v1806_v36, %v6491_v56  ;;  %v1855_v38 = vpop.f32.mrf.mxu1 }
  0xc1   :  { %v6505_v39 = vadd.f32 %v1951_v35, %v1903_v34  ;;  %v5139_v34 = vld [vmem:[#allocation5 + $0x390] sm:$0xf0]  ;;  %v5943_v35 = vld [vmem:[#allocation5 + $0x184] sm:$0xf] }
  0xc2   :  { %v1856_v59 = vadd.f32 %v1855_v38, %v1807_v37  ;;  %v5142_v36 = vor.u32 %v6007_v33, %v5139_v34  ;;  %v4883_v37 = vld [vmem:[#allocation5 + $0x190] sm:$0xf0]  ;;  %v6039_v38 = vld [vmem:[#allocation5 + $0x484] sm:$0xf]  ;;  %v4539_v34 = vld [vmem:[#allocation3 + $0x9c] sm:$0xf0] }
  0xc3   :  { %v5270_v60 = vor.u32 %v6039_v38, %v5267_v40  ;;  %v5855_v33 = vld [vmem:[#allocation3 + $0x84] sm:$0xf] }
  0xc4   :  { %2288 = vmatpush.bf16.msra.mxu2 %v5142_v36 }
  0xc5   :  { %2337 = vmatpush.bf16.msra.mxu3 %v5270_v60 }
  0xc6   :  { %v1904_v6 = vpop.f32.mrf.mxu2 }
  0xc7   :  { %v1905_v8 = vadd.f32 %v1904_v6, %v1856_v59  ;;  %v1953_v17 = vpop.f32.mrf.mxu3  ;;  %v1809_v18 = vpop.f32.mrf.mxu0  ;;  %v4886_v59 = vor.u32 %v5943_v35, %v4883_v37  ;;  %v5975_v6 = vld [vmem:[#allocation5 + $0x284] sm:$0xf]  ;;  %v4545_v35 = vld [vmem:[#allocation3 + $0x88] sm:$0xf] }
  0xc8   :  { %v1810_v29 = vadd.f32 %v1809_v18, %v6491_v56  ;;  %v1858_v30 = vpop.f32.mrf.mxu1 }
  0xc9   :  { %v6514_v31 = vadd.f32 %v1953_v17, %v1905_v8  ;;  %2190 = vmatpush.bf16.msra.mxu0 %v4886_v59  ;;  %v5011_v8 = vld [vmem:[#allocation5 + $0x290] sm:$0xf0]  ;;  %v6525_v59 = vor.u32 %v5855_v33, %v4539_v34 }
  0xca   :  { %v1859_v32 = vadd.f32 %v1858_v30, %v1810_v29  ;;  %2004 = vmatmul.bf16.gmra.mxu0 %v6507_v7  ;;  %v5014_v18 = vor.u32 %v5975_v6, %v5011_v8  ;;  %v4537_v29 = vld [vmem:[#allocation3 + $0x80] sm:$0xf]  ;;  %v5858_v30 = vld [vmem:[#allocation3 + $0x98] sm:$0xf0]  ;;  %v5123_v6 = vld [vmem:[#allocation5 + $0x370] sm:$0xf0] }
  0xcb   :  { %2053 = vmatmul.bf16.gmra.mxu1 %v6509_v19  ;;  %2102 = vmatmul.bf16.gmra.mxu2 %v6511_v20  ;;  %v6523_v36 = vor.u32 %v5858_v30, %v4537_v29  ;;  %7604 = vst [vmem:[#allocation37_spill] sm:$0xff] %v6525_v59  ;;  %v5939_v8 = vld [vmem:[#allocation5 + $0x164] sm:$0xf]  ;;  %v5251_v30 = vld [vmem:[#allocation5 + $0x470] sm:$0xf0] }
  0xcc   :  { %2151 = vmatmul.bf16.gmra.mxu3 %v6407_v25  ;;  %2239 = vmatpush.bf16.msra.mxu1 %v5014_v18  ;;  %v4867_v18 = vld [vmem:[#allocation5 + $0x170] sm:$0xf0]  ;;  %v6035_v29 = vld [vmem:[#allocation5 + $0x464] sm:$0xf]  ;;  %v5862_v25 = vld [vmem:[#allocation3 + $0xbc] sm:$0xf] }
  0xcd   :  { %v4870_v34 = vor.u32 %v5939_v8, %v4867_v18  ;;  %v4567_v8 = vld [vmem:[#allocation3 + $0xd4] sm:$0xf0]  ;;  %v4573_v18 = vld [vmem:[#allocation3 + $0xc0] sm:$0xf]  ;;  %v5872_v20 = vld [vmem:[#allocation3 + $0x108] sm:$0xf0] }
  0xce   :  { %v1907_v57 = vpop.f32.mrf.mxu2  ;;  %v5869_v19 = vld [vmem:[#allocation3 + $0xf4] sm:$0xf] }
  0xcf   :  { %v1908_v61 = vadd.f32 %v1907_v57, %v1859_v32  ;;  %v1956_v62 = vpop.f32.mrf.mxu3  ;;  %v1811_v63 = vpop.f32.mrf.mxu0  ;;  %v5859_v32 = vld [vmem:[#allocation3 + $0xa0] sm:$0xf0]  ;;  %2191 = vmatpush.bf16.msra.mxu0 %v4870_v34 }
  0xd0   :  { %v1812_v0 = vadd.f32 %v1811_v63, %v6491_v56  ;;  %v1860_v2 = vpop.f32.mrf.mxu1  ;;  %v6527_v60 = vor.u32 %v5859_v32, %v4545_v35  ;;  %v5254_v35 = vor.u32 %v6035_v29, %v5251_v30 }
  0xd1   :  { %v6521_v5 = vadd.f32 %v1956_v62, %v1908_v61 }
  0xd2   :  { %v1861_v17 = vadd.f32 %v1860_v2, %v1812_v0  ;;  %7605 = vst [vmem:[#allocation38_spill] sm:$0xff] %v6527_v60  ;;  %v6003_v2 = vld [vmem:[#allocation5 + $0x364] sm:$0xf]  ;;  %2338 = vmatpush.bf16.msra.mxu3 %v5254_v35  ;;  %v6541_v35 = vor.u32 %v5862_v25, %v4567_v8 }
  0xd3   :  { %v5935_v25 = vld [vmem:[#allocation5 + $0x144] sm:$0xf] }
  0xd4   :  { %7606 = vst [vmem:[#allocation39_spill] sm:$0xff] %v6541_v35 }
  0xd6   :  { %v1909_v37 = vpop.f32.mrf.mxu2 }
  0xd7   :  { %v1910_v38 = vadd.f32 %v1909_v37, %v1861_v17  ;;  %v1958_v40 = vpop.f32.mrf.mxu3  ;;  %v1814_v57 = vpop.f32.mrf.mxu0  ;;  %v5126_v17 = vor.u32 %v6003_v2, %v5123_v6 }
  0xd8   :  { %v1815_v61 = vadd.f32 %v1814_v57, %v6491_v56  ;;  %v1863_v62 = vpop.f32.mrf.mxu1 }
  0xd9   :  { %v6530_v63 = vadd.f32 %v1958_v40, %v1910_v38  ;;  %2289 = vmatpush.bf16.msra.mxu2 %v5126_v17 }
  0xda   :  { %v1864_v0 = vadd.f32 %v1863_v62, %v1815_v61  ;;  %2009 = vmatmul.bf16.gmra.mxu0 %v6523_v36  ;;  %v5971_v62 = vld [vmem:[#allocation5 + $0x264] sm:$0xf] }
  0xdb   :  { %2058 = vmatmul.bf16.gmra.mxu1 %v6525_v59  ;;  %2107 = vmatmul.bf16.gmra.mxu2 %v6527_v60  ;;  %v4565_v60 = vld [vmem:[#allocation3 + $0xb8] sm:$0xf]  ;;  %v5865_v59 = vld [vmem:[#allocation3 + $0xd0] sm:$0xf0] }
  0xdc   :  { %2156 = vmatmul.bf16.gmra.mxu3 %v6419_v50  ;;  %v4995_v50 = vld [vmem:[#allocation5 + $0x270] sm:$0xf0]  ;;  %v6539_v17 = vor.u32 %v5865_v59, %v4565_v60  ;;  %v5999_v59 = vld [vmem:[#allocation5 + $0x344] sm:$0xf] }
  0xdd   :  { %v4998_v6 = vor.u32 %v5971_v62, %v4995_v50  ;;  %v5107_v60 = vld [vmem:[#allocation5 + $0x350] sm:$0xf0] }
  0xde   :  { %v1912_v33 = vpop.f32.mrf.mxu2  ;;  %v4851_v62 = vld [vmem:[#allocation5 + $0x150] sm:$0xf0] }
  0xdf   :  { %v1913_v32 = vadd.f32 %v1912_v33, %v1864_v0  ;;  %v1961_v37 = vpop.f32.mrf.mxu3  ;;  %v1816_v38 = vpop.f32.mrf.mxu0  ;;  %v5866_v0 = vld [vmem:[#allocation3 + $0xd8] sm:$0xf0]  ;;  %2240 = vmatpush.bf16.msra.mxu1 %v4998_v6  ;;  %v5235_v6 = vld [vmem:[#allocation5 + $0x450] sm:$0xf0] }
  0xe0   :  { %v1817_v40 = vadd.f32 %v1816_v38, %v6491_v56  ;;  %v1865_v57 = vpop.f32.mrf.mxu1 }
  0xe1   :  { %v6537_v61 = vadd.f32 %v1961_v37, %v1913_v32  ;;  %v6543_v32 = vor.u32 %v5866_v0, %v4573_v18  ;;  %v4854_v18 = vor.u32 %v5935_v25, %v4851_v62  ;;  %v4595_v25 = vld [vmem:[#allocation3 + $0x10c] sm:$0xf0]  ;;  %v4601_v62 = vld [vmem:[#allocation3 + $0xf8] sm:$0xf] }
  0xe2   :  { %v1866_v2 = vadd.f32 %v1865_v57, %v1817_v40  ;;  %v5110_v57 = vor.u32 %v5999_v59, %v5107_v60 }
  0xe3   :  { %7607 = vst [vmem:[#allocation40_spill] sm:$0xff] %v6543_v32  ;;  %2192 = vmatpush.bf16.msra.mxu0 %v4854_v18 }
  0xe4   :  { %2290 = vmatpush.bf16.msra.mxu2 %v5110_v57 }
  0xe6   :  { %v1914_v29 = vpop.f32.mrf.mxu2 }
  0xe7   :  { %v1915_v30 = vadd.f32 %v1914_v29, %v1866_v2  ;;  %v1963_v33 = vpop.f32.mrf.mxu3  ;;  %v1819_v34 = vpop.f32.mrf.mxu0  ;;  %v6031_v2 = vld [vmem:[#allocation5 + $0x444] sm:$0xf] }
  0xe8   :  { %v1820_v37 = vadd.f32 %v1819_v34, %v6491_v56  ;;  %v1868_v50 = vpop.f32.mrf.mxu1  ;;  %v5238_v0 = vor.u32 %v6031_v2, %v5235_v6 }
  0xe9   :  { %v6546_v38 = vadd.f32 %v1963_v33, %v1915_v30 }
  0xea   :  { %v1869_v40 = vadd.f32 %v1868_v50, %v1820_v37  ;;  %2014 = vmatmul.bf16.gmra.mxu0 %v6539_v17  ;;  %2339 = vmatpush.bf16.msra.mxu3 %v5238_v0  ;;  %v6557_v0 = vor.u32 %v5869_v19, %v4595_v25  ;;  %v5931_v19 = vld [vmem:[#allocation5 + $0x124] sm:$0xf] }
  0xeb   :  { %2063 = vmatmul.bf16.gmra.mxu1 %v6541_v35  ;;  %2112 = vmatmul.bf16.gmra.mxu2 %v6543_v32  ;;  %v4979_v32 = vld [vmem:[#allocation5 + $0x250] sm:$0xf0]  ;;  %v4593_v35 = vld [vmem:[#allocation3 + $0xf0] sm:$0xf] }
  0xec   :  { %2161 = vmatmul.bf16.gmra.mxu3 %v6431_v13  ;;  %v5967_v13 = vld [vmem:[#allocation5 + $0x244] sm:$0xf]  ;;  %v6555_v57 = vor.u32 %v5872_v20, %v4593_v35  ;;  %7608 = vst [vmem:[#allocation41_spill] sm:$0xff] %v6557_v0  ;;  %v5091_v35 = vld [vmem:[#allocation5 + $0x330] sm:$0xf0] }
  0xed   :  { %v4982_v60 = vor.u32 %v5967_v13, %v4979_v32  ;;  %v5995_v20 = vld [vmem:[#allocation5 + $0x324] sm:$0xf] }
  0xee   :  { %v1917_v8 = vpop.f32.mrf.mxu2 }
  0xef   :  { %v1918_v29 = vadd.f32 %v1917_v8, %v1869_v40  ;;  %v1966_v30 = vpop.f32.mrf.mxu3  ;;  %v1821_v33 = vpop.f32.mrf.mxu0  ;;  %v5873_v40 = vld [vmem:[#allocation3 + $0x110] sm:$0xf0]  ;;  %2241 = vmatpush.bf16.msra.mxu1 %v4982_v60 }
  0xf0   :  { %v1822_v34 = vadd.f32 %v1821_v33, %v6491_v56  ;;  %v1870_v37 = vpop.f32.mrf.mxu1  ;;  %v5219_v60 = vld [vmem:[#allocation5 + $0x430] sm:$0xf0] }
  0xf1   :  { %v6553_v50 = vadd.f32 %v1966_v30, %v1918_v29  ;;  %v6559_v29 = vor.u32 %v5873_v40, %v4601_v62 }
  0xf2   :  { %v1871_v59 = vadd.f32 %v1870_v37, %v1822_v34  ;;  %v5094_v34 = vor.u32 %v5995_v20, %v5091_v35  ;;  %v4835_v37 = vld [vmem:[#allocation5 + $0x130] sm:$0xf0] }
  0xf3   :  { %7609 = vst [vmem:[#allocation42_spill] sm:$0xff] %v6559_v29  ;;  %v4838_v62 = vor.u32 %v5931_v19, %v4835_v37  ;;  %v4623_v19 = vld [vmem:[#allocation3 + $0x144] sm:$0xf0]  ;;  %v4629_v37 = vld [vmem:[#allocation3 + $0x130] sm:$0xf] }
  0xf4   :  { %2291 = vmatpush.bf16.msra.mxu2 %v5094_v34 }
  0xf5   :  { %2193 = vmatpush.bf16.msra.mxu0 %v4838_v62 }
  0xf6   :  { %v1919_v2 = vpop.f32.mrf.mxu2 }
  0xf7   :  { %v1920_v6 = vadd.f32 %v1919_v2, %v1871_v59  ;;  %v1968_v8 = vpop.f32.mrf.mxu3  ;;  %v1824_v18 = vpop.f32.mrf.mxu0  ;;  %v6027_v59 = vld [vmem:[#allocation5 + $0x424] sm:$0xf] }
  0xf8   :  { %v1825_v30 = vadd.f32 %v1824_v18, %v6491_v56  ;;  %v1873_v13 = vpop.f32.mrf.mxu1  ;;  %v5222_v40 = vor.u32 %v6027_v59, %v5219_v60 }
  0xf9   :  { %v6562_v32 = vadd.f32 %v1968_v8, %v1920_v6 }
  0xfa   :  { %v1874_v33 = vadd.f32 %v1873_v13, %v1825_v30  ;;  %2019 = vmatmul.bf16.gmra.mxu0 %v6555_v57  ;;  %2340 = vmatpush.bf16.msra.mxu3 %v5222_v40  ;;  %v6573_v40 = vor.u32 %v5876_v4, %v4623_v19  ;;  %v5927_v4 = vld [vmem:[#allocation5 + $0x104] sm:$0xf] }
  0xfb   :  { %2068 = vmatmul.bf16.gmra.mxu1 %v6557_v0  ;;  %2117 = vmatmul.bf16.gmra.mxu2 %v6559_v29  ;;  %v4963_v29 = vld [vmem:[#allocation5 + $0x230] sm:$0xf0]  ;;  %v4621_v0 = vld [vmem:[#allocation3 + $0x128] sm:$0xf] }
  0xfc   :  { %2166 = vmatmul.bf16.gmra.mxu3 %v6443_v41  ;;  %v5963_v41 = vld [vmem:[#allocation5 + $0x224] sm:$0xf]  ;;  %v6571_v34 = vor.u32 %v5879_v49, %v4621_v0  ;;  %7610 = vst [vmem:[#allocation43_spill] sm:$0xff] %v6573_v40  ;;  %v5075_v0 = vld [vmem:[#allocation5 + $0x310] sm:$0xf0] }
  0xfd   :  { %v4966_v35 = vor.u32 %v5963_v41, %v4963_v29  ;;  %v5991_v49 = vld [vmem:[#allocation5 + $0x304] sm:$0xf] }
  0xfe   :  { %v1922_v25 = vpop.f32.mrf.mxu2 }
  0xff   :  { %v1923_v2 = vadd.f32 %v1922_v25, %v1874_v33  ;;  %v1971_v6 = vpop.f32.mrf.mxu3  ;;  %v1826_v8 = vpop.f32.mrf.mxu0  ;;  %v5880_v33 = vld [vmem:[#allocation3 + $0x148] sm:$0xf0]  ;;  %2242 = vmatpush.bf16.msra.mxu1 %v4966_v35  ;;  %v5203_v35 = vld [vmem:[#allocation5 + $0x410] sm:$0xf0] }
 0x100   :  { %v1827_v18 = vadd.f32 %v1826_v8, %v6491_v56  ;;  %v1875_v30 = vpop.f32.mrf.mxu1 }
 0x101   :  { %v6569_v13 = vadd.f32 %v1971_v6, %v1923_v2  ;;  %v6575_v2 = vor.u32 %v5880_v33, %v4629_v37 }
 0x102   :  { %v1876_v20 = vadd.f32 %v1875_v30, %v1827_v18  ;;  %v5078_v18 = vor.u32 %v5991_v49, %v5075_v0  ;;  %v4819_v30 = vld [vmem:[#allocation5 + $0x110] sm:$0xf0] }
 0x103   :  { %7611 = vst [vmem:[#allocation44_spill] sm:$0xff] %v6575_v2  ;;  %v4822_v37 = vor.u32 %v5927_v4, %v4819_v30  ;;  %v4651_v4 = vld [vmem:[#allocation3 + $0x17c] sm:$0xf0]  ;;  %v4657_v30 = vld [vmem:[#allocation3 + $0x168] sm:$0xf] }
 0x104   :  { %2292 = vmatpush.bf16.msra.mxu2 %v5078_v18 }
 0x105   :  { %2194 = vmatpush.bf16.msra.mxu0 %v4822_v37 }
 0x106   :  { %v1924_v59 = vpop.f32.mrf.mxu2 }
 0x107   :  { %v1925_v60 = vadd.f32 %v1924_v59, %v1876_v20  ;;  %v1973_v25 = vpop.f32.mrf.mxu3  ;;  %v1829_v62 = vpop.f32.mrf.mxu0  ;;  %v6023_v20 = vld [vmem:[#allocation5 + $0x404] sm:$0xf] }
 0x108   :  { %v1830_v6 = vadd.f32 %v1829_v62, %v6491_v56  ;;  %v1878_v41 = vpop.f32.mrf.mxu1  ;;  %v5206_v33 = vor.u32 %v6023_v20, %v5203_v35 }
 0x109   :  { %v6578_v29 = vadd.f32 %v1973_v25, %v1925_v60 }
 0x10a   :  { %v1879_v8 = vadd.f32 %v1878_v41, %v1830_v6  ;;  %2024 = vmatmul.bf16.gmra.mxu0 %v6571_v34  ;;  %2341 = vmatpush.bf16.msra.mxu3 %v5206_v33  ;;  %v6589_v33 = vor.u32 %v5883_v24, %v4651_v4  ;;  %v6083_v24 = vld [vmem:[#allocation5 + $0x5e4] sm:$0xf] }
 0x10b   :  { %2073 = vmatmul.bf16.gmra.mxu1 %v6573_v40  ;;  %2122 = vmatmul.bf16.gmra.mxu2 %v6575_v2  ;;  %v4947_v2 = vld [vmem:[#allocation5 + $0x210] sm:$0xf0]  ;;  %v4649_v40 = vld [vmem:[#allocation3 + $0x160] sm:$0xf] }
 0x10c   :  { %2171 = vmatmul.bf16.gmra.mxu3 %v6455_v9  ;;  %v5959_v9 = vld [vmem:[#allocation5 + $0x204] sm:$0xf]  ;;  %v6587_v18 = vor.u32 %v5886_v3, %v4649_v40  ;;  %7613 = vst [vmem:[#allocation46_spill] sm:$0xff] %v6589_v33  ;;  %v4809_v3 = vld [vmem:[#allocation5 + $0xe8] sm:$0xf] }
 0x10d   :  { %v4950_v0 = vor.u32 %v5959_v9, %v4947_v2  ;;  %v5926_v40 = vld [vmem:[#allocation5 + $0xf4] sm:$0xf0] }
 0x10e   :  { %v1927_v19 = vpop.f32.mrf.mxu2  ;;  %7612 = vst [vmem:[#allocation45_spill] sm:$0xff] %v6587_v18 }
 0x10f   :  { %v1928_v59 = vadd.f32 %v1927_v19, %v1879_v8  ;;  %v1976_v60 = vpop.f32.mrf.mxu3  ;;  %v1831_v25 = vpop.f32.mrf.mxu0  ;;  %v5887_v8 = vld [vmem:[#allocation3 + $0x180] sm:$0xf0]  ;;  %2243 = vmatpush.bf16.msra.mxu1 %v4950_v0  ;;  %v5958_v0 = vld [vmem:[#allocation5 + $0x1f4] sm:$0xf0] }
 0x110   :  { %v1832_v62 = vadd.f32 %v1831_v25, %v6491_v56  ;;  %v1880_v6 = vpop.f32.mrf.mxu1 }
 0x111   :  { %v6585_v41 = vadd.f32 %v1976_v60, %v1928_v59  ;;  %v6591_v59 = vor.u32 %v5887_v8, %v4657_v30 }
 0x112   :  { %v1881_v49 = vadd.f32 %v1880_v6, %v1832_v62  ;;  %v4810_v62 = vor.u32 %v5926_v40, %v4809_v3  ;;  %v5443_v6 = vld [vmem:[#allocation5 + $0x5f0] sm:$0xf0]  ;;  %v5890_v40 = vld [vmem:[#allocation3 + $0x19c] sm:$0xf] }
 0x113   :  { %7614 = vst [vmem:[#allocation47_spill] sm:$0xff] %v6591_v59  ;;  %v5446_v30 = vor.u32 %v6083_v24, %v5443_v6  ;;  %v5893_v3 = vld [vmem:[#allocation3 + $0x1b0] sm:$0xf0]  ;;  %v4685_v24 = vld [vmem:[#allocation3 + $0x1a0] sm:$0xf] }
 0x114   :  { %2481 = vmatpush.bf16.msrb.mxu2 %v4810_v62  ;;  %v5894_v6 = vld [vmem:[#allocation3 + $0x1b8] sm:$0xf0] }
 0x115   :  { %2383 = vmatpush.bf16.msrb.mxu0 %v5446_v30 }
 0x116   :  { %v1929_v20 = vpop.f32.mrf.mxu2 }
 0x117   :  { %v1930_v35 = vadd.f32 %v1929_v20, %v1881_v49  ;;  %v1978_v19 = vpop.f32.mrf.mxu3  ;;  %v1834_v37 = vpop.f32.mrf.mxu0  ;;  %v4937_v49 = vld [vmem:[#allocation5 + $0x1e8] sm:$0xf] }
 0x118   :  { %v1835_v60 = vadd.f32 %v1834_v37, %v6491_v56  ;;  %v1883_v9 = vpop.f32.mrf.mxu1  ;;  %v4938_v8 = vor.u32 %v5958_v0, %v4937_v49 }
 0x119   :  { %v6594_v2 = vadd.f32 %v1978_v19, %v1930_v35 }
 0x11a   :  { %v1884_v25 = vadd.f32 %v1883_v9, %v1835_v60  ;;  %2029 = vmatmul.bf16.gmra.mxu0 %v6587_v18  ;;  %2530 = vmatpush.bf16.msrb.mxu3 %v4938_v8  ;;  %v6605_v8 = vor.u32 %v5890_v40, %v4679_v22  ;;  %v6079_v22 = vld [vmem:[#allocation5 + $0x5c4] sm:$0xf]  ;;  %v5954_v40 = vld [vmem:[#allocation5 + $0x1d4] sm:$0xf0] }
 0x11b   :  { %2078 = vmatmul.bf16.gmra.mxu1 %v6589_v33  ;;  %2127 = vmatmul.bf16.gmra.mxu2 %v6591_v59  ;;  %v4677_v59 = vld [vmem:[#allocation3 + $0x198] sm:$0xf]  ;;  %v6115_v33 = vld [vmem:[#allocation5 + $0x6e4] sm:$0xf] }
 0x11c   :  { %2176 = vmatmul.bf16.gmra.mxu3 %v6467_v45  ;;  %v6603_v0 = vor.u32 %v5893_v3, %v4677_v59  ;;  %7616 = vst [vmem:[#allocation49_spill] sm:$0xff] %v6605_v8  ;;  %v5427_v59 = vld [vmem:[#allocation5 + $0x5d0] sm:$0xf0]  ;;  %v4921_v3 = vld [vmem:[#allocation5 + $0x1c8] sm:$0xf] }
 0x11e   :  { %v1932_v4 = vpop.f32.mrf.mxu2  ;;  %7615 = vst [vmem:[#allocation48_spill] sm:$0xff] %v6603_v0 }
 0x11f   :  { %v1933_v20 = vadd.f32 %v1932_v4, %v1884_v25  ;;  %v1981_v35 = vpop.f32.mrf.mxu3  ;;  %v1836_v19 = vpop.f32.mrf.mxu0  ;;  %v5574_v25 = vor.u32 %v6115_v33, %v5571_v23  ;;  %v5922_v23 = vld [vmem:[#allocation5 + $0xd4] sm:$0xf0] }
 0x120   :  { %v1837_v37 = vadd.f32 %v1836_v19, %v6491_v56  ;;  %v1885_v60 = vpop.f32.mrf.mxu1 }
 0x121   :  { %v6601_v9 = vadd.f32 %v1981_v35, %v1933_v20  ;;  %2432 = vmatpush.bf16.msrb.mxu1 %v5574_v25  ;;  %v6607_v20 = vor.u32 %v5894_v6, %v4685_v24  ;;  %v5430_v6 = vor.u32 %v6079_v22, %v5427_v59  ;;  %v4922_v25 = vor.u32 %v5954_v40, %v4921_v3  ;;  %v6075_v40 = vld [vmem:[#allocation5 + $0x5a4] sm:$0xf] }
 0x122   :  { %v1886_v45 = vadd.f32 %v1885_v60, %v1837_v37 }
 0x123   :  { %7617 = vst [vmem:[#allocation50_spill] sm:$0xff] %v6607_v20  ;;  %2384 = vmatpush.bf16.msrb.mxu0 %v5430_v6  ;;  %2531 = vmatpush.bf16.msrb.mxu3 %v4922_v25  ;;  %v4905_v6 = vld [vmem:[#allocation5 + $0x1a8] sm:$0xf]  ;;  %v5950_v25 = vld [vmem:[#allocation5 + $0x1b4] sm:$0xf0] }
 0x126   :  { %v1934_v49 = vpop.f32.mrf.mxu2 }
 0x127   :  { %v1935_v62 = vadd.f32 %v1934_v49, %v1886_v45  ;;  %v1983_v4 = vpop.f32.mrf.mxu3  ;;  %v1839_v30 = vpop.f32.mrf.mxu0  ;;  %v4793_v45 = vld [vmem:[#allocation5 + $0xc8] sm:$0xf] }
 0x128   :  { %v1840_v35 = vadd.f32 %v1839_v30, %v6491_v56  ;;  %v1888_v19 = vpop.f32.mrf.mxu1  ;;  %v4794_v33 = vor.u32 %v5922_v23, %v4793_v45 }
 0x129   :  { %v6610_v37 = vadd.f32 %v1983_v4, %v1935_v62 }
 0x12a   :  { %v1889_v60 = vadd.f32 %v1888_v19, %v1840_v35  ;;  %2034 = vmatmul.bf16.gmra.mxu0 %v6603_v0  ;;  %2482 = vmatpush.bf16.msrb.mxu2 %v4794_v33 }
 0x12b   :  { %2083 = vmatmul.bf16.gmra.mxu1 %v6605_v8  ;;  %2132 = vmatmul.bf16.gmra.mxu2 %v6607_v20  ;;  %v5555_v20 = vld [vmem:[#allocation5 + $0x6d0] sm:$0xf0] }
 0x12c   :  { %2181 = vmatmul.bf16.gmra.mxu3 %v6479_v21  ;;  %v6111_v21 = vld [vmem:[#allocation5 + $0x6c4] sm:$0xf] }
 0x12d   :  { %v5558_v23 = vor.u32 %v6111_v21, %v5555_v20  ;;  %v4777_v21 = vld [vmem:[#allocation5 + $0xa8] sm:$0xf]  ;;  %v5918_v20 = vld [vmem:[#allocation5 + $0xb4] sm:$0xf0] }
 0x12e   :  { %v1937_v24 = vpop.f32.mrf.mxu2 }
 0x12f   :  { %v1938_v49 = vadd.f32 %v1937_v24, %v1889_v60  ;;  %v1986_v62 = vpop.f32.mrf.mxu3  ;;  %v1841_v4 = vpop.f32.mrf.mxu0  ;;  %2433 = vmatpush.bf16.msrb.mxu1 %v5558_v23  ;;  %v5411_v24 = vld [vmem:[#allocation5 + $0x5b0] sm:$0xf0]  ;;  %v6107_v23 = vld [vmem:[#allocation5 + $0x6a4] sm:$0xf] }
 0x130   :  { %v1842_v30 = vadd.f32 %v1841_v4, %v6491_v56  ;;  %v1890_v35 = vpop.f32.mrf.mxu1 }
 0x131   :  { %v6617_v19 = vadd.f32 %v1986_v62, %v1938_v49  ;;  %v5414_v49 = vor.u32 %v6075_v40, %v5411_v24 }
 0x132   :  { %v1891_v45 = vadd.f32 %v1890_v35, %v1842_v30 }
 0x133   :  { %2385 = vmatpush.bf16.msrb.mxu0 %v5414_v49 }
 0x136   :  { %v1939_v8 = vpop.f32.mrf.mxu2 }
 0x137   :  { %v1940_v0 = vadd.f32 %v1939_v8, %v1891_v45  ;;  %v1988_v22 = vpop.f32.mrf.mxu3  ;;  %v2000_v59 = vpop.f32.mrf.mxu0  ;;  %v4778_v8 = vor.u32 %v5918_v20, %v4777_v21 }
 0x138   :  { %v2001_v60 = vadd.f32 %v2000_v59, %v6505_v39  ;;  %v2049_v3 = vpop.f32.mrf.mxu1  ;;  %v5539_v59 = vld [vmem:[#allocation5 + $0x6b0] sm:$0xf0] }
 0x139   :  { %v6620_v33 = vadd.f32 %v1988_v22, %v1940_v0  ;;  %v4906_v0 = vor.u32 %v5950_v25, %v4905_v6  ;;  %2483 = vmatpush.bf16.msrb.mxu2 %v4778_v8 }
 0x13a   :  { %v2050_v56 = vadd.f32 %v2049_v3, %v2001_v60  ;;  %2195 = vmatmul.bf16.vlgmr.msra.gmra.mxu0 %v6397_v54  ;;  %v5542_v60 = vor.u32 %v6107_v23, %v5539_v59  ;;  %v4889_v23 = vld [vmem:[#allocation5 + $0x188] sm:$0xf] }
 0x13b   :  { %2244 = vmatmul.bf16.vlgmr.msra.gmra.mxu1 %v6399_v55  ;;  %2293 = vmatmul.bf16.vlgmr.msra.gmra.mxu2 %v6401_v58 }
 0x13c   :  { %2342 = vmatmul.bf16.vlgmr.msra.gmra.mxu3 %v6493_v1  ;;  %2434 = vmatpush.bf16.msrb.mxu1 %v5542_v60 }
 0x13d   :  { %2532 = vmatpush.bf16.msrb.mxu3 %v4906_v0  ;;  %v4761_v0 = vld [vmem:[#allocation5 + $0x88] sm:$0xf] }
 0x13e   :  { %v2098_v39 = vpop.f32.mrf.mxu2 }
 0x13f   :  { %v2099_v62 = vadd.f32 %v2098_v39, %v2050_v56  ;;  %v6626_v4 = vpop.f32.mrf.mxu3  ;;  %v2002_v30 = vpop.f32.mrf.mxu0 }
 0x140   :  { %v2003_v35 = vadd.f32 %v2002_v30, %v6514_v31  ;;  %v2051_v45 = vpop.f32.mrf.mxu1  ;;  %v5914_v30 = vld [vmem:[#allocation5 + $0x94] sm:$0xf0] }
 0x141   :  { %v3231_v21 = vmul.f32 0.2, %v2099_v62  ;;  %vm3167_vm0 = vcmp.gt.f32.partialorder %v2099_v62, 0.0 }
 0x142   :  { %v2052_v22 = vadd.f32 %v2051_v45, %v2003_v35  ;;  %v6071_v35 = vld [vmem:[#allocation5 + $0x584] sm:$0xf]  ;;  %v5395_v45 = vld [vmem:[#allocation5 + $0x590] sm:$0xf0] }
 0x143   :  { %v3295_v25 = vsel %vm3167_vm0, %v2099_v62, %v3231_v21  ;;  %v5398_v60 = vor.u32 %v6071_v35, %v5395_v45 }
 0x145   :  { %2386 = vmatpush.bf16.msrb.mxu0 %v5398_v60  ;;  %v4745_v60 = vld [vmem:[#allocation5 + $0x68] sm:$0xf] }
 0x146   :  { %v2100_v3 = vpop.f32.mrf.mxu2 }
 0x147   :  { %v2101_v20 = vadd.f32 %v2100_v3, %v2052_v22  ;;  %v6629_v40 = vpop.f32.mrf.mxu3  ;;  %v2005_v56 = vpop.f32.mrf.mxu0  ;;  %v5946_v22 = vld [vmem:[#allocation5 + $0x194] sm:$0xf0] }
 0x148   :  { %v2006_v24 = vadd.f32 %v2005_v56, %v6521_v5  ;;  %v2054_v8 = vpop.f32.mrf.mxu1  ;;  %v4762_v5 = vor.u32 %v5914_v30, %v4761_v0  ;;  %v4890_v3 = vor.u32 %v5946_v22, %v4889_v23 }
 0x149   :  { %vm3171_vm1 = vcmp.gt.f32.partialorder %v2101_v20, 0.0  ;;  %v3235_v31 = vmul.f32 0.2, %v2101_v20 }
 0x14a   :  { %v2055_v6 = vadd.f32 %v2054_v8, %v2006_v24  ;;  %2200 = vmatmul.bf16.gmra.mxu0 %v6409_v26  ;;  %2484 = vmatpush.bf16.msrb.mxu2 %v4762_v5  ;;  %v6103_v8 = vld [vmem:[#allocation5 + $0x684] sm:$0xf] }
 0x14b   :  { %v3299_v39 = vsel %vm3171_vm1, %v2101_v20, %v3235_v31  ;;  %2249 = vmatmul.bf16.gmra.mxu1 %v6411_v27  ;;  %2298 = vmatmul.bf16.gmra.mxu2 %v6413_v28 }
 0x14c   :  { %v6635_v49 = vpack.c.bf16 %v3299_v39, %v3295_v25  ;;  %2347 = vmatmul.bf16.gmra.mxu3 %v6507_v7  ;;  %v5523_v25 = vld [vmem:[#allocation5 + $0x690] sm:$0xf0] }
 0x14d   :  { %2533 = vmatpush.bf16.msrb.mxu3 %v4890_v3  ;;  %v5526_v39 = vor.u32 %v6103_v8, %v5523_v25  ;;  %v5910_v3 = vld [vmem:[#allocation5 + $0x74] sm:$0xf0]  ;;  %v4873_v8 = vld [vmem:[#allocation5 + $0x168] sm:$0xf] }
 0x14e   :  { %7618 = vst [vmem:[#allocation51_spill] sm:$0xff] %v6635_v49  ;;  %v2103_v59 = vpop.f32.mrf.mxu2 }
 0x14f   :  { %v2104_v62 = vadd.f32 %v2103_v59, %v2055_v6  ;;  %v6638_v21 = vpop.f32.mrf.mxu3  ;;  %v2007_v20 = vpop.f32.mrf.mxu0  ;;  %2435 = vmatpush.bf16.msrb.mxu1 %v5526_v39 }
 0x150   :  { %v2008_v56 = vadd.f32 %v2007_v20, %v6530_v63  ;;  %v2056_v24 = vpop.f32.mrf.mxu1  ;;  %v6067_v20 = vld [vmem:[#allocation5 + $0x564] sm:$0xf] }
 0x151   :  { %v3239_v30 = vmul.f32 0.2, %v2104_v62  ;;  %vm3175_vm2 = vcmp.gt.f32.partialorder %v2104_v62, 0.0 }
 0x152   :  { %v2057_v31 = vadd.f32 %v2056_v24, %v2008_v56  ;;  %v5379_v24 = vld [vmem:[#allocation5 + $0x570] sm:$0xf0] }
 0x153   :  { %v3303_v22 = vsel %vm3175_vm2, %v2104_v62, %v3239_v30  ;;  %v5382_v39 = vor.u32 %v6067_v20, %v5379_v24  ;;  %v6099_v30 = vld [vmem:[#allocation5 + $0x664] sm:$0xf] }
 0x155   :  { %2387 = vmatpush.bf16.msrb.mxu0 %v5382_v39  ;;  %v4729_v39 = vld [vmem:[#allocation5 + $0x48] sm:$0xf] }
 0x156   :  { %v2105_v0 = vpop.f32.mrf.mxu2 }
 0x157   :  { %v2106_v49 = vadd.f32 %v2105_v0, %v2057_v31  ;;  %v6641_v35 = vpop.f32.mrf.mxu3  ;;  %v2010_v6 = vpop.f32.mrf.mxu0  ;;  %v5942_v31 = vld [vmem:[#allocation5 + $0x174] sm:$0xf0] }
 0x158   :  { %v2011_v45 = vadd.f32 %v2010_v6, %v6537_v61  ;;  %v2059_v5 = vpop.f32.mrf.mxu1  ;;  %v4746_v61 = vor.u32 %v5910_v3, %v4745_v60  ;;  %v4874_v0 = vor.u32 %v5942_v31, %v4873_v8 }
 0x159   :  { %vm3179_vm3 = vcmp.gt.f32.partialorder %v2106_v49, 0.0  ;;  %v3243_v63 = vmul.f32 0.2, %v2106_v49 }
 0x15a   :  { %v2060_v23 = vadd.f32 %v2059_v5, %v2011_v45  ;;  %2205 = vmatmul.bf16.gmra.mxu0 %v6421_v51  ;;  %2485 = vmatpush.bf16.msrb.mxu2 %v4746_v61 }
 0x15b   :  { %2254 = vmatmul.bf16.gmra.mxu1 %v6423_v52  ;;  %2303 = vmatmul.bf16.gmra.mxu2 %v6425_v53  ;;  %v3307_v59 = vsel %vm3179_vm3, %v2106_v49, %v3243_v63 }
 0x15c   :  { %2352 = vmatmul.bf16.gmra.mxu3 %v6523_v36  ;;  %v6648_v56 = vpack.c.bf16 %v3307_v59, %v3303_v22  ;;  %v5507_v22 = vld [vmem:[#allocation5 + $0x670] sm:$0xf0] }
 0x15d   :  { %2534 = vmatpush.bf16.msrb.mxu3 %v4874_v0  ;;  %v5510_v59 = vor.u32 %v6099_v30, %v5507_v22  ;;  %v5906_v0 = vld [vmem:[#allocation5 + $0x54] sm:$0xf0]  ;;  %v4857_v30 = vld [vmem:[#allocation5 + $0x148] sm:$0xf] }
 0x15e   :  { %7619 = vst [vmem:[#allocation52_spill] sm:$0xff] %v6648_v56  ;;  %v2108_v25 = vpop.f32.mrf.mxu2 }
 0x15f   :  { %v2109_v6 = vadd.f32 %v2108_v25, %v2060_v23  ;;  %v6650_v45 = vpop.f32.mrf.mxu3  ;;  %v2012_v5 = vpop.f32.mrf.mxu0  ;;  %2436 = vmatpush.bf16.msrb.mxu1 %v5510_v59 }
 0x160   :  { %v2013_v49 = vadd.f32 %v2012_v5, %v6546_v38  ;;  %v2061_v62 = vpop.f32.mrf.mxu1  ;;  %v6063_v5 = vld [vmem:[#allocation5 + $0x544] sm:$0xf] }
 0x161   :  { %v3247_v3 = vmul.f32 0.2, %v2109_v6  ;;  %vm3183_vm4 = vcmp.gt.f32.partialorder %v2109_v6, 0.0 }
 0x162   :  { %v2062_v63 = vadd.f32 %v2061_v62, %v2013_v49  ;;  %v5363_v62 = vld [vmem:[#allocation5 + $0x550] sm:$0xf0] }
 0x163   :  { %v3311_v31 = vsel %vm3183_vm4, %v2109_v6, %v3247_v3  ;;  %v5366_v59 = vor.u32 %v6063_v5, %v5363_v62  ;;  %v6095_v3 = vld [vmem:[#allocation5 + $0x644] sm:$0xf] }
 0x165   :  { %2388 = vmatpush.bf16.msrb.mxu0 %v5366_v59  ;;  %v4713_v59 = vld [vmem:[#allocation5 + $0x28] sm:$0xf] }
 0x166   :  { %v2110_v60 = vpop.f32.mrf.mxu2 }
 0x167   :  { %v2111_v56 = vadd.f32 %v2110_v60, %v2062_v63  ;;  %v6653_v20 = vpop.f32.mrf.mxu3  ;;  %v2015_v23 = vpop.f32.mrf.mxu0  ;;  %v5938_v63 = vld [vmem:[#allocation5 + $0x154] sm:$0xf0] }
 0x168   :  { %v2016_v24 = vadd.f32 %v2015_v23, %v6553_v50  ;;  %v2064_v61 = vpop.f32.mrf.mxu1  ;;  %v4730_v50 = vor.u32 %v5906_v0, %v4729_v39  ;;  %v4858_v60 = vor.u32 %v5938_v63, %v4857_v30 }
 0x169   :  { %vm3187_vm5 = vcmp.gt.f32.partialorder %v2111_v56, 0.0  ;;  %v3251_v38 = vmul.f32 0.2, %v2111_v56 }
 0x16a   :  { %v2065_v8 = vadd.f32 %v2064_v61, %v2016_v24  ;;  %2210 = vmatmul.bf16.gmra.mxu0 %v6433_v14  ;;  %2486 = vmatpush.bf16.msrb.mxu2 %v4730_v50 }
 0x16b   :  { %2259 = vmatmul.bf16.gmra.mxu1 %v6435_v15  ;;  %2308 = vmatmul.bf16.gmra.mxu2 %v6437_v16  ;;  %v3315_v25 = vsel %vm3187_vm5, %v2111_v56, %v3251_v38 }
 0x16c   :  { %2357 = vmatmul.bf16.gmra.mxu3 %v6539_v17  ;;  %v6660_v49 = vpack.c.bf16 %v3315_v25, %v3311_v31  ;;  %v5491_v31 = vld [vmem:[#allocation5 + $0x650] sm:$0xf0] }
 0x16d   :  { %2535 = vmatpush.bf16.msrb.mxu3 %v4858_v60  ;;  %v5494_v25 = vor.u32 %v6095_v3, %v5491_v31  ;;  %v5902_v60 = vld [vmem:[#allocation5 + $0x34] sm:$0xf0]  ;;  %v4841_v3 = vld [vmem:[#allocation5 + $0x128] sm:$0xf] }
 0x16e   :  { %7620 = vst [vmem:[#allocation53_spill] sm:$0xff] %v6660_v49  ;;  %v2113_v22 = vpop.f32.mrf.mxu2 }
 0x16f   :  { %v2114_v23 = vadd.f32 %v2113_v22, %v2065_v8  ;;  %v6662_v24 = vpop.f32.mrf.mxu3  ;;  %v2017_v61 = vpop.f32.mrf.mxu0  ;;  %2437 = vmatpush.bf16.msrb.mxu1 %v5494_v25 }
 0x170   :  { %v2018_v56 = vadd.f32 %v2017_v61, %v6562_v32  ;;  %v2066_v6 = vpop.f32.mrf.mxu1  ;;  %v6059_v61 = vld [vmem:[#allocation5 + $0x524] sm:$0xf] }
 0x171   :  { %v3255_v0 = vmul.f32 0.2, %v2114_v23  ;;  %vm3191_vm6 = vcmp.gt.f32.partialorder %v2114_v23, 0.0 }
 0x172   :  { %v2067_v38 = vadd.f32 %v2066_v6, %v2018_v56  ;;  %v5347_v6 = vld [vmem:[#allocation5 + $0x530] sm:$0xf0] }
 0x173   :  { %v3319_v63 = vsel %vm3191_vm6, %v2114_v23, %v3255_v0  ;;  %v5350_v25 = vor.u32 %v6059_v61, %v5347_v6  ;;  %v6091_v0 = vld [vmem:[#allocation5 + $0x624] sm:$0xf] }
 0x175   :  { %2389 = vmatpush.bf16.msrb.mxu0 %v5350_v25  ;;  %v4697_v25 = vld [vmem:[#allocation5 + $0x8] sm:$0xf] }
 0x176   :  { %v2115_v39 = vpop.f32.mrf.mxu2 }
 0x177   :  { %v2116_v49 = vadd.f32 %v2115_v39, %v2067_v38  ;;  %v6665_v5 = vpop.f32.mrf.mxu3  ;;  %v2020_v8 = vpop.f32.mrf.mxu0  ;;  %v5934_v38 = vld [vmem:[#allocation5 + $0x134] sm:$0xf0] }
 0x178   :  { %v2021_v62 = vadd.f32 %v2020_v8, %v6569_v13  ;;  %v2069_v50 = vpop.f32.mrf.mxu1  ;;  %v4714_v13 = vor.u32 %v5902_v60, %v4713_v59  ;;  %v4842_v39 = vor.u32 %v5934_v38, %v4841_v3 }
 0x179   :  { %vm3195_vm7 = vcmp.gt.f32.partialorder %v2116_v49, 0.0  ;;  %v3259_v32 = vmul.f32 0.2, %v2116_v49 }
 0x17a   :  { %v2070_v30 = vadd.f32 %v2069_v50, %v2021_v62  ;;  %2215 = vmatmul.bf16.gmra.mxu0 %v6445_v42  ;;  %2487 = vmatpush.bf16.msrb.mxu2 %v4714_v13 }
 0x17b   :  { %2264 = vmatmul.bf16.gmra.mxu1 %v6447_v43  ;;  %2313 = vmatmul.bf16.gmra.mxu2 %v6449_v44  ;;  %v3323_v22 = vsel %vm3195_vm7, %v2116_v49, %v3259_v32 }
 0x17c   :  { %2362 = vmatmul.bf16.gmra.mxu3 %v6555_v57  ;;  %v6672_v56 = vpack.c.bf16 %v3323_v22, %v3319_v63  ;;  %v5475_v63 = vld [vmem:[#allocation5 + $0x630] sm:$0xf0] }
 0x17d   :  { %2536 = vmatpush.bf16.msrb.mxu3 %v4842_v39  ;;  %v5478_v22 = vor.u32 %v6091_v0, %v5475_v63  ;;  %v5898_v39 = vld [vmem:[#allocation5 + $0x14] sm:$0xf0]  ;;  %v4825_v0 = vld [vmem:[#allocation5 + $0x108] sm:$0xf] }
 0x17e   :  { %7621 = vst [vmem:[#allocation54_spill] sm:$0xff] %v6672_v56  ;;  %v2118_v31 = vpop.f32.mrf.mxu2 }
 0x17f   :  { %v2119_v8 = vadd.f32 %v2118_v31, %v2070_v30  ;;  %v6674_v62 = vpop.f32.mrf.mxu3  ;;  %v2022_v50 = vpop.f32.mrf.mxu0  ;;  %2438 = vmatpush.bf16.msrb.mxu1 %v5478_v22 }
 0x180   :  { %v2023_v49 = vadd.f32 %v2022_v50, %v6578_v29  ;;  %v2071_v23 = vpop.f32.mrf.mxu1  ;;  %v6055_v50 = vld [vmem:[#allocation5 + $0x504] sm:$0xf] }
 0x181   :  { %v3263_v60 = vmul.f32 0.2, %v2119_v8  ;;  %vm3199_vm8 = vcmp.gt.f32.partialorder %v2119_v8, 0.0 }
 0x182   :  { %v2072_v32 = vadd.f32 %v2071_v23, %v2023_v49  ;;  %v5331_v23 = vld [vmem:[#allocation5 + $0x510] sm:$0xf0] }
 0x183   :  { %v3327_v38 = vsel %vm3199_vm8, %v2119_v8, %v3263_v60  ;;  %v5334_v22 = vor.u32 %v6055_v50, %v5331_v23  ;;  %v6087_v60 = vld [vmem:[#allocation5 + $0x604] sm:$0xf] }
 0x185   :  { %2390 = vmatpush.bf16.msrb.mxu0 %v5334_v22  ;;  %v5321_v22 = vld [vmem:[#allocation5 + $0x4e8] sm:$0xf] }
 0x186   :  { %v2120_v59 = vpop.f32.mrf.mxu2 }
 0x187   :  { %v2121_v56 = vadd.f32 %v2120_v59, %v2072_v32  ;;  %v6677_v61 = vpop.f32.mrf.mxu3  ;;  %v2025_v30 = vpop.f32.mrf.mxu0  ;;  %v5930_v32 = vld [vmem:[#allocation5 + $0x114] sm:$0xf0] }
 0x188   :  { %v2026_v6 = vadd.f32 %v2025_v30, %v6585_v41  ;;  %v2074_v13 = vpop.f32.mrf.mxu1  ;;  %v4698_v41 = vor.u32 %v5898_v39, %v4697_v25  ;;  %v4826_v59 = vor.u32 %v5930_v32, %v4825_v0 }
 0x189   :  { %vm3203_vm9 = vcmp.gt.f32.partialorder %v2121_v56, 0.0  ;;  %v3267_v29 = vmul.f32 0.2, %v2121_v56 }
 0x18a   :  { %v2075_v3 = vadd.f32 %v2074_v13, %v2026_v6  ;;  %2220 = vmatmul.bf16.gmra.mxu0 %v6457_v10  ;;  %2488 = vmatpush.bf16.msrb.mxu2 %v4698_v41 }
 0x18b   :  { %2269 = vmatmul.bf16.gmra.mxu1 %v6459_v11  ;;  %2318 = vmatmul.bf16.gmra.mxu2 %v6461_v12  ;;  %v3331_v31 = vsel %vm3203_vm9, %v2121_v56, %v3267_v29 }
 0x18c   :  { %2367 = vmatmul.bf16.gmra.mxu3 %v6571_v34  ;;  %v6684_v49 = vpack.c.bf16 %v3331_v31, %v3327_v38  ;;  %v5459_v38 = vld [vmem:[#allocation5 + $0x610] sm:$0xf0] }
 0x18d   :  { %2537 = vmatpush.bf16.msrb.mxu3 %v4826_v59  ;;  %v5462_v31 = vor.u32 %v6087_v60, %v5459_v38  ;;  %v6054_v59 = vld [vmem:[#allocation5 + $0x4f4] sm:$0xf0]  ;;  %v5449_v60 = vld [vmem:[#allocation5 + $0x5e8] sm:$0xf] }
 0x18e   :  { %7622 = vst [vmem:[#allocation55_spill] sm:$0xff] %v6684_v49  ;;  %v2123_v63 = vpop.f32.mrf.mxu2 }
 0x18f   :  { %v2124_v30 = vadd.f32 %v2123_v63, %v2075_v3  ;;  %v6686_v6 = vpop.f32.mrf.mxu3  ;;  %v2027_v13 = vpop.f32.mrf.mxu0  ;;  %2439 = vmatpush.bf16.msrb.mxu1 %v5462_v31 }
 0x190   :  { %v2028_v56 = vadd.f32 %v2027_v13, %v6594_v2  ;;  %v2076_v8 = vpop.f32.mrf.mxu1  ;;  %v5065_v13 = vld [vmem:[#allocation5 + $0x2e8] sm:$0xf] }
 0x191   :  { %v3271_v39 = vmul.f32 0.2, %v2124_v30  ;;  %vm3207_vm10 = vcmp.gt.f32.partialorder %v2124_v30, 0.0 }
 0x192   :  { %v2077_v29 = vadd.f32 %v2076_v8, %v2028_v56  ;;  %v5990_v8 = vld [vmem:[#allocation5 + $0x2f4] sm:$0xf0] }
 0x193   :  { %v3335_v32 = vsel %vm3207_vm10, %v2124_v30, %v3271_v39  ;;  %v5066_v31 = vor.u32 %v5990_v8, %v5065_v13  ;;  %v5193_v39 = vld [vmem:[#allocation5 + $0x3e8] sm:$0xf] }
 0x195   :  { %2579 = vmatpush.bf16.msra.mxu0 %v5066_v31  ;;  %v7626_v31 = vld [vmem:[#allocation32_spill] sm:$0xff] }
 0x196   :  { %v2125_v25 = vpop.f32.mrf.mxu2 }
 0x197   :  { %v2126_v49 = vadd.f32 %v2125_v25, %v2077_v29  ;;  %v6689_v50 = vpop.f32.mrf.mxu3  ;;  %v2030_v3 = vpop.f32.mrf.mxu0  ;;  %v6086_v29 = vld [vmem:[#allocation5 + $0x5f4] sm:$0xf0] }
 0x198   :  { %v2031_v23 = vadd.f32 %v2030_v3, %v6601_v9  ;;  %v2079_v41 = vpop.f32.mrf.mxu1  ;;  %v5322_v9 = vor.u32 %v6054_v59, %v5321_v22  ;;  %v5450_v25 = vor.u32 %v6086_v29, %v5449_v60  ;;  %v7624_v29 = vld [vmem:[#allocation30_spill] sm:$0xff] }
 0x199   :  { %vm3211_vm11 = vcmp.gt.f32.partialorder %v2126_v49, 0.0  ;;  %v3275_v2 = vmul.f32 0.2, %v2126_v49 }
 0x19a   :  { %v2080_v0 = vadd.f32 %v2079_v41, %v2031_v23  ;;  %2225 = vmatmul.bf16.gmra.mxu0 %v6469_v46  ;;  %2677 = vmatpush.bf16.msra.mxu2 %v5322_v9 }
 0x19b   :  { %2274 = vmatmul.bf16.gmra.mxu1 %v6471_v47  ;;  %2323 = vmatmul.bf16.gmra.mxu2 %v6473_v48  ;;  %v3339_v63 = vsel %vm3211_vm11, %v2126_v49, %v3275_v2 }
 0x19c   :  { %2372 = vmatmul.bf16.gmra.mxu3 %v6587_v18  ;;  %v6696_v56 = vpack.c.bf16 %v3339_v63, %v3335_v32  ;;  %v6022_v32 = vld [vmem:[#allocation5 + $0x3f4] sm:$0xf0] }
 0x19d   :  { %2726 = vmatpush.bf16.msra.mxu3 %v5450_v25  ;;  %v5194_v63 = vor.u32 %v6022_v32, %v5193_v39  ;;  %v6050_v39 = vld [vmem:[#allocation5 + $0x4d4] sm:$0xf0] }
 0x19e   :  { %7623 = vst [vmem:[#allocation56_spill] sm:$0xff] %v6696_v56  ;;  %v2128_v38 = vpop.f32.mrf.mxu2 }
 0x19f   :  { %v2129_v3 = vadd.f32 %v2128_v38, %v2080_v0  ;;  %v6698_v23 = vpop.f32.mrf.mxu3  ;;  %v2032_v41 = vpop.f32.mrf.mxu0  ;;  %2628 = vmatpush.bf16.msra.mxu1 %v5194_v63  ;;  %v7625_v38 = vld [vmem:[#allocation31_spill] sm:$0xff] }
 0x1a0   :  { %v2033_v49 = vadd.f32 %v2032_v41, %v6610_v37  ;;  %v2081_v30 = vpop.f32.mrf.mxu1  ;;  %v5986_v63 = vld [vmem:[#allocation5 + $0x2d4] sm:$0xf0] }
 0x1a1   :  { %v3279_v59 = vmul.f32 0.2, %v2129_v3  ;;  %vm3215_vm12 = vcmp.gt.f32.partialorder %v2129_v3, 0.0 }
 0x1a2   :  { %v2082_v2 = vadd.f32 %v2081_v30, %v2033_v49  ;;  %v7627_v49 = vld [vmem:[#allocation48_spill] sm:$0xff]  ;;  %v5305_v30 = vld [vmem:[#allocation5 + $0x4c8] sm:$0xf] }
 0x1a3   :  { %v3343_v25 = vsel %vm3215_vm12, %v2129_v3, %v3279_v59  ;;  %v5177_v59 = vld [vmem:[#allocation5 + $0x3c8] sm:$0xf] }
 0x1a6   :  { %v2130_v22 = vpop.f32.mrf.mxu2 }
 0x1a7   :  { %v2131_v56 = vadd.f32 %v2130_v22, %v2082_v2  ;;  %v6701_v13 = vpop.f32.mrf.mxu3  ;;  %v2035_v0 = vpop.f32.mrf.mxu0  ;;  %v5049_v2 = vld [vmem:[#allocation5 + $0x2c8] sm:$0xf] }
 0x1a8   :  { %v2036_v8 = vadd.f32 %v2035_v0, %v6617_v19  ;;  %v2084_v9 = vpop.f32.mrf.mxu1  ;;  %v5306_v19 = vor.u32 %v6050_v39, %v5305_v30  ;;  %v5433_v22 = vld [vmem:[#allocation5 + $0x5c8] sm:$0xf]  ;;  %v6082_v0 = vld [vmem:[#allocation5 + $0x5d4] sm:$0xf0] }
 0x1a9   :  { %vm3219_vm13 = vcmp.gt.f32.partialorder %v2131_v56, 0.0  ;;  %v3283_v37 = vmul.f32 0.2, %v2131_v56  ;;  %v5434_v18 = vor.u32 %v6082_v0, %v5433_v22  ;;  %v6018_v30 = vld [vmem:[#allocation5 + $0x3d4] sm:$0xf0] }
 0x1aa   :  { %v2085_v60 = vadd.f32 %v2084_v9, %v2036_v8  ;;  %2230 = vmatmul.bf16.gmra.mxu0 %v7624_v29  ;;  %v5050_v9 = vor.u32 %v5986_v63, %v5049_v2  ;;  %2678 = vmatpush.bf16.msra.mxu2 %v5306_v19  ;;  %v5178_v39 = vor.u32 %v6018_v30, %v5177_v59  ;;  %v6046_v30 = vld [vmem:[#allocation5 + $0x4b4] sm:$0xf0] }
 0x1ab   :  { %2279 = vmatmul.bf16.gmra.mxu1 %v7625_v38  ;;  %2328 = vmatmul.bf16.gmra.mxu2 %v7626_v31  ;;  %v3347_v41 = vsel %vm3219_vm13, %v2131_v56, %v3283_v37  ;;  %v6713_v37 = vld [vmem:[#allocation7] sm:$0xf] }
 0x1ac   :  { %2377 = vmatmul.bf16.gmra.mxu3 %v7627_v49  ;;  %v6708_v32 = vpack.c.bf16 %v3347_v41, %v3343_v25  ;;  %2580 = vmatpush.bf16.msra.mxu0 %v5050_v9  ;;  %v6716_v25 = vperm.slane %v6713_v37, 1  ;;  %v7629_v9 = vld [vmem:[#allocation33_spill] sm:$0xff]  ;;  %v6078_v49 = vld [vmem:[#allocation5 + $0x5b4] sm:$0xf0] }
 0x1ad   :  { %2727 = vmatpush.bf16.msra.mxu3 %v5434_v18  ;;  %2629 = vmatpush.bf16.msra.mxu1 %v5178_v39  ;;  %v5033_v39 = vld [vmem:[#allocation5 + $0x2a8] sm:$0xf] }
 0x1ae   :  { %7628 = vst [vmem:[#allocation57_spill] sm:$0xff] %v6708_v32  ;;  %v2133_v8 = vpop.f32.mrf.mxu2  ;;  %v5417_v32 = vld [vmem:[#allocation5 + $0x5a8] sm:$0xf] }
 0x1af   :  { %v2134_v48 = vadd.f32 %v2133_v8, %v2085_v60  ;;  %v6710_v38 = vpop.f32.mrf.mxu3  ;;  %v2037_v31 = vpop.f32.mrf.mxu0  ;;  %v2148_v60 = vadd.f32 %v6626_v4, %v6716_v25  ;;  %v5418_v47 = vor.u32 %v6078_v49, %v5417_v32 }
 0x1b0   :  { %v2038_v56 = vadd.f32 %v2037_v31, %v6620_v33  ;;  %v2086_v3 = vpop.f32.mrf.mxu1 }
 0x1b1   :  { %v3287_v19 = vmul.f32 0.2, %v2134_v48  ;;  %vm3223_vm14 = vcmp.gt.f32.partialorder %v2134_v48, 0.0  ;;  %2728 = vmatpush.bf16.msra.mxu3 %v5418_v47  ;;  %v7633_v47 = vld [vmem:[#allocation35_spill] sm:$0xff] }
 0x1b2   :  { %v2087_v41 = vadd.f32 %v2086_v3, %v2038_v56  ;;  %v7630_v56 = vld [vmem:[#allocation34_spill] sm:$0xff]  ;;  %v7631_v3 = vld [vmem:[#allocation13_spill] sm:$0xff] }
 0x1b3   :  { %v3351_v59 = vsel %vm3223_vm14, %v2134_v48, %v3287_v19 }
 0x1b6   :  { %v2135_v2 = vpop.f32.mrf.mxu2 }
 0x1b7   :  { %v2136_v63 = vadd.f32 %v2135_v2, %v2087_v41  ;;  %v6720_v33 = vpop.f32.mrf.mxu3  ;;  %v2196_v31 = vpop.f32.mrf.mxu0  ;;  %v5289_v41 = vld [vmem:[#allocation5 + $0x4a8] sm:$0xf] }
 0x1b8   :  { %v2197_v18 = vadd.f32 %v2196_v31, %v2148_v60  ;;  %v2245_v22 = vpop.f32.mrf.mxu1  ;;  %v5290_v60 = vor.u32 %v6046_v30, %v5289_v41  ;;  %v5982_v31 = vld [vmem:[#allocation5 + $0x2b4] sm:$0xf0] }
 0x1b9   :  { %vm3227_vm15 = vcmp.gt.f32.partialorder %v2136_v63, 0.0  ;;  %v3291_v0 = vmul.f32 0.2, %v2136_v63  ;;  %v6014_v41 = vld [vmem:[#allocation5 + $0x3b4] sm:$0xf0] }
 0x1ba   :  { %v2246_v8 = vadd.f32 %v2245_v22, %v2197_v18  ;;  %2391 = vmatmul.bf16.vlgmr.msrb.gmra.mxu0 %v7629_v9  ;;  %v2150_v18 = vadd.f32 %v6629_v40, %v6716_v25  ;;  %2679 = vmatpush.bf16.msra.mxu2 %v5290_v60  ;;  %v2153_v40 = vadd.f32 %v6638_v21, %v6716_v25  ;;  %v5017_v21 = vld [vmem:[#allocation5 + $0x288] sm:$0xf] }
 0x1bb   :  { %2440 = vmatmul.bf16.vlgmr.msrb.gmra.mxu1 %v7630_v56  ;;  %2489 = vmatmul.bf16.vlgmr.msrb.gmra.mxu2 %v7631_v3  ;;  %v3355_v4 = vsel %vm3227_vm15, %v2136_v63, %v3291_v0  ;;  %v5034_v56 = vor.u32 %v5982_v31, %v5033_v39 }
 0x1bc   :  { %2538 = vmatmul.bf16.vlgmr.msrb.gmra.mxu3 %v6397_v54  ;;  %v6726_v2 = vpack.c.bf16 %v3355_v4, %v3351_v59  ;;  %v5161_v4 = vld [vmem:[#allocation5 + $0x3a8] sm:$0xf] }
 0x1bd   :  { %2581 = vmatpush.bf16.msra.mxu0 %v5034_v56 }
 0x1be   :  { %7632 = vst [vmem:[#allocation33_spill] sm:$0xff] %v6726_v2  ;;  %v2294_v22 = vpop.f32.mrf.mxu2  ;;  %v5162_v2 = vor.u32 %v6014_v41, %v5161_v4  ;;  %v6074_v4 = vld [vmem:[#allocation5 + $0x594] sm:$0xf0]  ;;  %v2155_v41 = vadd.f32 %v6641_v35, %v6716_v25  ;;  %v2158_v35 = vadd.f32 %v6650_v45, %v6716_v25  ;;  %v5001_v45 = vld [vmem:[#allocation5 + $0x268] sm:$0xf] }
 0x1bf   :  { %v2295_v3 = vadd.f32 %v2294_v22, %v2246_v8  ;;  %v2343_v48 = vpop.f32.mrf.mxu3  ;;  %v2198_v19 = vpop.f32.mrf.mxu0  ;;  %v7635_v22 = vld [vmem:[#allocation15_spill] sm:$0xff] }
 0x1c0   :  { %v2199_v63 = vadd.f32 %v2198_v19, %v2150_v18  ;;  %v2247_v0 = vpop.f32.mrf.mxu1  ;;  %2630 = vmatpush.bf16.msra.mxu1 %v5162_v2  ;;  %v5273_v2 = vld [vmem:[#allocation5 + $0x488] sm:$0xf] }
 0x1c1   :  { %v6730_v59 = vadd.f32 %v2343_v48, %v2295_v3  ;;  %v7634_v3 = vld [vmem:[#allocation36_spill] sm:$0xff]  ;;  %v6042_v48 = vld [vmem:[#allocation5 + $0x494] sm:$0xf0] }
 0x1c2   :  { %v2248_v30 = vadd.f32 %v2247_v0, %v2199_v63  ;;  %v5274_v19 = vor.u32 %v6042_v48, %v5273_v2  ;;  %v5978_v63 = vld [vmem:[#allocation5 + $0x294] sm:$0xf0]  ;;  %v5401_v0 = vld [vmem:[#allocation5 + $0x588] sm:$0xf] }
 0x1c3   :  { %v5145_v2 = vld [vmem:[#allocation5 + $0x388] sm:$0xf]  ;;  %v6010_v48 = vld [vmem:[#allocation5 + $0x394] sm:$0xf0] }
 0x1c4   :  { %2680 = vmatpush.bf16.msra.mxu2 %v5274_v19 }
 0x1c6   :  { %v2296_v39 = vpop.f32.mrf.mxu2 }
 0x1c7   :  { %v2297_v49 = vadd.f32 %v2296_v39, %v2248_v30  ;;  %v2345_v32 = vpop.f32.mrf.mxu3  ;;  %v2201_v8 = vpop.f32.mrf.mxu0  ;;  %v5402_v39 = vor.u32 %v6074_v4, %v5401_v0 }
 0x1c8   :  { %v2202_v31 = vadd.f32 %v2201_v8, %v2153_v40  ;;  %v2250_v60 = vpop.f32.mrf.mxu1  ;;  %v5018_v40 = vor.u32 %v5978_v63, %v5017_v21 }
 0x1c9   :  { %v6734_v18 = vadd.f32 %v2345_v32, %v2297_v49  ;;  %2729 = vmatpush.bf16.msra.mxu3 %v5402_v39  ;;  %v7637_v39 = vld [vmem:[#allocation38_spill] sm:$0xff] }
 0x1ca   :  { %v2251_v56 = vadd.f32 %v2250_v60, %v2202_v31  ;;  %2396 = vmatmul.bf16.gmra.mxu0 %v7633_v47 }
 0x1cb   :  { %2445 = vmatmul.bf16.gmra.mxu1 %v7634_v3  ;;  %2494 = vmatmul.bf16.gmra.mxu2 %v7635_v22  ;;  %v5146_v3 = vor.u32 %v6010_v48, %v5145_v2  ;;  %v2160_v2 = vadd.f32 %v6653_v20, %v6716_v25  ;;  %v2163_v20 = vadd.f32 %v6662_v24, %v6716_v25  ;;  %v4985_v24 = vld [vmem:[#allocation5 + $0x248] sm:$0xf] }
 0x1cc   :  { %2543 = vmatmul.bf16.gmra.mxu3 %v6409_v26  ;;  %2582 = vmatpush.bf16.msra.mxu0 %v5018_v40  ;;  %v7636_v40 = vld [vmem:[#allocation37_spill] sm:$0xff] }
 0x1cd   :  { %2631 = vmatpush.bf16.msra.mxu1 %v5146_v3  ;;  %v5257_v3 = vld [vmem:[#allocation5 + $0x468] sm:$0xf] }
 0x1ce   :  { %v2299_v30 = vpop.f32.mrf.mxu2 }
 0x1cf   :  { %v2300_v49 = vadd.f32 %v2299_v30, %v2251_v56  ;;  %v2348_v32 = vpop.f32.mrf.mxu3  ;;  %v2203_v8 = vpop.f32.mrf.mxu0 }
 0x1d0   :  { %v2204_v31 = vadd.f32 %v2203_v8, %v2155_v41  ;;  %v2252_v60 = vpop.f32.mrf.mxu1 }
 0x1d1   :  { %v6742_v26 = vadd.f32 %v2348_v32, %v2300_v49  ;;  %v7638_v49 = vld [vmem:[#allocation17_spill] sm:$0xff]  ;;  %v6038_v32 = vld [vmem:[#allocation5 + $0x474] sm:$0xf0] }
 0x1d2   :  { %v2253_v22 = vadd.f32 %v2252_v60, %v2204_v31  ;;  %v5258_v8 = vor.u32 %v6038_v32, %v5257_v3  ;;  %v5385_v31 = vld [vmem:[#allocation5 + $0x568] sm:$0xf]  ;;  %v6070_v60 = vld [vmem:[#allocation5 + $0x574] sm:$0xf0] }
 0x1d3   :  { %v5129_v3 = vld [vmem:[#allocation5 + $0x368] sm:$0xf]  ;;  %v6006_v32 = vld [vmem:[#allocation5 + $0x374] sm:$0xf0] }
 0x1d4   :  { %2681 = vmatpush.bf16.msra.mxu2 %v5258_v8 }
 0x1d6   :  { %v2301_v21 = vpop.f32.mrf.mxu2 }
 0x1d7   :  { %v2302_v63 = vadd.f32 %v2301_v21, %v2253_v22  ;;  %v2350_v56 = vpop.f32.mrf.mxu3  ;;  %v2206_v0 = vpop.f32.mrf.mxu0  ;;  %v5974_v22 = vld [vmem:[#allocation5 + $0x274] sm:$0xf0]  ;;  %v5386_v21 = vor.u32 %v6070_v60, %v5385_v31 }
 0x1d8   :  { %v2207_v4 = vadd.f32 %v2206_v0, %v2158_v35  ;;  %v2255_v19 = vpop.f32.mrf.mxu1  ;;  %v5002_v35 = vor.u32 %v5974_v22, %v5001_v45 }
 0x1d9   :  { %v6746_v41 = vadd.f32 %v2350_v56, %v2302_v63  ;;  %2730 = vmatpush.bf16.msra.mxu3 %v5386_v21  ;;  %v7640_v21 = vld [vmem:[#allocation40_spill] sm:$0xff] }
 0x1da   :  { %v2256_v30 = vadd.f32 %v2255_v19, %v2207_v4  ;;  %2401 = vmatmul.bf16.gmra.mxu0 %v7636_v40 }
 0x1db   :  { %2450 = vmatmul.bf16.gmra.mxu1 %v7637_v39  ;;  %2499 = vmatmul.bf16.gmra.mxu2 %v7638_v49  ;;  %v5130_v39 = vor.u32 %v6006_v32, %v5129_v3  ;;  %v2165_v3 = vadd.f32 %v6665_v5, %v6716_v25  ;;  %v2168_v5 = vadd.f32 %v6674_v62, %v6716_v25  ;;  %v4969_v62 = vld [vmem:[#allocation5 + $0x228] sm:$0xf] }
 0x1dc   :  { %2548 = vmatmul.bf16.gmra.mxu3 %v6421_v51  ;;  %2583 = vmatpush.bf16.msra.mxu0 %v5002_v35  ;;  %v7639_v35 = vld [vmem:[#allocation39_spill] sm:$0xff] }
 0x1dd   :  { %2632 = vmatpush.bf16.msra.mxu1 %v5130_v39  ;;  %v5241_v39 = vld [vmem:[#allocation5 + $0x448] sm:$0xf] }
 0x1de   :  { %v2304_v48 = vpop.f32.mrf.mxu2 }
 0x1df   :  { %v2305_v63 = vadd.f32 %v2304_v48, %v2256_v30  ;;  %v2353_v56 = vpop.f32.mrf.mxu3  ;;  %v2208_v0 = vpop.f32.mrf.mxu0 }
 0x1e0   :  { %v2209_v4 = vadd.f32 %v2208_v0, %v2160_v2  ;;  %v2257_v19 = vpop.f32.mrf.mxu1 }
 0x1e1   :  { %v6754_v51 = vadd.f32 %v2353_v56, %v2305_v63  ;;  %v7641_v63 = vld [vmem:[#allocation19_spill] sm:$0xff] }
 0x1e2   :  { %v2258_v49 = vadd.f32 %v2257_v19, %v2209_v4  ;;  %v6034_v56 = vld [vmem:[#allocation5 + $0x454] sm:$0xf0]  ;;  %v5369_v4 = vld [vmem:[#allocation5 + $0x548] sm:$0xf] }
 0x1e3   :  { %v5242_v0 = vor.u32 %v6034_v56, %v5241_v39  ;;  %v6066_v19 = vld [vmem:[#allocation5 + $0x554] sm:$0xf0]  ;;  %v5113_v39 = vld [vmem:[#allocation5 + $0x348] sm:$0xf] }
 0x1e4   :  { %v6002_v56 = vld [vmem:[#allocation5 + $0x354] sm:$0xf0] }
 0x1e5   :  { %2682 = vmatpush.bf16.msra.mxu2 %v5242_v0 }
 0x1e6   :  { %v2306_v45 = vpop.f32.mrf.mxu2 }
 0x1e7   :  { %v2307_v22 = vadd.f32 %v2306_v45, %v2258_v49  ;;  %v2355_v30 = vpop.f32.mrf.mxu3  ;;  %v2211_v31 = vpop.f32.mrf.mxu0  ;;  %v5970_v49 = vld [vmem:[#allocation5 + $0x254] sm:$0xf0]  ;;  %v5370_v45 = vor.u32 %v6066_v19, %v5369_v4 }
 0x1e8   :  { %v2212_v60 = vadd.f32 %v2211_v31, %v2163_v20  ;;  %v2260_v8 = vpop.f32.mrf.mxu1  ;;  %v4986_v20 = vor.u32 %v5970_v49, %v4985_v24 }
 0x1e9   :  { %v6758_v2 = vadd.f32 %v2355_v30, %v2307_v22  ;;  %2731 = vmatpush.bf16.msra.mxu3 %v5370_v45  ;;  %v7643_v45 = vld [vmem:[#allocation42_spill] sm:$0xff] }
 0x1ea   :  { %v2261_v48 = vadd.f32 %v2260_v8, %v2212_v60  ;;  %2406 = vmatmul.bf16.gmra.mxu0 %v7639_v35 }
 0x1eb   :  { %2455 = vmatmul.bf16.gmra.mxu1 %v7640_v21  ;;  %2504 = vmatmul.bf16.gmra.mxu2 %v7641_v63  ;;  %v5114_v21 = vor.u32 %v6002_v56, %v5113_v39  ;;  %v2170_v39 = vadd.f32 %v6677_v61, %v6716_v25  ;;  %v2173_v61 = vadd.f32 %v6686_v6, %v6716_v25  ;;  %v4953_v6 = vld [vmem:[#allocation5 + $0x208] sm:$0xf] }
 0x1ec   :  { %2553 = vmatmul.bf16.gmra.mxu3 %v6433_v14  ;;  %2584 = vmatpush.bf16.msra.mxu0 %v4986_v20  ;;  %v7642_v20 = vld [vmem:[#allocation41_spill] sm:$0xff] }
 0x1ed   :  { %2633 = vmatpush.bf16.msra.mxu1 %v5114_v21  ;;  %v5225_v21 = vld [vmem:[#allocation5 + $0x428] sm:$0xf] }
 0x1ee   :  { %v2309_v32 = vpop.f32.mrf.mxu2 }
 0x1ef   :  { %v2310_v22 = vadd.f32 %v2309_v32, %v2261_v48  ;;  %v2358_v30 = vpop.f32.mrf.mxu3  ;;  %v2213_v31 = vpop.f32.mrf.mxu0 }
 0x1f0   :  { %v2214_v60 = vadd.f32 %v2213_v31, %v2165_v3  ;;  %v2262_v8 = vpop.f32.mrf.mxu1 }
 0x1f1   :  { %v6766_v14 = vadd.f32 %v2358_v30, %v2310_v22  ;;  %v7644_v22 = vld [vmem:[#allocation21_spill] sm:$0xff]  ;;  %v6030_v30 = vld [vmem:[#allocation5 + $0x434] sm:$0xf0] }
 0x1f2   :  { %v2263_v63 = vadd.f32 %v2262_v8, %v2214_v60  ;;  %v5226_v31 = vor.u32 %v6030_v30, %v5225_v21  ;;  %v5353_v60 = vld [vmem:[#allocation5 + $0x528] sm:$0xf]  ;;  %v6062_v8 = vld [vmem:[#allocation5 + $0x534] sm:$0xf0] }
 0x1f3   :  { %v5097_v21 = vld [vmem:[#allocation5 + $0x328] sm:$0xf]  ;;  %v5998_v30 = vld [vmem:[#allocation5 + $0x334] sm:$0xf0] }
 0x1f4   :  { %2683 = vmatpush.bf16.msra.mxu2 %v5226_v31 }
 0x1f6   :  { %v2311_v24 = vpop.f32.mrf.mxu2 }
 0x1f7   :  { %v2312_v49 = vadd.f32 %v2311_v24, %v2263_v63  ;;  %v2360_v48 = vpop.f32.mrf.mxu3  ;;  %v2216_v4 = vpop.f32.mrf.mxu0  ;;  %v5966_v63 = vld [vmem:[#allocation5 + $0x234] sm:$0xf0]  ;;  %v5354_v24 = vor.u32 %v6062_v8, %v5353_v60 }
 0x1f8   :  { %v2217_v19 = vadd.f32 %v2216_v4, %v2168_v5  ;;  %v2265_v0 = vpop.f32.mrf.mxu1  ;;  %v4970_v5 = vor.u32 %v5966_v63, %v4969_v62 }
 0x1f9   :  { %v6770_v3 = vadd.f32 %v2360_v48, %v2312_v49  ;;  %2732 = vmatpush.bf16.msra.mxu3 %v5354_v24  ;;  %v7646_v24 = vld [vmem:[#allocation44_spill] sm:$0xff] }
 0x1fa   :  { %v2266_v32 = vadd.f32 %v2265_v0, %v2217_v19  ;;  %2411 = vmatmul.bf16.gmra.mxu0 %v7642_v20 }
 0x1fb   :  { %2460 = vmatmul.bf16.gmra.mxu1 %v7643_v45  ;;  %2509 = vmatmul.bf16.gmra.mxu2 %v7644_v22  ;;  %v5098_v45 = vor.u32 %v5998_v30, %v5097_v21  ;;  %v2175_v21 = vadd.f32 %v6689_v50, %v6716_v25  ;;  %v2178_v50 = vadd.f32 %v6698_v23, %v6716_v25 }
 0x1fc   :  { %2558 = vmatmul.bf16.gmra.mxu3 %v6445_v42  ;;  %2585 = vmatpush.bf16.msra.mxu0 %v4970_v5  ;;  %v7645_v5 = vld [vmem:[#allocation43_spill] sm:$0xff]  ;;  %v2180_v23 = vadd.f32 %v6701_v13, %v6716_v25  ;;  %v4811_v13 = vld [vmem:[#allocation5 + $0xf8] sm:$0xf0] }
 0x1fd   :  { %2634 = vmatpush.bf16.msra.mxu1 %v5098_v45  ;;  %v5209_v45 = vld [vmem:[#allocation5 + $0x408] sm:$0xf] }
 0x1fe   :  { %v2314_v56 = vpop.f32.mrf.mxu2 }
 0x1ff   :  { %v2315_v49 = vadd.f32 %v2314_v56, %v2266_v32  ;;  %v2363_v48 = vpop.f32.mrf.mxu3  ;;  %v2218_v4 = vpop.f32.mrf.mxu0 }
 0x200   :  { %v2219_v19 = vadd.f32 %v2218_v4, %v2170_v39  ;;  %v2267_v0 = vpop.f32.mrf.mxu1 }
 0x201   :  { %v6778_v42 = vadd.f32 %v2363_v48, %v2315_v49  ;;  %v7647_v49 = vld [vmem:[#allocation23_spill] sm:$0xff] }
 0x202   :  { %v2268_v22 = vadd.f32 %v2267_v0, %v2219_v19  ;;  %v6026_v48 = vld [vmem:[#allocation5 + $0x414] sm:$0xf0]  ;;  %v5337_v19 = vld [vmem:[#allocation5 + $0x508] sm:$0xf] }
 0x203   :  { %v5210_v4 = vor.u32 %v6026_v48, %v5209_v45  ;;  %v6058_v0 = vld [vmem:[#allocation5 + $0x514] sm:$0xf0]  ;;  %v5081_v45 = vld [vmem:[#allocation5 + $0x308] sm:$0xf] }
 0x204   :  { %v5994_v48 = vld [vmem:[#allocation5 + $0x314] sm:$0xf0] }
 0x205   :  { %2684 = vmatpush.bf16.msra.mxu2 %v5210_v4 }
 0x206   :  { %v2316_v62 = vpop.f32.mrf.mxu2 }
 0x207   :  { %v2317_v63 = vadd.f32 %v2316_v62, %v2268_v22  ;;  %v2365_v32 = vpop.f32.mrf.mxu3  ;;  %v2221_v60 = vpop.f32.mrf.mxu0  ;;  %v5962_v22 = vld [vmem:[#allocation5 + $0x214] sm:$0xf0]  ;;  %v5338_v62 = vor.u32 %v6058_v0, %v5337_v19 }
 0x208   :  { %v2222_v8 = vadd.f32 %v2221_v60, %v2173_v61  ;;  %v2270_v31 = vpop.f32.mrf.mxu1  ;;  %v4954_v61 = vor.u32 %v5962_v22, %v4953_v6 }
 0x209   :  { %v6782_v39 = vadd.f32 %v2365_v32, %v2317_v63  ;;  %2733 = vmatpush.bf16.msra.mxu3 %v5338_v62  ;;  %v7649_v62 = vld [vmem:[#allocation47_spill] sm:$0xff] }
 0x20a   :  { %v2271_v56 = vadd.f32 %v2270_v31, %v2222_v8  ;;  %2416 = vmatmul.bf16.gmra.mxu0 %v7645_v5 }
 0x20b   :  { %2465 = vmatmul.bf16.gmra.mxu1 %v7646_v24  ;;  %2514 = vmatmul.bf16.gmra.mxu2 %v7647_v49  ;;  %v5082_v24 = vor.u32 %v5994_v48, %v5081_v45 }
 0x20c   :  { %2563 = vmatmul.bf16.gmra.mxu3 %v6457_v10  ;;  %2586 = vmatpush.bf16.msra.mxu0 %v4954_v61  ;;  %v7648_v61 = vld [vmem:[#allocation46_spill] sm:$0xff] }
 0x20d   :  { %2635 = vmatpush.bf16.msra.mxu1 %v5082_v24 }
 0x20e   :  { %v2319_v30 = vpop.f32.mrf.mxu2 }
 0x20f   :  { %v2320_v63 = vadd.f32 %v2319_v30, %v2271_v56  ;;  %v2368_v32 = vpop.f32.mrf.mxu3  ;;  %v2223_v60 = vpop.f32.mrf.mxu0 }
 0x210   :  { %v2224_v8 = vadd.f32 %v2223_v60, %v2175_v21  ;;  %v2272_v31 = vpop.f32.mrf.mxu1  ;;  %v5577_v60 = vld [vmem:[#allocation5 + $0x6e8] sm:$0xf] }
 0x211   :  { %v6790_v10 = vadd.f32 %v2368_v32, %v2320_v63  ;;  %v7650_v63 = vld [vmem:[#allocation25_spill] sm:$0xff]  ;;  %v4939_v32 = vld [vmem:[#allocation5 + $0x1f8] sm:$0xf0] }
 0x212   :  { %v2273_v49 = vadd.f32 %v2272_v31, %v2224_v8 }
 0x216   :  { %v2321_v6 = vpop.f32.mrf.mxu2 }
 0x217   :  { %v2322_v22 = vadd.f32 %v2321_v6, %v2273_v49  ;;  %v2370_v56 = vpop.f32.mrf.mxu3  ;;  %v2226_v19 = vpop.f32.mrf.mxu0  ;;  %v5956_v49 = vld [vmem:[#allocation5 + $0x1ec] sm:$0xf] }
 0x218   :  { %v2227_v0 = vadd.f32 %v2226_v19, %v2178_v50  ;;  %v2275_v4 = vpop.f32.mrf.mxu1  ;;  %v4942_v48 = vor.u32 %v5956_v49, %v4939_v32  ;;  %v6118_v50 = vld [vmem:[#allocation5 + $0x6f4] sm:$0xf0]  ;;  %v5988_v6 = vld [vmem:[#allocation5 + $0x2ec] sm:$0xf] }
 0x219   :  { %v6794_v21 = vadd.f32 %v2370_v56, %v2322_v22  ;;  %v5067_v22 = vld [vmem:[#allocation5 + $0x2f8] sm:$0xf0] }
 0x21a   :  { %v2276_v30 = vadd.f32 %v2275_v4, %v2227_v0  ;;  %2421 = vmatmul.bf16.gmra.mxu0 %v7648_v61  ;;  %v5578_v0 = vor.u32 %v6118_v50, %v5577_v60  ;;  %v5070_v4 = vor.u32 %v5988_v6, %v5067_v22  ;;  %2873 = vmatpush.bf16.msrb.mxu2 %v4942_v48  ;;  %v7652_v48 = vld [vmem:[#allocation50_spill] sm:$0xff]  ;;  %v7653_v6 = vld [vmem:[#allocation29_spill] sm:$0xff] }
 0x21b   :  { %2470 = vmatmul.bf16.gmra.mxu1 %v7649_v62  ;;  %2519 = vmatmul.bf16.gmra.mxu2 %v7650_v63 }
 0x21c   :  { %2568 = vmatmul.bf16.gmra.mxu3 %v6469_v46  ;;  %v5924_v46 = vld [vmem:[#allocation5 + $0xec] sm:$0xf]  ;;  %2775 = vmatpush.bf16.msrb.mxu0 %v5578_v0  ;;  %v2185_v0 = vadd.f32 %v6720_v33, %v6716_v25 }
 0x21d   :  { %2922 = vmatpush.bf16.msrb.mxu3 %v5070_v4  ;;  %v4814_v54 = vor.u32 %v5924_v46, %v4811_v13  ;;  %v4923_v46 = vld [vmem:[#allocation5 + $0x1d8] sm:$0xf0] }
 0x21e   :  { %v2324_v24 = vpop.f32.mrf.mxu2 }
 0x21f   :  { %v2325_v8 = vadd.f32 %v2324_v24, %v2276_v30  ;;  %v2373_v31 = vpop.f32.mrf.mxu3  ;;  %v2228_v45 = vpop.f32.mrf.mxu0  ;;  %2824 = vmatpush.bf16.msrb.mxu1 %v4814_v54  ;;  %v2183_v30 = vadd.f32 %v6710_v38, %v6716_v25  ;;  %v5952_v54 = vld [vmem:[#allocation5 + $0x1cc] sm:$0xf]  ;;  %v5561_v38 = vld [vmem:[#allocation5 + $0x6c8] sm:$0xf] }
 0x220   :  { %v2229_v56 = vadd.f32 %v2228_v45, %v2180_v23  ;;  %v2277_v19 = vpop.f32.mrf.mxu1  ;;  %v4926_v22 = vor.u32 %v5952_v54, %v4923_v46  ;;  %v5920_v54 = vld [vmem:[#allocation5 + $0xcc] sm:$0xf]  ;;  %v4795_v46 = vld [vmem:[#allocation5 + $0xd8] sm:$0xf0] }
 0x221   :  { %v6802_v63 = vadd.f32 %v2373_v31, %v2325_v8  ;;  %v7651_v31 = vld [vmem:[#allocation49_spill] sm:$0xff] }
 0x222   :  { %v2278_v62 = vadd.f32 %v2277_v19, %v2229_v56  ;;  %v5984_v56 = vld [vmem:[#allocation5 + $0x2cc] sm:$0xf]  ;;  %v5051_v19 = vld [vmem:[#allocation5 + $0x2d8] sm:$0xf0]  ;;  %2874 = vmatpush.bf16.msrb.mxu2 %v4926_v22 }
 0x226   :  { %v2326_v24 = vpop.f32.mrf.mxu2 }
 0x227   :  { %v2327_v49 = vadd.f32 %v2326_v24, %v2278_v62  ;;  %v2375_v32 = vpop.f32.mrf.mxu3  ;;  %v2231_v23 = vpop.f32.mrf.mxu0  ;;  %v6114_v62 = vld [vmem:[#allocation5 + $0x6d4] sm:$0xf0] }
 0x228   :  { %v2232_v45 = vadd.f32 %v2231_v23, %v2183_v30  ;;  %v2280_v60 = vpop.f32.mrf.mxu1  ;;  %v5562_v13 = vor.u32 %v6114_v62, %v5561_v38  ;;  %v5054_v30 = vor.u32 %v5984_v56, %v5051_v19  ;;  %v6823_v19 = vperm.slane %v6713_v37, 2 }
 0x229   :  { %v6806_v50 = vadd.f32 %v2375_v32, %v2327_v49 }
 0x22a   :  { %v2281_v8 = vadd.f32 %v2280_v60, %v2232_v45  ;;  %2426 = vmatmul.bf16.gmra.mxu0 %v7651_v31  ;;  %2923 = vmatpush.bf16.msrb.mxu3 %v5054_v30  ;;  %v5980_v30 = vld [vmem:[#allocation5 + $0x2ac] sm:$0xf] }
 0x22b   :  { %2475 = vmatmul.bf16.gmra.mxu1 %v7652_v48  ;;  %2524 = vmatmul.bf16.gmra.mxu2 %v7653_v6  ;;  %v4798_v6 = vor.u32 %v5920_v54, %v4795_v46 }
 0x22c   :  { %2573 = vmatmul.bf16.gmra.mxu3 %v7624_v29  ;;  %2776 = vmatpush.bf16.msrb.mxu0 %v5562_v13 }
 0x22d   :  { %2825 = vmatpush.bf16.msrb.mxu1 %v4798_v6  ;;  %v5545_v6 = vld [vmem:[#allocation5 + $0x6a8] sm:$0xf] }
 0x22e   :  { %v2329_v4 = vpop.f32.mrf.mxu2 }
 0x22f   :  { %v2330_v24 = vadd.f32 %v2329_v4, %v2281_v8  ;;  %v2378_v49 = vpop.f32.mrf.mxu3  ;;  %v2233_v32 = vpop.f32.mrf.mxu0 }
 0x230   :  { %v2234_v23 = vadd.f32 %v2233_v32, %v2185_v0  ;;  %v2282_v45 = vpop.f32.mrf.mxu1  ;;  %v6110_v0 = vld [vmem:[#allocation5 + $0x6b4] sm:$0xf0] }
 0x231   :  { %v6814_v60 = vadd.f32 %v2378_v49, %v2330_v24  ;;  %v5546_v13 = vor.u32 %v6110_v0, %v5545_v6  ;;  %v5035_v24 = vld [vmem:[#allocation5 + $0x2b8] sm:$0xf0] }
 0x232   :  { %v2283_v29 = vadd.f32 %v2282_v45, %v2234_v23  ;;  %v5038_v45 = vor.u32 %v5980_v30, %v5035_v24 }
 0x233   :  { %2777 = vmatpush.bf16.msrb.mxu0 %v5546_v13 }
 0x234   :  { %2924 = vmatpush.bf16.msrb.mxu3 %v5038_v45  ;;  %v5529_v45 = vld [vmem:[#allocation5 + $0x688] sm:$0xf] }
 0x236   :  { %v2331_v48 = vpop.f32.mrf.mxu2 }
 0x237   :  { %v2332_v25 = vadd.f32 %v2331_v48, %v2283_v29  ;;  %v2380_v33 = vpop.f32.mrf.mxu3  ;;  %v2392_v38 = vpop.f32.mrf.mxu0  ;;  %v5948_v29 = vld [vmem:[#allocation5 + $0x1ac] sm:$0xf]  ;;  %v4907_v48 = vld [vmem:[#allocation5 + $0x1b8] sm:$0xf0] }
 0x238   :  { %v2393_v8 = vadd.f32 %v2392_v38, %v6730_v59  ;;  %v2441_v62 = vpop.f32.mrf.mxu1  ;;  %v4910_v4 = vor.u32 %v5948_v29, %v4907_v48 }
 0x239   :  { %v6817_v56 = vadd.f32 %v2380_v33, %v2332_v25  ;;  %v5916_v25 = vld [vmem:[#allocation5 + $0xac] sm:$0xf]  ;;  %v4779_v33 = vld [vmem:[#allocation5 + $0xb8] sm:$0xf0] }
 0x23a   :  { %v2442_v22 = vadd.f32 %v2441_v62, %v2393_v8  ;;  %2587 = vmatmul.bf16.vlgmr.msra.gmra.mxu0 %v6399_v55  ;;  %2875 = vmatpush.bf16.msrb.mxu2 %v4910_v4  ;;  %v4782_v62 = vor.u32 %v5916_v25, %v4779_v33 }
 0x23b   :  { %2636 = vmatmul.bf16.vlgmr.msra.gmra.mxu1 %v6401_v58  ;;  %2685 = vmatmul.bf16.vlgmr.msra.gmra.mxu2 %v6493_v1 }
 0x23c   :  { %2734 = vmatmul.bf16.vlgmr.msra.gmra.mxu3 %v7629_v9  ;;  %v3232_v38 = vmul.f32 0.2, %v2442_v22  ;;  %vm3168_vm0 = vcmp.gt.f32.partialorder %v2442_v22, 0.0  ;;  %2826 = vmatpush.bf16.msrb.mxu1 %v4782_v62 }
 0x23e   :  { %v2490_v59 = vpop.f32.mrf.mxu2  ;;  %v3296_v48 = vsel %vm3168_vm0, %v2442_v22, %v3232_v38  ;;  %v5944_v22 = vld [vmem:[#allocation5 + $0x18c] sm:$0xf]  ;;  %v5019_v38 = vld [vmem:[#allocation5 + $0x298] sm:$0xf0] }
 0x23f   :  { %v2491_v49 = vadd.f32 %v2490_v59, %v6823_v19  ;;  %v2539_v32 = vpop.f32.mrf.mxu3  ;;  %v2394_v23 = vpop.f32.mrf.mxu0 }
 0x240   :  { %v2395_v54 = vadd.f32 %v2394_v23, %v6734_v18  ;;  %v2443_v37 = vpop.f32.mrf.mxu1  ;;  %v4891_v23 = vld [vmem:[#allocation5 + $0x198] sm:$0xf0] }
 0x241   :  { %v6828_v46 = vadd.f32 %v2539_v32, %v2491_v49  ;;  %v4894_v25 = vor.u32 %v5944_v22, %v4891_v23 }
 0x242   :  { %v2444_v8 = vadd.f32 %v2443_v37, %v2395_v54  ;;  %v6106_v54 = vld [vmem:[#allocation5 + $0x694] sm:$0xf0] }
 0x243   :  { %v5530_v33 = vor.u32 %v6106_v54, %v5529_v45  ;;  %2876 = vmatpush.bf16.msrb.mxu2 %v4894_v25 }
 0x244   :  { %vm3172_vm1 = vcmp.gt.f32.partialorder %v2444_v8, 0.0  ;;  %v3236_v29 = vmul.f32 0.2, %v2444_v8 }
 0x245   :  { %2778 = vmatpush.bf16.msrb.mxu0 %v5530_v33 }
 0x246   :  { %v3300_v6 = vsel %vm3172_vm1, %v2444_v8, %v3236_v29  ;;  %v2492_v0 = vpop.f32.mrf.mxu2 }
 0x247   :  { %v6830_v59 = vpack.c.bf16 %v3300_v6, %v3296_v48  ;;  %v2493_v18 = vadd.f32 %v2492_v0, %v6823_v19  ;;  %v2541_v4 = vpop.f32.mrf.mxu3  ;;  %v2397_v13 = vpop.f32.mrf.mxu0 }
 0x248   :  { %v2398_v30 = vadd.f32 %v2397_v13, %v6742_v26  ;;  %v2446_v24 = vpop.f32.mrf.mxu1  ;;  %v5976_v26 = vld [vmem:[#allocation5 + $0x28c] sm:$0xf]  ;;  %v4763_v13 = vld [vmem:[#allocation5 + $0x98] sm:$0xf0] }
 0x249   :  { %7654 = vst [vmem:[#allocation35_spill] sm:$0xff] %v6830_v59  ;;  %v6834_v49 = vadd.f32 %v2541_v4, %v2493_v18  ;;  %v5022_v48 = vor.u32 %v5976_v26, %v5019_v38  ;;  %v5912_v4 = vld [vmem:[#allocation5 + $0x8c] sm:$0xf]  ;;  %v5323_v59 = vld [vmem:[#allocation5 + $0x4f8] sm:$0xf0] }
 0x24a   :  { %v2447_v32 = vadd.f32 %v2446_v24, %v2398_v30  ;;  %2592 = vmatmul.bf16.gmra.mxu0 %v6411_v27  ;;  %v4766_v22 = vor.u32 %v5912_v4, %v4763_v13 }
 0x24b   :  { %2641 = vmatmul.bf16.gmra.mxu1 %v6413_v28  ;;  %2690 = vmatmul.bf16.gmra.mxu2 %v6507_v7 }
 0x24c   :  { %2739 = vmatmul.bf16.gmra.mxu3 %v7633_v47  ;;  %v3240_v30 = vmul.f32 0.2, %v2447_v32  ;;  %vm3176_vm2 = vcmp.gt.f32.partialorder %v2447_v32, 0.0  ;;  %2827 = vmatpush.bf16.msrb.mxu1 %v4766_v22 }
 0x24d   :  { %2925 = vmatpush.bf16.msrb.mxu3 %v5022_v48  ;;  %v4875_v48 = vld [vmem:[#allocation5 + $0x178] sm:$0xf0] }
 0x24e   :  { %v2495_v37 = vpop.f32.mrf.mxu2  ;;  %v3304_v54 = vsel %vm3176_vm2, %v2447_v32, %v3240_v30  ;;  %v5940_v32 = vld [vmem:[#allocation5 + $0x16c] sm:$0xf] }
 0x24f   :  { %v2496_v8 = vadd.f32 %v2495_v37, %v6823_v19  ;;  %v2544_v62 = vpop.f32.mrf.mxu3  ;;  %v2399_v29 = vpop.f32.mrf.mxu0  ;;  %v4878_v13 = vor.u32 %v5940_v32, %v4875_v48 }
 0x250   :  { %v2400_v6 = vadd.f32 %v2399_v29, %v6746_v41  ;;  %v2448_v0 = vpop.f32.mrf.mxu1 }
 0x251   :  { %v6842_v18 = vadd.f32 %v2544_v62, %v2496_v8  ;;  %2877 = vmatpush.bf16.msrb.mxu2 %v4878_v13 }
 0x252   :  { %v2449_v24 = vadd.f32 %v2448_v0, %v2400_v6  ;;  %v5513_v6 = vld [vmem:[#allocation5 + $0x668] sm:$0xf]  ;;  %v6102_v0 = vld [vmem:[#allocation5 + $0x674] sm:$0xf0] }
 0x253   :  { %v5514_v30 = vor.u32 %v6102_v0, %v5513_v6 }
 0x254   :  { %vm3180_vm3 = vcmp.gt.f32.partialorder %v2449_v24, 0.0  ;;  %v3244_v23 = vmul.f32 0.2, %v2449_v24 }
 0x255   :  { %2779 = vmatpush.bf16.msrb.mxu0 %v5514_v30 }
 0x256   :  { %v2497_v45 = vpop.f32.mrf.mxu2  ;;  %v3308_v37 = vsel %vm3180_vm3, %v2449_v24, %v3244_v23  ;;  %v5003_v24 = vld [vmem:[#allocation5 + $0x278] sm:$0xf0] }
 0x257   :  { %v2498_v41 = vadd.f32 %v2497_v45, %v6823_v19  ;;  %v2546_v26 = vpop.f32.mrf.mxu3  ;;  %v2402_v25 = vpop.f32.mrf.mxu0  ;;  %v6845_v33 = vpack.c.bf16 %v3308_v37, %v3304_v54 }
 0x258   :  { %v2403_v38 = vadd.f32 %v2402_v25, %v6754_v51  ;;  %v2451_v8 = vpop.f32.mrf.mxu1  ;;  %v5972_v51 = vld [vmem:[#allocation5 + $0x26c] sm:$0xf] }
 0x259   :  { %7655 = vst [vmem:[#allocation37_spill] sm:$0xff] %v6845_v33  ;;  %v6848_v62 = vadd.f32 %v2546_v26, %v2498_v41  ;;  %v5006_v54 = vor.u32 %v5972_v51, %v5003_v24  ;;  %v5908_v25 = vld [vmem:[#allocation5 + $0x6c] sm:$0xf] }
 0x25a   :  { %v2452_v29 = vadd.f32 %v2451_v8, %v2403_v38  ;;  %2597 = vmatmul.bf16.gmra.mxu0 %v6423_v52  ;;  %v4747_v38 = vld [vmem:[#allocation5 + $0x78] sm:$0xf0]  ;;  %v6052_v33 = vld [vmem:[#allocation5 + $0x4ec] sm:$0xf] }
 0x25b   :  { %2646 = vmatmul.bf16.gmra.mxu1 %v6425_v53  ;;  %2695 = vmatmul.bf16.gmra.mxu2 %v6523_v36  ;;  %v4750_v48 = vor.u32 %v5908_v25, %v4747_v38  ;;  %v6098_v25 = vld [vmem:[#allocation5 + $0x654] sm:$0xf0] }
 0x25c   :  { %2744 = vmatmul.bf16.gmra.mxu3 %v7636_v40  ;;  %v3248_v8 = vmul.f32 0.2, %v2452_v29  ;;  %vm3184_vm4 = vcmp.gt.f32.partialorder %v2452_v29, 0.0 }
 0x25d   :  { %2926 = vmatpush.bf16.msrb.mxu3 %v5006_v54  ;;  %2828 = vmatpush.bf16.msrb.mxu1 %v4750_v48  ;;  %v4987_v48 = vld [vmem:[#allocation5 + $0x258] sm:$0xf0] }
 0x25e   :  { %v2500_v4 = vpop.f32.mrf.mxu2 }
 0x25f   :  { %v2501_v22 = vadd.f32 %v2500_v4, %v6823_v19  ;;  %v2549_v23 = vpop.f32.mrf.mxu3  ;;  %v2404_v45 = vpop.f32.mrf.mxu0  ;;  %v3312_v4 = vsel %vm3184_vm4, %v2452_v29, %v3248_v8  ;;  %v5936_v29 = vld [vmem:[#allocation5 + $0x14c] sm:$0xf] }
 0x260   :  { %v2405_v37 = vadd.f32 %v2404_v45, %v6758_v2  ;;  %v2453_v41 = vpop.f32.mrf.mxu1 }
 0x261   :  { %v6856_v26 = vadd.f32 %v2549_v23, %v2501_v22 }
 0x262   :  { %v2454_v32 = vadd.f32 %v2453_v41, %v2405_v37  ;;  %v4859_v37 = vld [vmem:[#allocation5 + $0x158] sm:$0xf0]  ;;  %v5497_v41 = vld [vmem:[#allocation5 + $0x648] sm:$0xf] }
 0x263   :  { %v4862_v8 = vor.u32 %v5936_v29, %v4859_v37 }
 0x264   :  { %vm3188_vm5 = vcmp.gt.f32.partialorder %v2454_v32, 0.0  ;;  %v3252_v6 = vmul.f32 0.2, %v2454_v32 }
 0x265   :  { %2878 = vmatpush.bf16.msrb.mxu2 %v4862_v8 }
 0x266   :  { %v2502_v0 = vpop.f32.mrf.mxu2  ;;  %v3316_v51 = vsel %vm3188_vm5, %v2454_v32, %v3252_v6  ;;  %v5498_v32 = vor.u32 %v6098_v25, %v5497_v41 }
 0x267   :  { %v2503_v2 = vadd.f32 %v2502_v0, %v6823_v19  ;;  %v2551_v24 = vpop.f32.mrf.mxu3  ;;  %v2407_v13 = vpop.f32.mrf.mxu0  ;;  %v6859_v30 = vpack.c.bf16 %v3316_v51, %v3312_v4 }
 0x268   :  { %v2408_v22 = vadd.f32 %v2407_v13, %v6766_v14  ;;  %v2456_v23 = vpop.f32.mrf.mxu1  ;;  %v5968_v14 = vld [vmem:[#allocation5 + $0x24c] sm:$0xf]  ;;  %2780 = vmatpush.bf16.msrb.mxu0 %v5498_v32 }
 0x269   :  { %7656 = vst [vmem:[#allocation39_spill] sm:$0xff] %v6859_v30  ;;  %v6862_v45 = vadd.f32 %v2551_v24, %v2503_v2  ;;  %v4990_v51 = vor.u32 %v5968_v14, %v4987_v48 }
 0x26a   :  { %v2457_v54 = vadd.f32 %v2456_v23, %v2408_v22  ;;  %2602 = vmatmul.bf16.gmra.mxu0 %v6435_v15  ;;  %v5904_v22 = vld [vmem:[#allocation5 + $0x4c] sm:$0xf]  ;;  %v4731_v23 = vld [vmem:[#allocation5 + $0x58] sm:$0xf0] }
 0x26b   :  { %2651 = vmatmul.bf16.gmra.mxu1 %v6437_v16  ;;  %2700 = vmatmul.bf16.gmra.mxu2 %v6539_v17  ;;  %v4734_v37 = vor.u32 %v5904_v22, %v4731_v23 }
 0x26c   :  { %2749 = vmatmul.bf16.gmra.mxu3 %v7639_v35  ;;  %v3256_v30 = vmul.f32 0.2, %v2457_v54  ;;  %vm3192_vm6 = vcmp.gt.f32.partialorder %v2457_v54, 0.0 }
 0x26d   :  { %2927 = vmatpush.bf16.msrb.mxu3 %v4990_v51  ;;  %2829 = vmatpush.bf16.msrb.mxu1 %v4734_v37  ;;  %v4971_v37 = vld [vmem:[#allocation5 + $0x238] sm:$0xf0] }
 0x26e   :  { %v2505_v38 = vpop.f32.mrf.mxu2 }
 0x26f   :  { %v2506_v6 = vadd.f32 %v2505_v38, %v6823_v19  ;;  %v2554_v0 = vpop.f32.mrf.mxu3  ;;  %v2409_v4 = vpop.f32.mrf.mxu0  ;;  %v3320_v38 = vsel %vm3192_vm6, %v2457_v54, %v3256_v30  ;;  %v5932_v30 = vld [vmem:[#allocation5 + $0x12c] sm:$0xf]  ;;  %v4843_v54 = vld [vmem:[#allocation5 + $0x138] sm:$0xf0] }
 0x270   :  { %v2410_v2 = vadd.f32 %v2409_v4, %v6770_v3  ;;  %v2458_v24 = vpop.f32.mrf.mxu1  ;;  %v4846_v23 = vor.u32 %v5932_v30, %v4843_v54 }
 0x271   :  { %v6870_v13 = vadd.f32 %v2554_v0, %v2506_v6 }
 0x272   :  { %v2459_v29 = vadd.f32 %v2458_v24, %v2410_v2  ;;  %v5481_v2 = vld [vmem:[#allocation5 + $0x628] sm:$0xf]  ;;  %v6094_v24 = vld [vmem:[#allocation5 + $0x634] sm:$0xf0]  ;;  %2879 = vmatpush.bf16.msrb.mxu2 %v4846_v23 }
 0x274   :  { %vm3196_vm7 = vcmp.gt.f32.partialorder %v2459_v29, 0.0  ;;  %v3260_v41 = vmul.f32 0.2, %v2459_v29 }
 0x276   :  { %v2507_v25 = vpop.f32.mrf.mxu2  ;;  %v3324_v14 = vsel %vm3196_vm7, %v2459_v29, %v3260_v41  ;;  %v5482_v29 = vor.u32 %v6094_v24, %v5481_v2 }
 0x277   :  { %v2508_v3 = vadd.f32 %v2507_v25, %v6823_v19  ;;  %v2556_v48 = vpop.f32.mrf.mxu3  ;;  %v2412_v8 = vpop.f32.mrf.mxu0  ;;  %v6873_v32 = vpack.c.bf16 %v3324_v14, %v3320_v38 }
 0x278   :  { %v2413_v6 = vadd.f32 %v2412_v8, %v6778_v42  ;;  %v2461_v0 = vpop.f32.mrf.mxu1  ;;  %v5964_v42 = vld [vmem:[#allocation5 + $0x22c] sm:$0xf]  ;;  %2781 = vmatpush.bf16.msrb.mxu0 %v5482_v29 }
 0x279   :  { %7657 = vst [vmem:[#allocation41_spill] sm:$0xff] %v6873_v32  ;;  %v6876_v4 = vadd.f32 %v2556_v48, %v2508_v3  ;;  %v4974_v14 = vor.u32 %v5964_v42, %v4971_v37 }
 0x27a   :  { %v2462_v51 = vadd.f32 %v2461_v0, %v2413_v6  ;;  %2607 = vmatmul.bf16.gmra.mxu0 %v6447_v43  ;;  %v5900_v6 = vld [vmem:[#allocation5 + $0x2c] sm:$0xf]  ;;  %v4715_v0 = vld [vmem:[#allocation5 + $0x38] sm:$0xf0] }
 0x27b   :  { %2656 = vmatmul.bf16.gmra.mxu1 %v6449_v44  ;;  %2705 = vmatmul.bf16.gmra.mxu2 %v6555_v57  ;;  %v4718_v54 = vor.u32 %v5900_v6, %v4715_v0 }
 0x27c   :  { %2754 = vmatmul.bf16.gmra.mxu3 %v7642_v20  ;;  %v3264_v32 = vmul.f32 0.2, %v2462_v51  ;;  %vm3200_vm8 = vcmp.gt.f32.partialorder %v2462_v51, 0.0 }
 0x27d   :  { %2928 = vmatpush.bf16.msrb.mxu3 %v4974_v14  ;;  %2830 = vmatpush.bf16.msrb.mxu1 %v4718_v54  ;;  %v4955_v54 = vld [vmem:[#allocation5 + $0x218] sm:$0xf0] }
 0x27e   :  { %v2510_v22 = vpop.f32.mrf.mxu2 }
 0x27f   :  { %v2511_v41 = vadd.f32 %v2510_v22, %v6823_v19  ;;  %v2559_v25 = vpop.f32.mrf.mxu3  ;;  %v2414_v38 = vpop.f32.mrf.mxu0  ;;  %v3328_v22 = vsel %vm3200_vm8, %v2462_v51, %v3264_v32  ;;  %v5928_v32 = vld [vmem:[#allocation5 + $0x10c] sm:$0xf]  ;;  %v4827_v51 = vld [vmem:[#allocation5 + $0x118] sm:$0xf0] }
 0x280   :  { %v2415_v3 = vadd.f32 %v2414_v38, %v6782_v39  ;;  %v2463_v48 = vpop.f32.mrf.mxu1  ;;  %v4830_v0 = vor.u32 %v5928_v32, %v4827_v51 }
 0x281   :  { %v6884_v8 = vadd.f32 %v2559_v25, %v2511_v41 }
 0x282   :  { %v2464_v30 = vadd.f32 %v2463_v48, %v2415_v3  ;;  %v5465_v3 = vld [vmem:[#allocation5 + $0x608] sm:$0xf]  ;;  %v6090_v48 = vld [vmem:[#allocation5 + $0x614] sm:$0xf0]  ;;  %2880 = vmatpush.bf16.msrb.mxu2 %v4830_v0 }
 0x284   :  { %vm3204_vm9 = vcmp.gt.f32.partialorder %v2464_v30, 0.0  ;;  %v3268_v2 = vmul.f32 0.2, %v2464_v30 }
 0x286   :  { %v2512_v24 = vpop.f32.mrf.mxu2  ;;  %v3332_v42 = vsel %vm3204_vm9, %v2464_v30, %v3268_v2  ;;  %v5466_v30 = vor.u32 %v6090_v48, %v5465_v3 }
 0x287   :  { %v2513_v39 = vadd.f32 %v2512_v24, %v6823_v19  ;;  %v2561_v37 = vpop.f32.mrf.mxu3  ;;  %v2417_v23 = vpop.f32.mrf.mxu0  ;;  %v6887_v29 = vpack.c.bf16 %v3332_v42, %v3328_v22 }
 0x288   :  { %v2418_v41 = vadd.f32 %v2417_v23, %v6790_v10  ;;  %v2466_v25 = vpop.f32.mrf.mxu1  ;;  %v5960_v10 = vld [vmem:[#allocation5 + $0x20c] sm:$0xf]  ;;  %2782 = vmatpush.bf16.msrb.mxu0 %v5466_v30 }
 0x289   :  { %7658 = vst [vmem:[#allocation43_spill] sm:$0xff] %v6887_v29  ;;  %v6890_v38 = vadd.f32 %v2561_v37, %v2513_v39  ;;  %v4958_v42 = vor.u32 %v5960_v10, %v4955_v54 }
 0x28a   :  { %v2467_v14 = vadd.f32 %v2466_v25, %v2418_v41  ;;  %2612 = vmatmul.bf16.gmra.mxu0 %v6459_v11  ;;  %v5896_v41 = vld [vmem:[#allocation5 + $0xc] sm:$0xf]  ;;  %v4699_v25 = vld [vmem:[#allocation5 + $0x18] sm:$0xf0] }
 0x28b   :  { %2661 = vmatmul.bf16.gmra.mxu1 %v6461_v12  ;;  %2710 = vmatmul.bf16.gmra.mxu2 %v6571_v34  ;;  %v4702_v51 = vor.u32 %v5896_v41, %v4699_v25  ;;  %v7662_v41 = vld [vmem:[#allocation45_spill] sm:$0xff]  ;;  %v6020_v25 = vld [vmem:[#allocation5 + $0x3ec] sm:$0xf] }
 0x28c   :  { %2759 = vmatmul.bf16.gmra.mxu3 %v7645_v5  ;;  %v3272_v29 = vmul.f32 0.2, %v2467_v14  ;;  %vm3208_vm10 = vcmp.gt.f32.partialorder %v2467_v14, 0.0 }
 0x28d   :  { %2929 = vmatpush.bf16.msrb.mxu3 %v4958_v42  ;;  %2831 = vmatpush.bf16.msrb.mxu1 %v4702_v51 }
 0x28e   :  { %v2515_v6 = vpop.f32.mrf.mxu2 }
 0x28f   :  { %v2516_v2 = vadd.f32 %v2515_v6, %v6823_v19  ;;  %v2564_v24 = vpop.f32.mrf.mxu3  ;;  %v2419_v22 = vpop.f32.mrf.mxu0  ;;  %v3336_v6 = vsel %vm3208_vm10, %v2467_v14, %v3272_v29  ;;  %v6084_v29 = vld [vmem:[#allocation5 + $0x5ec] sm:$0xf]  ;;  %v5451_v14 = vld [vmem:[#allocation5 + $0x5f8] sm:$0xf0] }
 0x290   :  { %v2420_v39 = vadd.f32 %v2419_v22, %v6794_v21  ;;  %v2468_v37 = vpop.f32.mrf.mxu1 }
 0x291   :  { %v6898_v23 = vadd.f32 %v2564_v24, %v2516_v2 }
 0x292   :  { %v2469_v32 = vadd.f32 %v2468_v37, %v2420_v39  ;;  %v7660_v39 = vld [vmem:[#allocation27_spill] sm:$0xff]  ;;  %v7661_v37 = vld [vmem:[#allocation28_spill] sm:$0xff] }
 0x294   :  { %vm3212_vm11 = vcmp.gt.f32.partialorder %v2469_v32, 0.0  ;;  %v3276_v3 = vmul.f32 0.2, %v2469_v32 }
 0x296   :  { %v2517_v48 = vpop.f32.mrf.mxu2  ;;  %v3340_v10 = vsel %vm3212_vm11, %v2469_v32, %v3276_v3  ;;  %v5195_v32 = vld [vmem:[#allocation5 + $0x3f8] sm:$0xf0]  ;;  %v5454_v3 = vor.u32 %v6084_v29, %v5451_v14  ;;  %v5326_v14 = vor.u32 %v6052_v33, %v5323_v59  ;;  %v7664_v59 = vld [vmem:[#allocation31_spill] sm:$0xff] }
 0x297   :  { %v2518_v21 = vadd.f32 %v2517_v48, %v6823_v19  ;;  %v2566_v54 = vpop.f32.mrf.mxu3  ;;  %v2422_v0 = vpop.f32.mrf.mxu0  ;;  %v6901_v30 = vpack.c.bf16 %v3340_v10, %v3336_v6  ;;  %v5198_v48 = vor.u32 %v6020_v25, %v5195_v32  ;;  %v5579_v6 = vld [vmem:[#allocation5 + $0x6f8] sm:$0xf0] }
 0x298   :  { %v2423_v2 = vadd.f32 %v2422_v0, %v6802_v63  ;;  %v2471_v24 = vpop.f32.mrf.mxu1  ;;  %v6116_v63 = vld [vmem:[#allocation5 + $0x6ec] sm:$0xf]  ;;  %3069 = vmatpush.bf16.msra.mxu2 %v5454_v3  ;;  %3020 = vmatpush.bf16.msra.mxu1 %v5326_v14  ;;  %v7665_v33 = vld [vmem:[#allocation32_spill] sm:$0xff] }
 0x299   :  { %7659 = vst [vmem:[#allocation58_spill] sm:$0xff] %v6901_v30  ;;  %v6904_v22 = vadd.f32 %v2566_v54, %v2518_v21  ;;  %v5582_v0 = vor.u32 %v6116_v63, %v5579_v6  ;;  %2971 = vmatpush.bf16.msra.mxu0 %v5198_v48 }
 0x29a   :  { %v2472_v42 = vadd.f32 %v2471_v24, %v2423_v2  ;;  %2617 = vmatmul.bf16.gmra.mxu0 %v7660_v39 }
 0x29b   :  { %2666 = vmatmul.bf16.gmra.mxu1 %v7661_v37  ;;  %2715 = vmatmul.bf16.gmra.mxu2 %v7662_v41 }
 0x29c   :  { %2764 = vmatmul.bf16.gmra.mxu3 %v7648_v61  ;;  %v3280_v61 = vmul.f32 0.2, %v2472_v42  ;;  %vm3216_vm12 = vcmp.gt.f32.partialorder %v2472_v42, 0.0 }
 0x29d   :  { %3118 = vmatpush.bf16.msra.mxu3 %v5582_v0 }
 0x29e   :  { %v2520_v51 = vpop.f32.mrf.mxu2 }
 0x29f   :  { %v2521_v10 = vadd.f32 %v2520_v51, %v6823_v19  ;;  %v2569_v21 = vpop.f32.mrf.mxu3  ;;  %v2424_v54 = vpop.f32.mrf.mxu0  ;;  %v3344_v51 = vsel %vm3216_vm12, %v2472_v42, %v3280_v61  ;;  %v6080_v61 = vld [vmem:[#allocation5 + $0x5cc] sm:$0xf]  ;;  %v5435_v42 = vld [vmem:[#allocation5 + $0x5d8] sm:$0xf0] }
 0x2a0   :  { %v2425_v2 = vadd.f32 %v2424_v54, %v6806_v50  ;;  %v2473_v24 = vpop.f32.mrf.mxu1 }
 0x2a1   :  { %v6912_v30 = vadd.f32 %v2569_v21, %v2521_v10 }
 0x2a2   :  { %v2474_v29 = vadd.f32 %v2473_v24, %v2425_v2  ;;  %v7666_v2 = vld [vmem:[#allocation48_spill] sm:$0xff]  ;;  %v6016_v24 = vld [vmem:[#allocation5 + $0x3cc] sm:$0xf] }
 0x2a4   :  { %vm3220_vm13 = vcmp.gt.f32.partialorder %v2474_v29, 0.0  ;;  %v3284_v25 = vmul.f32 0.2, %v2474_v29 }
 0x2a6   :  { %v2522_v32 = vpop.f32.mrf.mxu2  ;;  %v3348_v63 = vsel %vm3220_vm13, %v2474_v29, %v3284_v25  ;;  %v5179_v29 = vld [vmem:[#allocation5 + $0x3d8] sm:$0xf0]  ;;  %v5438_v25 = vor.u32 %v6080_v61, %v5435_v42 }
 0x2a7   :  { %v2523_v50 = vadd.f32 %v2522_v32, %v6823_v19  ;;  %v2571_v6 = vpop.f32.mrf.mxu3  ;;  %v2427_v3 = vpop.f32.mrf.mxu0  ;;  %v6915_v48 = vpack.c.bf16 %v3348_v63, %v3344_v51  ;;  %v5182_v32 = vor.u32 %v6016_v24, %v5179_v29  ;;  %v5563_v51 = vld [vmem:[#allocation5 + $0x6d8] sm:$0xf0] }
 0x2a8   :  { %v2428_v10 = vadd.f32 %v2427_v3, %v6814_v60  ;;  %v2476_v21 = vpop.f32.mrf.mxu1  ;;  %v6112_v60 = vld [vmem:[#allocation5 + $0x6cc] sm:$0xf]  ;;  %3070 = vmatpush.bf16.msra.mxu2 %v5438_v25 }
 0x2a9   :  { %7663 = vst [vmem:[#allocation27_spill] sm:$0xff] %v6915_v48  ;;  %v6918_v54 = vadd.f32 %v2571_v6, %v2523_v50  ;;  %v5566_v3 = vor.u32 %v6112_v60, %v5563_v51  ;;  %2972 = vmatpush.bf16.msra.mxu0 %v5182_v32 }
 0x2aa   :  { %v2477_v0 = vadd.f32 %v2476_v21, %v2428_v10  ;;  %2622 = vmatmul.bf16.gmra.mxu0 %v7664_v59 }
 0x2ab   :  { %2671 = vmatmul.bf16.gmra.mxu1 %v7665_v33  ;;  %2720 = vmatmul.bf16.gmra.mxu2 %v7666_v2  ;;  %v5307_v2 = vld [vmem:[#allocation5 + $0x4d8] sm:$0xf0] }
 0x2ac   :  { %2769 = vmatmul.bf16.gmra.mxu3 %v7651_v31  ;;  %v6048_v31 = vld [vmem:[#allocation5 + $0x4cc] sm:$0xf]  ;;  %v3288_v33 = vmul.f32 0.2, %v2477_v0  ;;  %vm3224_vm14 = vcmp.gt.f32.partialorder %v2477_v0, 0.0 }
 0x2ad   :  { %3119 = vmatpush.bf16.msra.mxu3 %v5566_v3  ;;  %v5310_v42 = vor.u32 %v6048_v31, %v5307_v2  ;;  %v7668_v31 = vld [vmem:[#allocation34_spill] sm:$0xff]  ;;  %v7669_v2 = vld [vmem:[#allocation13_spill] sm:$0xff] }
 0x2ae   :  { %v2525_v14 = vpop.f32.mrf.mxu2 }
 0x2af   :  { %v2526_v63 = vadd.f32 %v2525_v14, %v6823_v19  ;;  %v2574_v50 = vpop.f32.mrf.mxu3  ;;  %v2429_v6 = vpop.f32.mrf.mxu0  ;;  %3021 = vmatpush.bf16.msra.mxu1 %v5310_v42  ;;  %v3352_v14 = vsel %vm3224_vm14, %v2477_v0, %v3288_v33  ;;  %v6076_v0 = vld [vmem:[#allocation5 + $0x5ac] sm:$0xf] }
 0x2b0   :  { %v2430_v10 = vadd.f32 %v2429_v6, %v6817_v56  ;;  %v2478_v21 = vpop.f32.mrf.mxu1  ;;  %v6012_v33 = vld [vmem:[#allocation5 + $0x3ac] sm:$0xf] }
 0x2b1   :  { %v6926_v48 = vadd.f32 %v2574_v50, %v2526_v63  ;;  %v6108_v42 = vld [vmem:[#allocation5 + $0x6ac] sm:$0xf] }
 0x2b2   :  { %v2479_v61 = vadd.f32 %v2478_v21, %v2430_v10  ;;  %v7670_v10 = vld [vmem:[#allocation14_spill] sm:$0xff] }
 0x2b4   :  { %vm3228_vm15 = vcmp.gt.f32.partialorder %v2479_v61, 0.0  ;;  %v3292_v24 = vmul.f32 0.2, %v2479_v61 }
 0x2b6   :  { %v2527_v29 = vpop.f32.mrf.mxu2  ;;  %v3356_v60 = vsel %vm3228_vm15, %v2479_v61, %v3292_v24  ;;  %v5163_v61 = vld [vmem:[#allocation5 + $0x3b8] sm:$0xf0] }
 0x2b7   :  { %v2528_v56 = vadd.f32 %v2527_v29, %v6823_v19  ;;  %v2576_v51 = vpop.f32.mrf.mxu3  ;;  %v2588_v25 = vpop.f32.mrf.mxu0  ;;  %v6929_v32 = vpack.c.bf16 %v3356_v60, %v3352_v14  ;;  %v5419_v19 = vld [vmem:[#allocation5 + $0x5b8] sm:$0xf0]  ;;  %v5166_v29 = vor.u32 %v6012_v33, %v5163_v61 }
 0x2b8   :  { %v2589_v63 = vadd.f32 %v2588_v25, %v6828_v46  ;;  %v2637_v50 = vpop.f32.mrf.mxu1  ;;  %v5422_v21 = vor.u32 %v6076_v0, %v5419_v19  ;;  %v5547_v24 = vld [vmem:[#allocation5 + $0x6b8] sm:$0xf0] }
 0x2b9   :  { %7667 = vst [vmem:[#allocation28_spill] sm:$0xff] %v6929_v32  ;;  %v6932_v6 = vadd.f32 %v2576_v51, %v2528_v56  ;;  %v5550_v14 = vor.u32 %v6108_v42, %v5547_v24  ;;  %2973 = vmatpush.bf16.msra.mxu0 %v5166_v29  ;;  %v7671_v24 = vld [vmem:[#allocation36_spill] sm:$0xff] }
 0x2ba   :  { %v2638_v3 = vadd.f32 %v2637_v50, %v2589_v63  ;;  %2783 = vmatmul.bf16.vlgmr.msrb.gmra.mxu0 %v7668_v31  ;;  %3071 = vmatpush.bf16.msra.mxu2 %v5422_v21  ;;  %v6044_v50 = vld [vmem:[#allocation5 + $0x4ac] sm:$0xf]  ;;  %v7673_v29 = vld [vmem:[#allocation16_spill] sm:$0xff] }
 0x2bb   :  { %2832 = vmatmul.bf16.vlgmr.msrb.gmra.mxu1 %v7669_v2  ;;  %2881 = vmatmul.bf16.vlgmr.msrb.gmra.mxu2 %v7670_v10  ;;  %v5291_v2 = vld [vmem:[#allocation5 + $0x4b8] sm:$0xf0] }
 0x2bc   :  { %2930 = vmatmul.bf16.vlgmr.msrb.gmra.mxu3 %v6399_v55  ;;  %v5294_v0 = vor.u32 %v6044_v50, %v5291_v2  ;;  %v5531_v50 = vld [vmem:[#allocation5 + $0x698] sm:$0xf0] }
 0x2bd   :  { %3120 = vmatpush.bf16.msra.mxu3 %v5550_v14  ;;  %v6072_v14 = vld [vmem:[#allocation5 + $0x58c] sm:$0xf] }
 0x2be   :  { %v2686_v46 = vpop.f32.mrf.mxu2  ;;  %3022 = vmatpush.bf16.msra.mxu1 %v5294_v0 }
 0x2bf   :  { %v2687_v60 = vadd.f32 %v2686_v46, %v2638_v3  ;;  %v2735_v56 = vpop.f32.mrf.mxu3  ;;  %v2590_v51 = vpop.f32.mrf.mxu0  ;;  %v7672_v46 = vld [vmem:[#allocation15_spill] sm:$0xff] }
 0x2c0   :  { %v2591_v25 = vadd.f32 %v2590_v51, %v6834_v49  ;;  %v2639_v63 = vpop.f32.mrf.mxu1 }
 0x2c1   :  { %v6939_v55 = vadd.f32 %v2735_v56, %v2687_v60  ;;  %v5403_v60 = vld [vmem:[#allocation5 + $0x598] sm:$0xf0]  ;;  %v6008_v56 = vld [vmem:[#allocation5 + $0x38c] sm:$0xf] }
 0x2c2   :  { %v2640_v10 = vadd.f32 %v2639_v63, %v2591_v25  ;;  %v5406_v51 = vor.u32 %v6072_v14, %v5403_v60  ;;  %v5147_v25 = vld [vmem:[#allocation5 + $0x398] sm:$0xf0]  ;;  %v6104_v63 = vld [vmem:[#allocation5 + $0x68c] sm:$0xf] }
 0x2c3   :  { %v5150_v2 = vor.u32 %v6008_v56, %v5147_v25 }
 0x2c4   :  { %3072 = vmatpush.bf16.msra.mxu2 %v5406_v51 }
 0x2c5   :  { %2974 = vmatpush.bf16.msra.mxu0 %v5150_v2  ;;  %v7676_v2 = vld [vmem:[#allocation18_spill] sm:$0xff] }
 0x2c6   :  { %v2688_v19 = vpop.f32.mrf.mxu2 }
 0x2c7   :  { %v2689_v32 = vadd.f32 %v2688_v19, %v2640_v10  ;;  %v2737_v33 = vpop.f32.mrf.mxu3  ;;  %v2593_v61 = vpop.f32.mrf.mxu0 }
 0x2c8   :  { %v2594_v3 = vadd.f32 %v2593_v61, %v6842_v18  ;;  %v2642_v42 = vpop.f32.mrf.mxu1 }
 0x2c9   :  { %v6942_v21 = vadd.f32 %v2737_v33, %v2689_v32  ;;  %v5534_v32 = vor.u32 %v6104_v63, %v5531_v50  ;;  %v7674_v50 = vld [vmem:[#allocation38_spill] sm:$0xff] }
 0x2ca   :  { %v2643_v49 = vadd.f32 %v2642_v42, %v2594_v3  ;;  %2788 = vmatmul.bf16.gmra.mxu0 %v7671_v24  ;;  %v6040_v3 = vld [vmem:[#allocation5 + $0x48c] sm:$0xf]  ;;  %v5275_v42 = vld [vmem:[#allocation5 + $0x498] sm:$0xf0] }
 0x2cb   :  { %2837 = vmatmul.bf16.gmra.mxu1 %v7672_v46  ;;  %2886 = vmatmul.bf16.gmra.mxu2 %v7673_v29  ;;  %v5278_v29 = vor.u32 %v6040_v3, %v5275_v42  ;;  %v5515_v3 = vld [vmem:[#allocation5 + $0x678] sm:$0xf0] }
 0x2cc   :  { %2935 = vmatmul.bf16.gmra.mxu3 %v6411_v27 }
 0x2cd   :  { %3121 = vmatpush.bf16.msra.mxu3 %v5534_v32  ;;  %3023 = vmatpush.bf16.msra.mxu1 %v5278_v29  ;;  %v6068_v32 = vld [vmem:[#allocation5 + $0x56c] sm:$0xf] }
 0x2ce   :  { %v2691_v18 = vpop.f32.mrf.mxu2 }
 0x2cf   :  { %v2692_v10 = vadd.f32 %v2691_v18, %v2643_v49  ;;  %v2740_v0 = vpop.f32.mrf.mxu3  ;;  %v2595_v19 = vpop.f32.mrf.mxu0  ;;  %v7675_v18 = vld [vmem:[#allocation17_spill] sm:$0xff] }
 0x2d0   :  { %v2596_v33 = vadd.f32 %v2595_v19, %v6848_v62  ;;  %v2644_v61 = vpop.f32.mrf.mxu1 }
 0x2d1   :  { %v6949_v27 = vadd.f32 %v2740_v0, %v2692_v10  ;;  %v5387_v10 = vld [vmem:[#allocation5 + $0x578] sm:$0xf0]  ;;  %v6004_v0 = vld [vmem:[#allocation5 + $0x36c] sm:$0xf] }
 0x2d2   :  { %v2645_v46 = vadd.f32 %v2644_v61, %v2596_v33  ;;  %v5390_v19 = vor.u32 %v6068_v32, %v5387_v10  ;;  %v5131_v33 = vld [vmem:[#allocation5 + $0x378] sm:$0xf0]  ;;  %v6100_v61 = vld [vmem:[#allocation5 + $0x66c] sm:$0xf] }
 0x2d3   :  { %v5134_v42 = vor.u32 %v6004_v0, %v5131_v33 }
 0x2d4   :  { %3073 = vmatpush.bf16.msra.mxu2 %v5390_v19 }
 0x2d5   :  { %2975 = vmatpush.bf16.msra.mxu0 %v5134_v42  ;;  %v7679_v42 = vld [vmem:[#allocation20_spill] sm:$0xff] }
 0x2d6   :  { %v2693_v14 = vpop.f32.mrf.mxu2 }
 0x2d7   :  { %v2694_v60 = vadd.f32 %v2693_v14, %v2645_v46  ;;  %v2742_v56 = vpop.f32.mrf.mxu3  ;;  %v2598_v25 = vpop.f32.mrf.mxu0  ;;  %v5518_v46 = vor.u32 %v6100_v61, %v5515_v3  ;;  %v7677_v3 = vld [vmem:[#allocation40_spill] sm:$0xff] }
 0x2d8   :  { %v2599_v49 = vadd.f32 %v2598_v25, %v6856_v26  ;;  %v2647_v63 = vpop.f32.mrf.mxu1 }
 0x2d9   :  { %v6952_v51 = vadd.f32 %v2742_v56, %v2694_v60  ;;  %3122 = vmatpush.bf16.msra.mxu3 %v5518_v46  ;;  %v6064_v46 = vld [vmem:[#allocation5 + $0x54c] sm:$0xf] }
 0x2da   :  { %v2648_v62 = vadd.f32 %v2647_v63, %v2599_v49  ;;  %2793 = vmatmul.bf16.gmra.mxu0 %v7674_v50  ;;  %v6036_v49 = vld [vmem:[#allocation5 + $0x46c] sm:$0xf]  ;;  %v5259_v63 = vld [vmem:[#allocation5 + $0x478] sm:$0xf0] }
 0x2db   :  { %2842 = vmatmul.bf16.gmra.mxu1 %v7675_v18  ;;  %2891 = vmatmul.bf16.gmra.mxu2 %v7676_v2  ;;  %v5262_v2 = vor.u32 %v6036_v49, %v5259_v63  ;;  %v5499_v49 = vld [vmem:[#allocation5 + $0x658] sm:$0xf0] }
 0x2dc   :  { %2940 = vmatmul.bf16.gmra.mxu3 %v6423_v52 }
 0x2dd   :  { %3024 = vmatpush.bf16.msra.mxu1 %v5262_v2 }
 0x2de   :  { %v2696_v26 = vpop.f32.mrf.mxu2 }
 0x2df   :  { %v2697_v29 = vadd.f32 %v2696_v26, %v2648_v62  ;;  %v2745_v14 = vpop.f32.mrf.mxu3  ;;  %v2600_v60 = vpop.f32.mrf.mxu0  ;;  %v7678_v26 = vld [vmem:[#allocation19_spill] sm:$0xff] }
 0x2e0   :  { %v2601_v56 = vadd.f32 %v2600_v60, %v6862_v45  ;;  %v2649_v25 = vpop.f32.mrf.mxu1 }
 0x2e1   :  { %v6959_v52 = vadd.f32 %v2745_v14, %v2697_v29  ;;  %v5371_v29 = vld [vmem:[#allocation5 + $0x558] sm:$0xf0]  ;;  %v6000_v14 = vld [vmem:[#allocation5 + $0x34c] sm:$0xf] }
 0x2e2   :  { %v2650_v18 = vadd.f32 %v2649_v25, %v2601_v56  ;;  %v5374_v60 = vor.u32 %v6064_v46, %v5371_v29  ;;  %v5115_v56 = vld [vmem:[#allocation5 + $0x358] sm:$0xf0]  ;;  %v6096_v25 = vld [vmem:[#allocation5 + $0x64c] sm:$0xf] }
 0x2e3   :  { %v5118_v63 = vor.u32 %v6000_v14, %v5115_v56 }
 0x2e4   :  { %3074 = vmatpush.bf16.msra.mxu2 %v5374_v60 }
 0x2e5   :  { %2976 = vmatpush.bf16.msra.mxu0 %v5118_v63  ;;  %v7682_v63 = vld [vmem:[#allocation22_spill] sm:$0xff] }
 0x2e6   :  { %v2698_v32 = vpop.f32.mrf.mxu2 }
 0x2e7   :  { %v2699_v10 = vadd.f32 %v2698_v32, %v2650_v18  ;;  %v2747_v0 = vpop.f32.mrf.mxu3  ;;  %v2603_v33 = vpop.f32.mrf.mxu0  ;;  %v5502_v18 = vor.u32 %v6096_v25, %v5499_v49  ;;  %v7680_v49 = vld [vmem:[#allocation42_spill] sm:$0xff] }
 0x2e8   :  { %v2604_v62 = vadd.f32 %v2603_v33, %v6870_v13  ;;  %v2652_v61 = vpop.f32.mrf.mxu1 }
 0x2e9   :  { %v6962_v19 = vadd.f32 %v2747_v0, %v2699_v10  ;;  %3123 = vmatpush.bf16.msra.mxu3 %v5502_v18  ;;  %v6060_v18 = vld [vmem:[#allocation5 + $0x52c] sm:$0xf] }
 0x2ea   :  { %v2653_v45 = vadd.f32 %v2652_v61, %v2604_v62  ;;  %2798 = vmatmul.bf16.gmra.mxu0 %v7677_v3  ;;  %v6032_v62 = vld [vmem:[#allocation5 + $0x44c] sm:$0xf]  ;;  %v5243_v61 = vld [vmem:[#allocation5 + $0x458] sm:$0xf0] }
 0x2eb   :  { %2847 = vmatmul.bf16.gmra.mxu1 %v7678_v26  ;;  %2896 = vmatmul.bf16.gmra.mxu2 %v7679_v42  ;;  %v5246_v42 = vor.u32 %v6032_v62, %v5243_v61  ;;  %v5483_v62 = vld [vmem:[#allocation5 + $0x638] sm:$0xf0] }
 0x2ec   :  { %2945 = vmatmul.bf16.gmra.mxu3 %v6435_v15 }
 0x2ed   :  { %3025 = vmatpush.bf16.msra.mxu1 %v5246_v42 }
 0x2ee   :  { %v2701_v13 = vpop.f32.mrf.mxu2 }
 0x2ef   :  { %v2702_v2 = vadd.f32 %v2701_v13, %v2653_v45  ;;  %v2750_v32 = vpop.f32.mrf.mxu3  ;;  %v2605_v10 = vpop.f32.mrf.mxu0  ;;  %v7681_v13 = vld [vmem:[#allocation21_spill] sm:$0xff] }
 0x2f0   :  { %v2606_v0 = vadd.f32 %v2605_v10, %v6876_v4  ;;  %v2654_v33 = vpop.f32.mrf.mxu1 }
 0x2f1   :  { %v6969_v15 = vadd.f32 %v2750_v32, %v2702_v2  ;;  %v5355_v2 = vld [vmem:[#allocation5 + $0x538] sm:$0xf0]  ;;  %v5996_v32 = vld [vmem:[#allocation5 + $0x32c] sm:$0xf] }
 0x2f2   :  { %v2655_v26 = vadd.f32 %v2654_v33, %v2606_v0  ;;  %v5358_v10 = vor.u32 %v6060_v18, %v5355_v2  ;;  %v5099_v0 = vld [vmem:[#allocation5 + $0x338] sm:$0xf0]  ;;  %v6092_v33 = vld [vmem:[#allocation5 + $0x62c] sm:$0xf] }
 0x2f3   :  { %v5102_v61 = vor.u32 %v5996_v32, %v5099_v0 }
 0x2f4   :  { %3075 = vmatpush.bf16.msra.mxu2 %v5358_v10 }
 0x2f5   :  { %2977 = vmatpush.bf16.msra.mxu0 %v5102_v61  ;;  %v7685_v61 = vld [vmem:[#allocation24_spill] sm:$0xff] }
 0x2f6   :  { %v2703_v46 = vpop.f32.mrf.mxu2 }
 0x2f7   :  { %v2704_v29 = vadd.f32 %v2703_v46, %v2655_v26  ;;  %v2752_v14 = vpop.f32.mrf.mxu3  ;;  %v2608_v56 = vpop.f32.mrf.mxu0  ;;  %v5486_v26 = vor.u32 %v6092_v33, %v5483_v62  ;;  %v7683_v62 = vld [vmem:[#allocation44_spill] sm:$0xff] }
 0x2f8   :  { %v2609_v45 = vadd.f32 %v2608_v56, %v6884_v8  ;;  %v2657_v25 = vpop.f32.mrf.mxu1 }
 0x2f9   :  { %v6972_v60 = vadd.f32 %v2752_v14, %v2704_v29  ;;  %3124 = vmatpush.bf16.msra.mxu3 %v5486_v26  ;;  %v6056_v26 = vld [vmem:[#allocation5 + $0x50c] sm:$0xf] }
 0x2fa   :  { %v2658_v4 = vadd.f32 %v2657_v25, %v2609_v45  ;;  %2803 = vmatmul.bf16.gmra.mxu0 %v7680_v49  ;;  %v6028_v45 = vld [vmem:[#allocation5 + $0x42c] sm:$0xf]  ;;  %v5227_v25 = vld [vmem:[#allocation5 + $0x438] sm:$0xf0] }
 0x2fb   :  { %2852 = vmatmul.bf16.gmra.mxu1 %v7681_v13  ;;  %2901 = vmatmul.bf16.gmra.mxu2 %v7682_v63  ;;  %v5230_v63 = vor.u32 %v6028_v45, %v5227_v25  ;;  %v5467_v45 = vld [vmem:[#allocation5 + $0x618] sm:$0xf0] }
 0x2fc   :  { %2950 = vmatmul.bf16.gmra.mxu3 %v6447_v43 }
 0x2fd   :  { %3026 = vmatpush.bf16.msra.mxu1 %v5230_v63 }
 0x2fe   :  { %v2706_v8 = vpop.f32.mrf.mxu2 }
 0x2ff   :  { %v2707_v42 = vadd.f32 %v2706_v8, %v2658_v4  ;;  %v2755_v46 = vpop.f32.mrf.mxu3  ;;  %v2610_v29 = vpop.f32.mrf.mxu0  ;;  %v7684_v8 = vld [vmem:[#allocation23_spill] sm:$0xff] }
 0x300   :  { %v2611_v14 = vadd.f32 %v2610_v29, %v6890_v38  ;;  %v2659_v56 = vpop.f32.mrf.mxu1 }
 0x301   :  { %v6979_v43 = vadd.f32 %v2755_v46, %v2707_v42  ;;  %v5339_v42 = vld [vmem:[#allocation5 + $0x518] sm:$0xf0]  ;;  %v5992_v46 = vld [vmem:[#allocation5 + $0x30c] sm:$0xf] }
 0x302   :  { %v2660_v13 = vadd.f32 %v2659_v56, %v2611_v14  ;;  %v5342_v29 = vor.u32 %v6056_v26, %v5339_v42  ;;  %v5083_v14 = vld [vmem:[#allocation5 + $0x318] sm:$0xf0]  ;;  %v6088_v56 = vld [vmem:[#allocation5 + $0x60c] sm:$0xf] }
 0x303   :  { %v5086_v25 = vor.u32 %v5992_v46, %v5083_v14 }
 0x304   :  { %3076 = vmatpush.bf16.msra.mxu2 %v5342_v29 }
 0x305   :  { %2978 = vmatpush.bf16.msra.mxu0 %v5086_v25  ;;  %v7688_v25 = vld [vmem:[#allocation26_spill] sm:$0xff] }
 0x306   :  { %v2708_v18 = vpop.f32.mrf.mxu2 }
 0x307   :  { %v2709_v2 = vadd.f32 %v2708_v18, %v2660_v13  ;;  %v2757_v32 = vpop.f32.mrf.mxu3  ;;  %v2613_v0 = vpop.f32.mrf.mxu0  ;;  %v5470_v13 = vor.u32 %v6088_v56, %v5467_v45  ;;  %v7686_v45 = vld [vmem:[#allocation47_spill] sm:$0xff] }
 0x308   :  { %v2614_v4 = vadd.f32 %v2613_v0, %v6898_v23  ;;  %v2662_v33 = vpop.f32.mrf.mxu1 }
 0x309   :  { %v6982_v10 = vadd.f32 %v2757_v32, %v2709_v2  ;;  %3125 = vmatpush.bf16.msra.mxu3 %v5470_v13 }
 0x30a   :  { %v2663_v38 = vadd.f32 %v2662_v33, %v2614_v4  ;;  %2808 = vmatmul.bf16.gmra.mxu0 %v7683_v62  ;;  %v6024_v4 = vld [vmem:[#allocation5 + $0x40c] sm:$0xf]  ;;  %v5211_v33 = vld [vmem:[#allocation5 + $0x418] sm:$0xf0] }
 0x30b   :  { %2857 = vmatmul.bf16.gmra.mxu1 %v7684_v8  ;;  %2906 = vmatmul.bf16.gmra.mxu2 %v7685_v61  ;;  %v5214_v61 = vor.u32 %v6024_v4, %v5211_v33 }
 0x30c   :  { %2955 = vmatmul.bf16.gmra.mxu3 %v6459_v11 }
 0x30d   :  { %3027 = vmatpush.bf16.msra.mxu1 %v5214_v61 }
 0x30e   :  { %v2711_v23 = vpop.f32.mrf.mxu2 }
 0x30f   :  { %v2712_v63 = vadd.f32 %v2711_v23, %v2663_v38  ;;  %v2760_v18 = vpop.f32.mrf.mxu3  ;;  %v2615_v2 = vpop.f32.mrf.mxu0  ;;  %v7687_v23 = vld [vmem:[#allocation25_spill] sm:$0xff] }
 0x310   :  { %v2616_v32 = vadd.f32 %v2615_v2, %v6904_v22  ;;  %v2664_v0 = vpop.f32.mrf.mxu1 }
 0x311   :  { %v6989_v11 = vadd.f32 %v2760_v18, %v2712_v63 }
 0x312   :  { %v2665_v8 = vadd.f32 %v2664_v0, %v2616_v32 }
 0x316   :  { %v2713_v26 = vpop.f32.mrf.mxu2 }
 0x317   :  { %v2714_v42 = vadd.f32 %v2713_v26, %v2665_v8  ;;  %v2762_v46 = vpop.f32.mrf.mxu3  ;;  %v2618_v14 = vpop.f32.mrf.mxu0 }
 0x318   :  { %v2619_v38 = vadd.f32 %v2618_v14, %v6912_v30  ;;  %v2667_v56 = vpop.f32.mrf.mxu1 }
 0x319   :  { %v6992_v29 = vadd.f32 %v2762_v46, %v2714_v42 }
 0x31a   :  { %v2668_v22 = vadd.f32 %v2667_v56, %v2619_v38  ;;  %2813 = vmatmul.bf16.gmra.mxu0 %v7686_v45  ;;  %v7689_v38 = vld [vmem:[#allocation50_spill] sm:$0xff]  ;;  %v7690_v56 = vld [vmem:[#allocation29_spill] sm:$0xff] }
 0x31b   :  { %2862 = vmatmul.bf16.gmra.mxu1 %v7687_v23  ;;  %2911 = vmatmul.bf16.gmra.mxu2 %v7688_v25 }
 0x31c   :  { %2960 = vmatmul.bf16.gmra.mxu3 %v7660_v39 }
 0x31e   :  { %v2716_v13 = vpop.f32.mrf.mxu2 }
 0x31f   :  { %v2717_v63 = vadd.f32 %v2716_v13, %v2668_v22  ;;  %v2765_v18 = vpop.f32.mrf.mxu3  ;;  %v2620_v2 = vpop.f32.mrf.mxu0  ;;  %v7691_v22 = vld [vmem:[#allocation30_spill] sm:$0xff] }
 0x320   :  { %v2621_v32 = vadd.f32 %v2620_v2, %v6918_v54  ;;  %v2669_v0 = vpop.f32.mrf.mxu1  ;;  %v5769_v2 = vld [vmem:[#allocation8 + $0x170] sm:$0xf] }
 0x321   :  { %v6999_v30 = vadd.f32 %v2765_v18, %v2717_v63 }
 0x322   :  { %v2670_v4 = vadd.f32 %v2669_v0, %v2621_v32  ;;  %v6166_v32 = vld [vmem:[#allocation8 + $0x174] sm:$0xf0] }
 0x326   :  { %v2718_v33 = vpop.f32.mrf.mxu2 }
 0x327   :  { %v2719_v8 = vadd.f32 %v2718_v33, %v2670_v4  ;;  %v2767_v61 = vpop.f32.mrf.mxu3  ;;  %v2623_v26 = vpop.f32.mrf.mxu0  ;;  %v5770_v4 = vor.u32 %v6166_v32, %v5769_v2  ;;  %v5641_v33 = vld [vmem:[#allocation8 + $0x70] sm:$0xf] }
 0x328   :  { %v2624_v42 = vadd.f32 %v2623_v26, %v6926_v48  ;;  %v2672_v46 = vpop.f32.mrf.mxu1 }
 0x329   :  { %v7002_v14 = vadd.f32 %v2767_v61, %v2719_v8  ;;  %v6134_v8 = vld [vmem:[#allocation8 + $0x74] sm:$0xf0]  ;;  %v5833_v61 = vld [vmem:[#allocation8 + $0x1f0] sm:$0xf]  ;;  %3879 = vmatpush.bf16.msrb.mxu2 %v5770_v4 }
 0x32a   :  { %v2673_v39 = vadd.f32 %v2672_v46, %v2624_v42  ;;  %2818 = vmatmul.bf16.gmra.mxu0 %v7689_v38  ;;  %v5642_v26 = vor.u32 %v6134_v8, %v5641_v33  ;;  %v6182_v42 = vld [vmem:[#allocation8 + $0x1f4] sm:$0xf0]  ;;  %v5705_v46 = vld [vmem:[#allocation8 + $0xf0] sm:$0xf] }
 0x32b   :  { %2867 = vmatmul.bf16.gmra.mxu1 %v7690_v56  ;;  %2916 = vmatmul.bf16.gmra.mxu2 %v7691_v22 }
 0x32c   :  { %2965 = vmatmul.bf16.gmra.mxu3 %v7664_v59  ;;  %v6150_v59 = vld [vmem:[#allocation8 + $0xf4] sm:$0xf0]  ;;  %3781 = vmatpush.bf16.msrb.mxu0 %v5642_v26 }
 0x32d   :  { %v5706_v56 = vor.u32 %v6150_v59, %v5705_v46  ;;  %v6164_v46 = vld [vmem:[#allocation8 + $0x164] sm:$0xf0] }
 0x32e   :  { %v2721_v54 = vpop.f32.mrf.mxu2 }
 0x32f   :  { %v2722_v23 = vadd.f32 %v2721_v54, %v2673_v39  ;;  %v2770_v25 = vpop.f32.mrf.mxu3  ;;  %v2625_v13 = vpop.f32.mrf.mxu0  ;;  %v5834_v39 = vor.u32 %v6182_v42, %v5833_v61  ;;  %3830 = vmatpush.bf16.msrb.mxu1 %v5706_v56  ;;  %v5825_v56 = vld [vmem:[#allocation8 + $0x1e0] sm:$0xf] }
 0x330   :  { %v2626_v63 = vadd.f32 %v2625_v13, %v6932_v6  ;;  %v2674_v18 = vpop.f32.mrf.mxu1 }
 0x331   :  { %v7009_v48 = vadd.f32 %v2770_v25, %v2722_v23  ;;  %3928 = vmatpush.bf16.msrb.mxu3 %v5834_v39  ;;  %v6227_v25 = vld [vmem:[#allocation7] sm:$0xf]  ;;  %v5633_v39 = vld [vmem:[#allocation8 + $0x60] sm:$0xf] }
 0x332   :  { %v2675_v0 = vadd.f32 %v2674_v18, %v2626_v63  ;;  %v7011_v13 = vperm.slane %v6227_v25, 3  ;;  %v5697_v25 = vld [vmem:[#allocation8 + $0xe0] sm:$0xf] }
 0x336   :  { %v2723_v22 = vpop.f32.mrf.mxu2 }
 0x337   :  { %v2724_v6 = vadd.f32 %v2723_v22, %v2675_v0  ;;  %v2772_v54 = vpop.f32.mrf.mxu3  ;;  %v2784_v23 = vpop.f32.mrf.mxu0 }
 0x338   :  { %v2785_v63 = vadd.f32 %v2784_v23, %v6939_v55  ;;  %v2833_v18 = vpop.f32.mrf.mxu1 }
 0x339   :  { %v7014_v2 = vadd.f32 %v2772_v54, %v2724_v6  ;;  %v2834_v32 = vadd.f32 %v2833_v18, %v7011_v13 }
 0x33a   :  { %2979 = vmatmul.bf16.vlgmr.msra.gmra.mxu0 %v6401_v58  ;;  %v3233_v61 = vmul.f32 0.2, %v2785_v63  ;;  %vm3169_vm0 = vcmp.gt.f32.partialorder %v2785_v63, 0.0  ;;  %v5761_v58 = vld [vmem:[#allocation8 + $0x160] sm:$0xf] }
 0x33b   :  { %3028 = vmatmul.bf16.vlgmr.msra.gmra.mxu1 %v6493_v1  ;;  %3077 = vmatmul.bf16.vlgmr.msra.gmra.mxu2 %v7629_v9  ;;  %v5762_v1 = vor.u32 %v6164_v46, %v5761_v58  ;;  %v6132_v9 = vld [vmem:[#allocation8 + $0x64] sm:$0xf0] }
 0x33c   :  { %3126 = vmatmul.bf16.vlgmr.msra.gmra.mxu3 %v7668_v31  ;;  %v6180_v31 = vld [vmem:[#allocation8 + $0x1e4] sm:$0xf0]  ;;  %v3297_v22 = vsel %vm3169_vm0, %v2785_v63, %v3233_v61  ;;  %v5634_v54 = vor.u32 %v6132_v9, %v5633_v39 }
 0x33d   :  { %3880 = vmatpush.bf16.msrb.mxu2 %v5762_v1  ;;  %v5826_v23 = vor.u32 %v6180_v31, %v5825_v56 }
 0x33e   :  { %v2882_v0 = vpop.f32.mrf.mxu2  ;;  %3782 = vmatpush.bf16.msrb.mxu0 %v5634_v54  ;;  %v5625_v54 = vld [vmem:[#allocation8 + $0x50] sm:$0xf] }
 0x33f   :  { %v2883_v4 = vadd.f32 %v2882_v0, %v2834_v32  ;;  %v2931_v33 = vpop.f32.mrf.mxu3  ;;  %v2786_v8 = vpop.f32.mrf.mxu0  ;;  %3929 = vmatpush.bf16.msrb.mxu3 %v5826_v23  ;;  %v5817_v23 = vld [vmem:[#allocation8 + $0x1d0] sm:$0xf] }
 0x340   :  { %v2787_v55 = vadd.f32 %v2786_v8, %v6942_v21  ;;  %v2835_v26 = vpop.f32.mrf.mxu1  ;;  %v6148_v21 = vld [vmem:[#allocation8 + $0xe4] sm:$0xf0] }
 0x341   :  { %v7022_v42 = vadd.f32 %v2931_v33, %v2883_v4  ;;  %v2836_v32 = vadd.f32 %v2835_v26, %v7011_v13  ;;  %v5698_v0 = vor.u32 %v6148_v21, %v5697_v25 }
 0x342   :  { %vm3173_vm1 = vcmp.gt.f32.partialorder %v2787_v55, 0.0  ;;  %v3237_v59 = vmul.f32 0.2, %v2787_v55 }
 0x343   :  { %3831 = vmatpush.bf16.msrb.mxu1 %v5698_v0  ;;  %v6146_v0 = vld [vmem:[#allocation8 + $0xd4] sm:$0xf0] }
 0x344   :  { %v3301_v6 = vsel %vm3173_vm1, %v2787_v55, %v3237_v59 }
 0x345   :  { %v7024_v18 = vpack.c.bf16 %v3301_v6, %v3297_v22  ;;  %v6162_v22 = vld [vmem:[#allocation8 + $0x154] sm:$0xf0] }
 0x346   :  { %v2884_v4 = vpop.f32.mrf.mxu2 }
 0x347   :  { %v2885_v33 = vadd.f32 %v2884_v4, %v2836_v32  ;;  %v2933_v8 = vpop.f32.mrf.mxu3  ;;  %v2789_v58 = vpop.f32.mrf.mxu0  ;;  %v5689_v32 = vld [vmem:[#allocation8 + $0xd0] sm:$0xf] }
 0x348   :  { %v2790_v63 = vadd.f32 %v2789_v58, %v6949_v27  ;;  %v2838_v61 = vpop.f32.mrf.mxu1 }
 0x349   :  { %v7028_v55 = vadd.f32 %v2933_v8, %v2885_v33  ;;  %v2839_v46 = vadd.f32 %v2838_v61, %v7011_v13  ;;  %v5690_v8 = vor.u32 %v6146_v0, %v5689_v32  ;;  %v5681_v0 = vld [vmem:[#allocation8 + $0xc0] sm:$0xf] }
 0x34a   :  { %2984 = vmatmul.bf16.gmra.mxu0 %v6413_v28  ;;  %v3241_v9 = vmul.f32 0.2, %v2790_v63  ;;  %vm3177_vm2 = vcmp.gt.f32.partialorder %v2790_v63, 0.0  ;;  %v5753_v28 = vld [vmem:[#allocation8 + $0x150] sm:$0xf] }
 0x34b   :  { %3033 = vmatmul.bf16.gmra.mxu1 %v6507_v7  ;;  %3082 = vmatmul.bf16.gmra.mxu2 %v7633_v47  ;;  %v5754_v7 = vor.u32 %v6162_v22, %v5753_v28  ;;  %v6130_v47 = vld [vmem:[#allocation8 + $0x54] sm:$0xf0] }
 0x34c   :  { %3131 = vmatmul.bf16.gmra.mxu3 %v7671_v24  ;;  %v6178_v24 = vld [vmem:[#allocation8 + $0x1d4] sm:$0xf0]  ;;  %v5626_v25 = vor.u32 %v6130_v47, %v5625_v54  ;;  %3832 = vmatpush.bf16.msrb.mxu1 %v5690_v8  ;;  %v6160_v47 = vld [vmem:[#allocation8 + $0x144] sm:$0xf0] }
 0x34d   :  { %3881 = vmatpush.bf16.msrb.mxu2 %v5754_v7  ;;  %v5818_v21 = vor.u32 %v6178_v24, %v5817_v23  ;;  %v5617_v24 = vld [vmem:[#allocation8 + $0x40] sm:$0xf] }
 0x34e   :  { %v2887_v26 = vpop.f32.mrf.mxu2  ;;  %3783 = vmatpush.bf16.msrb.mxu0 %v5626_v25  ;;  %v5809_v25 = vld [vmem:[#allocation8 + $0x1c0] sm:$0xf] }
 0x34f   :  { %v2888_v59 = vadd.f32 %v2887_v26, %v2839_v46  ;;  %v2936_v1 = vpop.f32.mrf.mxu3  ;;  %v2791_v39 = vpop.f32.mrf.mxu0  ;;  %3930 = vmatpush.bf16.msrb.mxu3 %v5818_v21 }
 0x350   :  { %v2792_v27 = vadd.f32 %v2791_v39, %v6952_v51  ;;  %v2840_v56 = vpop.f32.mrf.mxu1  ;;  %v3305_v51 = vsel %vm3177_vm2, %v2790_v63, %v3241_v9 }
 0x351   :  { %v7036_v31 = vadd.f32 %v2936_v1, %v2888_v59  ;;  %v2841_v33 = vadd.f32 %v2840_v56, %v7011_v13 }
 0x352   :  { %vm3181_vm3 = vcmp.gt.f32.partialorder %v2792_v27, 0.0  ;;  %v3245_v6 = vmul.f32 0.2, %v2792_v27 }
 0x354   :  { %v3309_v4 = vsel %vm3181_vm3, %v2792_v27, %v3245_v6 }
 0x355   :  { %v7040_v58 = vpack.c.bf16 %v3309_v4, %v3305_v51  ;;  %v6144_v51 = vld [vmem:[#allocation8 + $0xc4] sm:$0xf0] }
 0x356   :  { %v2889_v61 = vpop.f32.mrf.mxu2  ;;  %v5682_v8 = vor.u32 %v6144_v51, %v5681_v0 }
 0x357   :  { %v2890_v46 = vadd.f32 %v2889_v61, %v2841_v33  ;;  %v2938_v26 = vpop.f32.mrf.mxu3  ;;  %v2794_v59 = vpop.f32.mrf.mxu0 }
 0x358   :  { %v2795_v1 = vadd.f32 %v2794_v59, %v6959_v52  ;;  %v2843_v39 = vpop.f32.mrf.mxu1  ;;  %3833 = vmatpush.bf16.msrb.mxu1 %v5682_v8 }
 0x359   :  { %v7043_v28 = vadd.f32 %v2938_v26, %v2890_v46  ;;  %v2844_v63 = vadd.f32 %v2843_v39, %v7011_v13 }
 0x35a   :  { %2989 = vmatmul.bf16.gmra.mxu0 %v6425_v53  ;;  %v3249_v6 = vmul.f32 0.2, %v2795_v1  ;;  %vm3185_vm4 = vcmp.gt.f32.partialorder %v2795_v1, 0.0  ;;  %v5745_v53 = vld [vmem:[#allocation8 + $0x140] sm:$0xf] }
 0x35b   :  { %3038 = vmatmul.bf16.gmra.mxu1 %v6523_v36  ;;  %3087 = vmatmul.bf16.gmra.mxu2 %v7636_v40  ;;  %v5746_v36 = vor.u32 %v6160_v47, %v5745_v53  ;;  %v6128_v40 = vld [vmem:[#allocation8 + $0x44] sm:$0xf0] }
 0x35c   :  { %3136 = vmatmul.bf16.gmra.mxu3 %v7674_v50  ;;  %v6176_v50 = vld [vmem:[#allocation8 + $0x1c4] sm:$0xf0]  ;;  %v5618_v21 = vor.u32 %v6128_v40, %v5617_v24  ;;  %v5609_v24 = vld [vmem:[#allocation8 + $0x30] sm:$0xf] }
 0x35d   :  { %3882 = vmatpush.bf16.msrb.mxu2 %v5746_v36  ;;  %v5810_v32 = vor.u32 %v6176_v50, %v5809_v25  ;;  %v5801_v40 = vld [vmem:[#allocation8 + $0x1b0] sm:$0xf] }
 0x35e   :  { %v2892_v9 = vpop.f32.mrf.mxu2  ;;  %3784 = vmatpush.bf16.msrb.mxu0 %v5618_v21  ;;  %v5673_v21 = vld [vmem:[#allocation8 + $0xb0] sm:$0xf] }
 0x35f   :  { %v2893_v27 = vadd.f32 %v2892_v9, %v2844_v63  ;;  %v2941_v56 = vpop.f32.mrf.mxu3  ;;  %v2796_v22 = vpop.f32.mrf.mxu0  ;;  %3931 = vmatpush.bf16.msrb.mxu3 %v5810_v32  ;;  %v6142_v32 = vld [vmem:[#allocation8 + $0xb4] sm:$0xf0] }
 0x360   :  { %v2797_v52 = vadd.f32 %v2796_v22, %v6962_v19  ;;  %v2845_v7 = vpop.f32.mrf.mxu1  ;;  %v3313_v19 = vsel %vm3185_vm4, %v2795_v1, %v3249_v6 }
 0x361   :  { %v7051_v54 = vadd.f32 %v2941_v56, %v2893_v27  ;;  %v2846_v33 = vadd.f32 %v2845_v7, %v7011_v13 }
 0x362   :  { %vm3189_vm5 = vcmp.gt.f32.partialorder %v2797_v52, 0.0  ;;  %v3253_v23 = vmul.f32 0.2, %v2797_v52 }
 0x364   :  { %v3317_v4 = vsel %vm3189_vm5, %v2797_v52, %v3253_v23  ;;  %v6158_v23 = vld [vmem:[#allocation8 + $0x134] sm:$0xf0] }
 0x365   :  { %v7055_v61 = vpack.c.bf16 %v3317_v4, %v3313_v19  ;;  %v5674_v19 = vor.u32 %v6142_v32, %v5673_v21 }
 0x366   :  { %v2894_v46 = vpop.f32.mrf.mxu2 }
 0x367   :  { %v2895_v26 = vadd.f32 %v2894_v46, %v2846_v33  ;;  %v2943_v59 = vpop.f32.mrf.mxu3  ;;  %v2799_v39 = vpop.f32.mrf.mxu0  ;;  %3834 = vmatpush.bf16.msrb.mxu1 %v5674_v19 }
 0x368   :  { %v2800_v63 = vadd.f32 %v2799_v39, %v6969_v15  ;;  %v2848_v9 = vpop.f32.mrf.mxu1 }
 0x369   :  { %v7058_v27 = vadd.f32 %v2943_v59, %v2895_v26  ;;  %v2849_v1 = vadd.f32 %v2848_v9, %v7011_v13 }
 0x36a   :  { %2994 = vmatmul.bf16.gmra.mxu0 %v6437_v16  ;;  %v3257_v7 = vmul.f32 0.2, %v2800_v63  ;;  %vm3193_vm6 = vcmp.gt.f32.partialorder %v2800_v63, 0.0  ;;  %v5737_v16 = vld [vmem:[#allocation8 + $0x130] sm:$0xf] }
 0x36b   :  { %3043 = vmatmul.bf16.gmra.mxu1 %v6539_v17  ;;  %3092 = vmatmul.bf16.gmra.mxu2 %v7639_v35  ;;  %v5738_v17 = vor.u32 %v6158_v23, %v5737_v16  ;;  %v6126_v35 = vld [vmem:[#allocation8 + $0x34] sm:$0xf0]  ;;  %v5601_v23 = vld [vmem:[#allocation8 + $0x20] sm:$0xf] }
 0x36c   :  { %3141 = vmatmul.bf16.gmra.mxu3 %v7677_v3  ;;  %v6174_v3 = vld [vmem:[#allocation8 + $0x1b4] sm:$0xf0]  ;;  %v5610_v25 = vor.u32 %v6126_v35, %v5609_v24  ;;  %v5665_v35 = vld [vmem:[#allocation8 + $0xa0] sm:$0xf] }
 0x36d   :  { %3883 = vmatpush.bf16.msrb.mxu2 %v5738_v17  ;;  %v5802_v50 = vor.u32 %v6174_v3, %v5801_v40  ;;  %v6140_v40 = vld [vmem:[#allocation8 + $0xa4] sm:$0xf0] }
 0x36e   :  { %v2897_v56 = vpop.f32.mrf.mxu2  ;;  %3785 = vmatpush.bf16.msrb.mxu0 %v5610_v25 }
 0x36f   :  { %v2898_v22 = vadd.f32 %v2897_v56, %v2849_v1  ;;  %v2946_v6 = vpop.f32.mrf.mxu3  ;;  %v2801_v52 = vpop.f32.mrf.mxu0  ;;  %3932 = vmatpush.bf16.msrb.mxu3 %v5802_v50  ;;  %v5666_v50 = vor.u32 %v6140_v40, %v5665_v35  ;;  %v5649_v35 = vld [vmem:[#allocation8 + $0x80] sm:$0xf] }
 0x370   :  { %v2802_v15 = vadd.f32 %v2801_v52, %v6972_v60  ;;  %v2850_v53 = vpop.f32.mrf.mxu1  ;;  %v3321_v60 = vsel %vm3193_vm6, %v2800_v63, %v3257_v7 }
 0x371   :  { %v7066_v47 = vadd.f32 %v2946_v6, %v2898_v22  ;;  %v2851_v51 = vadd.f32 %v2850_v53, %v7011_v13  ;;  %v6156_v53 = vld [vmem:[#allocation8 + $0x124] sm:$0xf0]  ;;  %3835 = vmatpush.bf16.msrb.mxu1 %v5666_v50  ;;  %v5713_v50 = vld [vmem:[#allocation8 + $0x100] sm:$0xf] }
 0x372   :  { %vm3197_vm7 = vcmp.gt.f32.partialorder %v2802_v15, 0.0  ;;  %v3261_v36 = vmul.f32 0.2, %v2802_v15 }
 0x374   :  { %v3325_v0 = vsel %vm3197_vm7, %v2802_v15, %v3261_v36  ;;  %v5793_v36 = vld [vmem:[#allocation8 + $0x1a0] sm:$0xf] }
 0x375   :  { %v7070_v4 = vpack.c.bf16 %v3325_v0, %v3321_v60 }
 0x376   :  { %v2899_v33 = vpop.f32.mrf.mxu2 }
 0x377   :  { %v2900_v8 = vadd.f32 %v2899_v33, %v2851_v51  ;;  %v2948_v46 = vpop.f32.mrf.mxu3  ;;  %v2804_v26 = vpop.f32.mrf.mxu0 }
 0x378   :  { %v2805_v59 = vadd.f32 %v2804_v26, %v6979_v43  ;;  %v2853_v39 = vpop.f32.mrf.mxu1 }
 0x379   :  { %v7073_v9 = vadd.f32 %v2948_v46, %v2900_v8  ;;  %v2854_v63 = vadd.f32 %v2853_v39, %v7011_v13 }
 0x37a   :  { %2999 = vmatmul.bf16.gmra.mxu0 %v6449_v44  ;;  %v3265_v52 = vmul.f32 0.2, %v2805_v59  ;;  %vm3201_vm8 = vcmp.gt.f32.partialorder %v2805_v59, 0.0  ;;  %v5729_v44 = vld [vmem:[#allocation8 + $0x120] sm:$0xf] }
 0x37b   :  { %3048 = vmatmul.bf16.gmra.mxu1 %v6555_v57  ;;  %3097 = vmatmul.bf16.gmra.mxu2 %v7642_v20  ;;  %v5730_v57 = vor.u32 %v6156_v53, %v5729_v44  ;;  %v6124_v20 = vld [vmem:[#allocation8 + $0x24] sm:$0xf0]  ;;  %v5657_v53 = vld [vmem:[#allocation8 + $0x90] sm:$0xf] }
 0x37c   :  { %3146 = vmatmul.bf16.gmra.mxu3 %v7680_v49  ;;  %v6172_v49 = vld [vmem:[#allocation8 + $0x1a4] sm:$0xf0]  ;;  %v5602_v17 = vor.u32 %v6124_v20, %v5601_v23 }
 0x37d   :  { %3884 = vmatpush.bf16.msrb.mxu2 %v5730_v57  ;;  %v5794_v24 = vor.u32 %v6172_v49, %v5793_v36 }
 0x37e   :  { %v2902_v1 = vpop.f32.mrf.mxu2  ;;  %3786 = vmatpush.bf16.msrb.mxu0 %v5602_v17  ;;  %v5585_v17 = vld [vmem:[#allocation8] sm:$0xf] }
 0x37f   :  { %v2903_v56 = vadd.f32 %v2902_v1, %v2854_v63  ;;  %v2951_v22 = vpop.f32.mrf.mxu3  ;;  %v2806_v6 = vpop.f32.mrf.mxu0  ;;  %3933 = vmatpush.bf16.msrb.mxu3 %v5794_v24  ;;  %v6120_v24 = vld [vmem:[#allocation8 + $0x4] sm:$0xf0] }
 0x380   :  { %v2807_v43 = vadd.f32 %v2806_v6, %v6982_v10  ;;  %v2855_v7 = vpop.f32.mrf.mxu1  ;;  %v3329_v10 = vsel %vm3201_vm8, %v2805_v59, %v3265_v52  ;;  %v5593_v52 = vld [vmem:[#allocation8 + $0x10] sm:$0xf] }
 0x381   :  { %v7081_v15 = vadd.f32 %v2951_v22, %v2903_v56  ;;  %v2856_v25 = vadd.f32 %v2855_v7, %v7011_v13  ;;  %v6154_v22 = vld [vmem:[#allocation8 + $0x114] sm:$0xf0] }
 0x382   :  { %vm3205_vm9 = vcmp.gt.f32.partialorder %v2807_v43, 0.0  ;;  %v3269_v16 = vmul.f32 0.2, %v2807_v43 }
 0x384   :  { %v3333_v3 = vsel %vm3205_vm9, %v2807_v43, %v3269_v16  ;;  %v5785_v43 = vld [vmem:[#allocation8 + $0x190] sm:$0xf]  ;;  %v6138_v16 = vld [vmem:[#allocation8 + $0x94] sm:$0xf0] }
 0x385   :  { %v7085_v21 = vpack.c.bf16 %v3333_v3, %v3329_v10  ;;  %v5658_v20 = vor.u32 %v6138_v16, %v5657_v53 }
 0x386   :  { %v2904_v32 = vpop.f32.mrf.mxu2 }
 0x387   :  { %v7087_v60 = vadd.f32 %v2904_v32, %v2856_v25  ;;  %v7089_v0 = vpop.f32.mrf.mxu3  ;;  %v2809_v51 = vpop.f32.mrf.mxu0  ;;  %3836 = vmatpush.bf16.msrb.mxu1 %v5658_v20  ;;  %v6136_v25 = vld [vmem:[#allocation8 + $0x84] sm:$0xf0]  ;;  %v7694_v20 = vld [vmem:[#allocation48_spill] sm:$0xff] }
 0x388   :  { %v2810_v19 = vadd.f32 %v2809_v51, %v6989_v11  ;;  %v2858_v33 = vpop.f32.mrf.mxu1  ;;  %v6152_v32 = vld [vmem:[#allocation8 + $0x104] sm:$0xf0] }
 0x389   :  { %v2859_v8 = vadd.f32 %v2858_v33, %v7011_v13  ;;  %v5586_v33 = vor.u32 %v6120_v24, %v5585_v17 }
 0x38a   :  { %3004 = vmatmul.bf16.gmra.mxu0 %v6461_v12  ;;  %v3273_v63 = vmul.f32 0.2, %v2810_v19  ;;  %vm3209_vm10 = vcmp.gt.f32.partialorder %v2810_v19, 0.0  ;;  %v5721_v12 = vld [vmem:[#allocation8 + $0x110] sm:$0xf] }
 0x38b   :  { %3053 = vmatmul.bf16.gmra.mxu1 %v6571_v34  ;;  %3102 = vmatmul.bf16.gmra.mxu2 %v7645_v5  ;;  %v5722_v34 = vor.u32 %v6154_v22, %v5721_v12  ;;  %v6122_v5 = vld [vmem:[#allocation8 + $0x14] sm:$0xf0] }
 0x38c   :  { %3151 = vmatmul.bf16.gmra.mxu3 %v7683_v62  ;;  %v6170_v62 = vld [vmem:[#allocation8 + $0x194] sm:$0xf0]  ;;  %v5594_v7 = vor.u32 %v6122_v5, %v5593_v52  ;;  %v6168_v5 = vld [vmem:[#allocation8 + $0x184] sm:$0xf0] }
 0x38d   :  { %3885 = vmatpush.bf16.msrb.mxu2 %v5722_v34  ;;  %v5786_v44 = vor.u32 %v6170_v62, %v5785_v43 }
 0x38e   :  { %v2907_v46 = vpop.f32.mrf.mxu2  ;;  %3787 = vmatpush.bf16.msrb.mxu0 %v5594_v7 }
 0x38f   :  { %v2908_v26 = vadd.f32 %v2907_v46, %v2859_v8  ;;  %v2956_v59 = vpop.f32.mrf.mxu3  ;;  %v2811_v39 = vpop.f32.mrf.mxu0  ;;  %3934 = vmatpush.bf16.msrb.mxu3 %v5786_v44  ;;  %v5714_v8 = vor.u32 %v6152_v32, %v5713_v50  ;;  %v5650_v46 = vor.u32 %v6136_v25, %v5649_v35 }
 0x390   :  { %v2812_v1 = vadd.f32 %v2811_v39, %v6992_v29  ;;  %v2860_v56 = vpop.f32.mrf.mxu1  ;;  %v3337_v29 = vsel %vm3209_vm10, %v2810_v19, %v3273_v63 }
 0x391   :  { %v7098_v11 = vadd.f32 %v2956_v59, %v2908_v26  ;;  %v2861_v23 = vadd.f32 %v2860_v56, %v7011_v13  ;;  %3886 = vmatpush.bf16.msrb.mxu2 %v5714_v8  ;;  %v7692_v59 = vld [vmem:[#allocation46_spill] sm:$0xff]  ;;  %3837 = vmatpush.bf16.msrb.mxu1 %v5650_v46  ;;  %v6133_v8 = vld [vmem:[#allocation8 + $0x74] sm:$0xf] }
 0x392   :  { %vm3213_vm11 = vcmp.gt.f32.partialorder %v2812_v1, 0.0  ;;  %v3277_v6 = vmul.f32 0.2, %v2812_v1  ;;  %3788 = vmatpush.bf16.msrb.mxu0 %v5586_v33  ;;  %v5771_v33 = vld [vmem:[#allocation8 + $0x178] sm:$0xf0] }
 0x394   :  { %v3341_v57 = vsel %vm3213_vm11, %v2812_v1, %v3277_v6 }
 0x395   :  { %v7102_v36 = vpack.c.bf16 %v3341_v57, %v3337_v29  ;;  %v7693_v57 = vld [vmem:[#allocation32_spill] sm:$0xff] }
 0x396   :  { %v2909_v49 = vpop.f32.mrf.mxu2 }
 0x397   :  { %v7104_v40 = vadd.f32 %v2909_v49, %v2861_v23  ;;  %v7106_v10 = vpop.f32.mrf.mxu3  ;;  %v2814_v3 = vpop.f32.mrf.mxu0  ;;  %v7695_v49 = vld [vmem:[#allocation49_spill] sm:$0xff] }
 0x398   :  { %v2815_v51 = vadd.f32 %v2814_v3, %v6999_v30  ;;  %v2863_v19 = vpop.f32.mrf.mxu1 }
 0x399   :  { %v2864_v26 = vadd.f32 %v2863_v19, %v7011_v13  ;;  %v6165_v19 = vld [vmem:[#allocation8 + $0x174] sm:$0xf] }
 0x39a   :  { %3009 = vmatmul.bf16.gmra.mxu0 %v7661_v37  ;;  %v3281_v56 = vmul.f32 0.2, %v2815_v51  ;;  %vm3217_vm12 = vcmp.gt.f32.partialorder %v2815_v51, 0.0  ;;  %v5774_v46 = vor.u32 %v6165_v19, %v5771_v33  ;;  %v5827_v19 = vld [vmem:[#allocation8 + $0x1e8] sm:$0xf0] }
 0x39b   :  { %3058 = vmatmul.bf16.gmra.mxu1 %v7662_v41  ;;  %3107 = vmatmul.bf16.gmra.mxu2 %v7692_v59  ;;  %v6181_v59 = vld [vmem:[#allocation8 + $0x1f4] sm:$0xf]  ;;  %v6147_v33 = vld [vmem:[#allocation8 + $0xe4] sm:$0xf] }
 0x39c   :  { %3156 = vmatmul.bf16.gmra.mxu3 %v7686_v45  ;;  %v3345_v41 = vsel %vm3217_vm12, %v2815_v51, %v3281_v56  ;;  %v5777_v45 = vld [vmem:[#allocation8 + $0x180] sm:$0xf]  ;;  %4075 = vmatpush.bf16.msra.mxu2 %v5774_v46 }
 0x39d   :  { %v5778_v7 = vor.u32 %v6168_v5, %v5777_v45 }
 0x39e   :  { %v2912_v39 = vpop.f32.mrf.mxu2 }
 0x39f   :  { %v2913_v63 = vadd.f32 %v2912_v39, %v2864_v26  ;;  %v2961_v30 = vpop.f32.mrf.mxu3  ;;  %v2816_v1 = vpop.f32.mrf.mxu0  ;;  %3935 = vmatpush.bf16.msrb.mxu3 %v5778_v7  ;;  %v5643_v26 = vld [vmem:[#allocation8 + $0x78] sm:$0xf0]  ;;  %v7697_v7 = vld [vmem:[#allocation35_spill] sm:$0xff] }
 0x3a0   :  { %v2817_v12 = vadd.f32 %v2816_v1, %v7002_v14  ;;  %v2865_v22 = vpop.f32.mrf.mxu1  ;;  %v5646_v1 = vor.u32 %v6133_v8, %v5643_v26  ;;  %v5699_v26 = vld [vmem:[#allocation8 + $0xe8] sm:$0xf0] }
 0x3a1   :  { %v7115_v37 = vadd.f32 %v2961_v30, %v2913_v63  ;;  %v2866_v52 = vadd.f32 %v2865_v22, %v7011_v13 }
 0x3a2   :  { %vm3221_vm13 = vcmp.gt.f32.partialorder %v2817_v12, 0.0  ;;  %v3285_v6 = vmul.f32 0.2, %v2817_v12  ;;  %3977 = vmatpush.bf16.msra.mxu0 %v5646_v1 }
 0x3a4   :  { %v3349_v34 = vsel %vm3221_vm13, %v2817_v12, %v3285_v6  ;;  %v5707_v12 = vld [vmem:[#allocation8 + $0xf8] sm:$0xf0] }
 0x3a5   :  { %v7118_v43 = vpack.c.bf16 %v3349_v34, %v3345_v41 }
 0x3a6   :  { %v2914_v62 = vpop.f32.mrf.mxu2 }
 0x3a7   :  { %v7120_v44 = vadd.f32 %v2914_v62, %v2866_v52  ;;  %v7122_v53 = vpop.f32.mrf.mxu3  ;;  %v2819_v14 = vpop.f32.mrf.mxu0  ;;  %v7696_v62 = vld [vmem:[#allocation51_spill] sm:$0xff] }
 0x3a8   :  { %v2820_v16 = vadd.f32 %v2819_v14, %v7009_v48  ;;  %v2868_v29 = vpop.f32.mrf.mxu1 }
 0x3a9   :  { %v2869_v23 = vadd.f32 %v2868_v29, %v7011_v13 }
 0x3aa   :  { %3014 = vmatmul.bf16.gmra.mxu0 %v7693_v57  ;;  %v3289_v25 = vmul.f32 0.2, %v2820_v16  ;;  %vm3225_vm14 = vcmp.gt.f32.partialorder %v2820_v16, 0.0 }
 0x3ab   :  { %3063 = vmatmul.bf16.gmra.mxu1 %v7694_v20  ;;  %3112 = vmatmul.bf16.gmra.mxu2 %v7695_v49 }
 0x3ac   :  { %3161 = vmatmul.bf16.gmra.mxu3 %v7689_v38  ;;  %v5835_v38 = vld [vmem:[#allocation8 + $0x1f8] sm:$0xf0]  ;;  %v3353_v39 = vsel %vm3225_vm14, %v2820_v16, %v3289_v25 }
 0x3ad   :  { %v5838_v56 = vor.u32 %v6181_v59, %v5835_v38 }
 0x3ae   :  { %v2917_v17 = vpop.f32.mrf.mxu2 }
 0x3af   :  { %v2918_v24 = vadd.f32 %v2917_v17, %v2869_v23  ;;  %v2966_v35 = vpop.f32.mrf.mxu3  ;;  %v2821_v3 = vpop.f32.mrf.mxu0  ;;  %4124 = vmatpush.bf16.msra.mxu3 %v5838_v56  ;;  %v6163_v17 = vld [vmem:[#allocation8 + $0x164] sm:$0xf]  ;;  %v7698_v56 = vld [vmem:[#allocation52_spill] sm:$0xff] }
 0x3b0   :  { %v2822_v50 = vadd.f32 %v2821_v3, %v7014_v2  ;;  %v2870_v48 = vpop.f32.mrf.mxu1  ;;  %v6149_v2 = vld [vmem:[#allocation8 + $0xf4] sm:$0xf]  ;;  %v5635_v3 = vld [vmem:[#allocation8 + $0x68] sm:$0xf0] }
 0x3b1   :  { %v7131_v32 = vadd.f32 %v2966_v35, %v2918_v24  ;;  %v2871_v30 = vadd.f32 %v2870_v48, %v7011_v13  ;;  %v5710_v41 = vor.u32 %v6149_v2, %v5707_v12  ;;  %v5763_v24 = vld [vmem:[#allocation8 + $0x168] sm:$0xf0]  ;;  %v6131_v35 = vld [vmem:[#allocation8 + $0x64] sm:$0xf] }
 0x3b2   :  { %vm3229_vm15 = vcmp.gt.f32.partialorder %v2822_v50, 0.0  ;;  %v3293_v51 = vmul.f32 0.2, %v2822_v50  ;;  %v5766_v48 = vor.u32 %v6163_v17, %v5763_v24  ;;  %v6129_v17 = vld [vmem:[#allocation8 + $0x54] sm:$0xf] }
 0x3b3   :  { %4026 = vmatpush.bf16.msra.mxu1 %v5710_v41  ;;  %v5627_v24 = vld [vmem:[#allocation8 + $0x58] sm:$0xf0] }
 0x3b4   :  { %v3357_v63 = vsel %vm3229_vm15, %v2822_v50, %v3293_v51  ;;  %v6179_v51 = vld [vmem:[#allocation8 + $0x1e4] sm:$0xf]  ;;  %4076 = vmatpush.bf16.msra.mxu2 %v5766_v48  ;;  %v6177_v48 = vld [vmem:[#allocation8 + $0x1d4] sm:$0xf] }
 0x3b5   :  { %v7134_v22 = vpack.c.bf16 %v3357_v63, %v3353_v39  ;;  %v5830_v46 = vor.u32 %v6179_v51, %v5827_v19  ;;  %v6145_v51 = vld [vmem:[#allocation8 + $0xd4] sm:$0xf] }
 0x3b6   :  { %v2919_v6 = vpop.f32.mrf.mxu2 }
 0x3b7   :  { %v7136_v34 = vadd.f32 %v2919_v6, %v2871_v30  ;;  %v7138_v52 = vpop.f32.mrf.mxu3  ;;  %v2980_v45 = vpop.f32.mrf.mxu0  ;;  %4125 = vmatpush.bf16.msra.mxu3 %v5830_v46  ;;  %v7699_v6 = vld [vmem:[#allocation37_spill] sm:$0xff] }
 0x3b8   :  { %v3029_v5 = vpop.f32.mrf.mxu1  ;;  %v2981_v13 = vadd.f32 %v2980_v45, %v7022_v42  ;;  %v5638_v42 = vor.u32 %v6131_v35, %v5635_v3 }
 0x3ba   :  { %3789 = vmatmul.bf16.vlgmr.msrb.gmra.mxu0 %v7696_v62  ;;  %v3030_v16 = vadd.f32 %v3029_v5, %v2981_v13 }
 0x3bb   :  { %3838 = vmatmul.bf16.vlgmr.msrb.gmra.mxu1 %v7697_v7  ;;  %3887 = vmatmul.bf16.vlgmr.msrb.gmra.mxu2 %v7024_v18 }
 0x3bc   :  { %3978 = vmatpush.bf16.msra.mxu0 %v5638_v42  ;;  %v5819_v42 = vld [vmem:[#allocation8 + $0x1d8] sm:$0xf0] }
 0x3be   :  { %v3078_v14 = vpop.f32.mrf.mxu2 }
 0x3bf   :  { %v3127_v29 = vpop.f32.mrf.mxu3  ;;  %v2982_v57 = vpop.f32.mrf.mxu0  ;;  %v3079_v20 = vadd.f32 %v3078_v14, %v3030_v16 }
 0x3c0   :  { %v3031_v23 = vpop.f32.mrf.mxu1  ;;  %v2983_v49 = vadd.f32 %v2982_v57, %v7028_v55  ;;  %v5702_v55 = vor.u32 %v6147_v33, %v5699_v26  ;;  %v5822_v33 = vor.u32 %v6177_v48, %v5819_v42  ;;  %v5811_v48 = vld [vmem:[#allocation8 + $0x1c8] sm:$0xf0]  ;;  %v6143_v42 = vld [vmem:[#allocation8 + $0xc4] sm:$0xf] }
 0x3c1   :  { %v3128_v25 = vadd.f32 %v3127_v29, %v3079_v20 }
 0x3c2   :  { %v3032_v50 = vadd.f32 %v3031_v23, %v2983_v49  ;;  %4027 = vmatpush.bf16.msra.mxu1 %v5702_v55  ;;  %v6161_v49 = vld [vmem:[#allocation8 + $0x154] sm:$0xf]  ;;  %4126 = vmatpush.bf16.msra.mxu3 %v5822_v33  ;;  %v5683_v33 = vld [vmem:[#allocation8 + $0xc8] sm:$0xf0] }
 0x3c3   :  { %v3234_v30 = vmul.f32 0.2, %v3128_v25  ;;  %vm3170_vm0 = vcmp.gt.f32.partialorder %v3128_v25, 0.0 }
 0x3c5   :  { %v3298_v41 = vsel %vm3170_vm0, %v3128_v25, %v3234_v30 }
 0x3c6   :  { %v3080_v8 = vpop.f32.mrf.mxu2 }
 0x3c7   :  { %v3081_v59 = vadd.f32 %v3080_v8, %v3032_v50  ;;  %v3129_v38 = vpop.f32.mrf.mxu3  ;;  %v2985_v39 = vpop.f32.mrf.mxu0  ;;  %v5630_v50 = vor.u32 %v6129_v17, %v5627_v24  ;;  %v5691_v8 = vld [vmem:[#allocation8 + $0xd8] sm:$0xf0]  ;;  %v5619_v17 = vld [vmem:[#allocation8 + $0x48] sm:$0xf0] }
 0x3c8   :  { %v3034_v63 = vpop.f32.mrf.mxu1  ;;  %v2986_v12 = vadd.f32 %v2985_v39, %v7036_v31  ;;  %v5755_v31 = vld [vmem:[#allocation8 + $0x158] sm:$0xf0] }
 0x3c9   :  { %v3130_v1 = vadd.f32 %v3129_v38, %v3081_v59  ;;  %v5758_v25 = vor.u32 %v6161_v49, %v5755_v31  ;;  %3979 = vmatpush.bf16.msra.mxu0 %v5630_v50  ;;  %v6159_v49 = vld [vmem:[#allocation8 + $0x144] sm:$0xf] }
 0x3ca   :  { %3794 = vmatmul.bf16.gmra.mxu0 %v7698_v56  ;;  %v3035_v14 = vadd.f32 %v3034_v63, %v2986_v12  ;;  %v7700_v63 = vld [vmem:[#allocation53_spill] sm:$0xff] }
 0x3cb   :  { %vm3174_vm1 = vcmp.gt.f32.partialorder %v3130_v1, 0.0  ;;  %v3238_v2 = vmul.f32 0.2, %v3130_v1  ;;  %3843 = vmatmul.bf16.gmra.mxu1 %v7699_v6  ;;  %3892 = vmatmul.bf16.gmra.mxu2 %v7040_v58  ;;  %v6127_v31 = vld [vmem:[#allocation8 + $0x44] sm:$0xf] }
 0x3cc   :  { %4077 = vmatpush.bf16.msra.mxu2 %v5758_v25  ;;  %v5622_v25 = vor.u32 %v6127_v31, %v5619_v17  ;;  %v6175_v50 = vld [vmem:[#allocation8 + $0x1c4] sm:$0xf]  ;;  %v6125_v31 = vld [vmem:[#allocation8 + $0x34] sm:$0xf]  ;;  %v5611_v17 = vld [vmem:[#allocation8 + $0x38] sm:$0xf0] }
 0x3cd   :  { %v3302_v45 = vsel %vm3174_vm1, %v3130_v1, %v3238_v2  ;;  %v7701_v2 = vld [vmem:[#allocation39_spill] sm:$0xff] }
 0x3ce   :  { %v7149_v5 = vpack.c.bf16 %v3302_v45, %v3298_v41  ;;  %v3083_v13 = vpop.f32.mrf.mxu2  ;;  %3980 = vmatpush.bf16.msra.mxu0 %v5622_v25  ;;  %v5614_v25 = vor.u32 %v6125_v31, %v5611_v17  ;;  %v6155_v31 = vld [vmem:[#allocation8 + $0x124] sm:$0xf]  ;;  %v5731_v17 = vld [vmem:[#allocation8 + $0x128] sm:$0xf0] }
 0x3cf   :  { %v3132_v16 = vpop.f32.mrf.mxu3  ;;  %v2987_v29 = vpop.f32.mrf.mxu0  ;;  %v3084_v23 = vadd.f32 %v3083_v13, %v3035_v14 }
 0x3d0   :  { %v3036_v57 = vpop.f32.mrf.mxu1  ;;  %3936 = vmatmul.bf16.vlgmr.msrb.gmra.mxu3 %v7149_v5  ;;  %v2988_v20 = vadd.f32 %v2987_v29, %v7043_v28  ;;  %v5694_v28 = vor.u32 %v6145_v51, %v5691_v8 }
 0x3d1   :  { %v3133_v35 = vadd.f32 %v3132_v16, %v3084_v23 }
 0x3d2   :  { %v3037_v3 = vadd.f32 %v3036_v57, %v2988_v20  ;;  %4028 = vmatpush.bf16.msra.mxu1 %v5694_v28  ;;  %3981 = vmatpush.bf16.msra.mxu0 %v5614_v25 }
 0x3d3   :  { %v3242_v39 = vmul.f32 0.2, %v3133_v35  ;;  %vm3178_vm2 = vcmp.gt.f32.partialorder %v3133_v35, 0.0 }
 0x3d5   :  { %v3306_v12 = vsel %vm3178_vm2, %v3133_v35, %v3242_v39  ;;  %v7702_v39 = vld [vmem:[#allocation54_spill] sm:$0xff] }
 0x3d6   :  { %v3085_v19 = vpop.f32.mrf.mxu2 }
 0x3d7   :  { %v3086_v46 = vadd.f32 %v3085_v19, %v3037_v3  ;;  %v3134_v26 = vpop.f32.mrf.mxu3  ;;  %v2990_v59 = vpop.f32.mrf.mxu0  ;;  %v5814_v19 = vor.u32 %v6175_v50, %v5811_v48  ;;  %v6173_v50 = vld [vmem:[#allocation8 + $0x1b4] sm:$0xf]  ;;  %v5803_v48 = vld [vmem:[#allocation8 + $0x1b8] sm:$0xf0] }
 0x3d8   :  { %v3039_v38 = vpop.f32.mrf.mxu1  ;;  %v2991_v1 = vadd.f32 %v2990_v59, %v7051_v54  ;;  %v5747_v54 = vld [vmem:[#allocation8 + $0x148] sm:$0xf0] }
 0x3d9   :  { %v3135_v55 = vadd.f32 %v3134_v26, %v3086_v46  ;;  %v5750_v35 = vor.u32 %v6159_v49, %v5747_v54  ;;  %4127 = vmatpush.bf16.msra.mxu3 %v5814_v19  ;;  %v6157_v54 = vld [vmem:[#allocation8 + $0x134] sm:$0xf]  ;;  %v5806_v19 = vor.u32 %v6173_v50, %v5803_v48  ;;  %v5734_v50 = vor.u32 %v6155_v31, %v5731_v17 }
 0x3da   :  { %3799 = vmatmul.bf16.gmra.mxu0 %v7700_v63  ;;  %v3040_v14 = vadd.f32 %v3039_v38, %v2991_v1  ;;  %v7703_v1 = vld [vmem:[#allocation41_spill] sm:$0xff] }
 0x3db   :  { %vm3182_vm3 = vcmp.gt.f32.partialorder %v3135_v55, 0.0  ;;  %v3246_v30 = vmul.f32 0.2, %v3135_v55  ;;  %3848 = vmatmul.bf16.gmra.mxu1 %v7701_v2  ;;  %3897 = vmatmul.bf16.gmra.mxu2 %v7055_v61 }
 0x3dc   :  { %4078 = vmatpush.bf16.msra.mxu2 %v5750_v35 }
 0x3dd   :  { %v3310_v41 = vsel %vm3182_vm3, %v3135_v55, %v3246_v30  ;;  %4128 = vmatpush.bf16.msra.mxu3 %v5806_v19  ;;  %v6139_v19 = vld [vmem:[#allocation8 + $0xa4] sm:$0xf] }
 0x3de   :  { %v3088_v45 = vpop.f32.mrf.mxu2  ;;  %v7157_v13 = vpack.c.bf16 %v3310_v41, %v3306_v12 }
 0x3df   :  { %v3137_v16 = vpop.f32.mrf.mxu3  ;;  %v2992_v29 = vpop.f32.mrf.mxu0  ;;  %v3089_v23 = vadd.f32 %v3088_v45, %v3040_v14 }
 0x3e0   :  { %v3041_v57 = vpop.f32.mrf.mxu1  ;;  %3941 = vmatmul.bf16.gmra.mxu3 %v7157_v13  ;;  %v2993_v20 = vadd.f32 %v2992_v29, %v7058_v27  ;;  %v5686_v27 = vor.u32 %v6143_v42, %v5683_v33  ;;  %v6141_v42 = vld [vmem:[#allocation8 + $0xb4] sm:$0xf]  ;;  %v5675_v33 = vld [vmem:[#allocation8 + $0xb8] sm:$0xf0] }
 0x3e1   :  { %v3138_v24 = vadd.f32 %v3137_v16, %v3089_v23 }
 0x3e2   :  { %v3042_v3 = vadd.f32 %v3041_v57, %v2993_v20  ;;  %4029 = vmatpush.bf16.msra.mxu1 %v5686_v27 }
 0x3e3   :  { %v3250_v28 = vmul.f32 0.2, %v3138_v24  ;;  %vm3186_vm4 = vcmp.gt.f32.partialorder %v3138_v24, 0.0 }
 0x3e5   :  { %v3314_v12 = vsel %vm3186_vm4, %v3138_v24, %v3250_v28 }
 0x3e6   :  { %v3090_v51 = vpop.f32.mrf.mxu2 }
 0x3e7   :  { %v3091_v8 = vadd.f32 %v3090_v51, %v3042_v3  ;;  %v3139_v46 = vpop.f32.mrf.mxu3  ;;  %v2995_v26 = vpop.f32.mrf.mxu0 }
 0x3e8   :  { %v3044_v59 = vpop.f32.mrf.mxu1  ;;  %v2996_v30 = vadd.f32 %v2995_v26, %v7066_v47  ;;  %v5739_v47 = vld [vmem:[#allocation8 + $0x138] sm:$0xf0] }
 0x3e9   :  { %v3140_v38 = vadd.f32 %v3139_v46, %v3091_v8  ;;  %v5742_v24 = vor.u32 %v6157_v54, %v5739_v47 }
 0x3ea   :  { %3804 = vmatmul.bf16.gmra.mxu0 %v7702_v39  ;;  %v3045_v16 = vadd.f32 %v3044_v59, %v2996_v30 }
 0x3eb   :  { %vm3190_vm5 = vcmp.gt.f32.partialorder %v3140_v38, 0.0  ;;  %v3254_v55 = vmul.f32 0.2, %v3140_v38  ;;  %3853 = vmatmul.bf16.gmra.mxu1 %v7703_v1  ;;  %3902 = vmatmul.bf16.gmra.mxu2 %v7070_v4 }
 0x3ec   :  { %4079 = vmatpush.bf16.msra.mxu2 %v5742_v24  ;;  %v5603_v24 = vld [vmem:[#allocation8 + $0x28] sm:$0xf0] }
 0x3ed   :  { %v3318_v41 = vsel %vm3190_vm5, %v3140_v38, %v3254_v55  ;;  %v7704_v38 = vld [vmem:[#allocation55_spill] sm:$0xff] }
 0x3ee   :  { %v3093_v45 = vpop.f32.mrf.mxu2  ;;  %v7165_v14 = vpack.c.bf16 %v3318_v41, %v3314_v12  ;;  %v7705_v12 = vld [vmem:[#allocation43_spill] sm:$0xff] }
 0x3ef   :  { %v3142_v29 = vpop.f32.mrf.mxu3  ;;  %v2997_v57 = vpop.f32.mrf.mxu0  ;;  %v3094_v20 = vadd.f32 %v3093_v45, %v3045_v16 }
 0x3f0   :  { %v3046_v23 = vpop.f32.mrf.mxu1  ;;  %3946 = vmatmul.bf16.gmra.mxu3 %v7165_v14  ;;  %v2998_v49 = vadd.f32 %v2997_v57, %v7073_v9  ;;  %v5678_v9 = vor.u32 %v6141_v42, %v5675_v33  ;;  %v2954_v57 = vadd.f32 %v7089_v0, %v7087_v60  ;;  %v6171_v42 = vld [vmem:[#allocation8 + $0x1a4] sm:$0xf]  ;;  %v5667_v33 = vld [vmem:[#allocation8 + $0xa8] sm:$0xf0]  ;;  %4080 = vmatpush.bf16.msra.mxu2 %v5734_v50 }
 0x3f1   :  { %v3143_v3 = vadd.f32 %v3142_v29, %v3094_v20 }
 0x3f2   :  { %v3047_v35 = vadd.f32 %v3046_v23, %v2998_v49  ;;  %4030 = vmatpush.bf16.msra.mxu1 %v5678_v9  ;;  %v5670_v9 = vor.u32 %v6139_v19, %v5667_v33  ;;  %v6137_v19 = vld [vmem:[#allocation8 + $0x94] sm:$0xf] }
 0x3f3   :  { %v3258_v59 = vmul.f32 0.2, %v3143_v3  ;;  %vm3194_vm6 = vcmp.gt.f32.partialorder %v3143_v3, 0.0 }
 0x3f5   :  { %v3322_v41 = vsel %vm3194_vm6, %v3143_v3, %v3258_v59 }
 0x3f6   :  { %v3095_v51 = vpop.f32.mrf.mxu2  ;;  %4031 = vmatpush.bf16.msra.mxu1 %v5670_v9  ;;  %v6135_v9 = vld [vmem:[#allocation8 + $0x84] sm:$0xf] }
 0x3f7   :  { %v3096_v8 = vadd.f32 %v3095_v51, %v3047_v35  ;;  %v3144_v46 = vpop.f32.mrf.mxu3  ;;  %v3000_v26 = vpop.f32.mrf.mxu0  ;;  %v6123_v35 = vld [vmem:[#allocation8 + $0x24] sm:$0xf]  ;;  %v5795_v51 = vld [vmem:[#allocation8 + $0x1a8] sm:$0xf0] }
 0x3f8   :  { %v3049_v27 = vpop.f32.mrf.mxu1  ;;  %v3001_v30 = vadd.f32 %v3000_v26, %v7081_v15  ;;  %v5606_v48 = vor.u32 %v6123_v35, %v5603_v24  ;;  %v5798_v0 = vor.u32 %v6171_v42, %v5795_v51  ;;  %v6153_v35 = vld [vmem:[#allocation8 + $0x114] sm:$0xf]  ;;  %v5723_v24 = vld [vmem:[#allocation8 + $0x118] sm:$0xf0] }
 0x3f9   :  { %v3145_v28 = vadd.f32 %v3144_v46, %v3096_v8  ;;  %v5726_v50 = vor.u32 %v6153_v35, %v5723_v24  ;;  %v6169_v42 = vld [vmem:[#allocation8 + $0x194] sm:$0xf]  ;;  %v5787_v51 = vld [vmem:[#allocation8 + $0x198] sm:$0xf0] }
 0x3fa   :  { %3809 = vmatmul.bf16.gmra.mxu0 %v7704_v38  ;;  %v3050_v23 = vadd.f32 %v3049_v27, %v3001_v30  ;;  %4129 = vmatpush.bf16.msra.mxu3 %v5798_v0  ;;  %v7709_v35 = vld [vmem:[#allocation27_spill] sm:$0xff] }
 0x3fb   :  { %vm3198_vm7 = vcmp.gt.f32.partialorder %v3145_v28, 0.0  ;;  %v3262_v55 = vmul.f32 0.2, %v3145_v28  ;;  %3858 = vmatmul.bf16.gmra.mxu1 %v7705_v12  ;;  %3907 = vmatmul.bf16.gmra.mxu2 %v7085_v21 }
 0x3fc   :  { %3982 = vmatpush.bf16.msra.mxu0 %v5606_v48  ;;  %4081 = vmatpush.bf16.msra.mxu2 %v5726_v50 }
 0x3fd   :  { %v3326_v45 = vsel %vm3198_vm7, %v3145_v28, %v3262_v55  ;;  %v7706_v55 = vld [vmem:[#allocation56_spill] sm:$0xff] }
 0x3fe   :  { %v3098_v16 = vpop.f32.mrf.mxu2  ;;  %v7173_v29 = vpack.c.bf16 %v3326_v45, %v3322_v41  ;;  %v7707_v45 = vld [vmem:[#allocation58_spill] sm:$0xff] }
 0x3ff   :  { %v3147_v20 = vpop.f32.mrf.mxu3  ;;  %v3002_v49 = vpop.f32.mrf.mxu0  ;;  %v3099_v47 = vadd.f32 %v3098_v16, %v3050_v23 }
 0x400   :  { %v3051_v54 = vpop.f32.mrf.mxu1  ;;  %3951 = vmatmul.bf16.gmra.mxu3 %v7173_v29  ;;  %v3003_v15 = vadd.f32 %v3002_v49, %v2954_v57  ;;  %v2959_v49 = vadd.f32 %v7106_v10, %v7104_v40  ;;  %v5790_v40 = vor.u32 %v6169_v42, %v5787_v51  ;;  %v5659_v10 = vld [vmem:[#allocation8 + $0x98] sm:$0xf0] }
 0x401   :  { %v3148_v3 = vadd.f32 %v3147_v20, %v3099_v47 }
 0x402   :  { %v3052_v25 = vadd.f32 %v3051_v54, %v3003_v15  ;;  %4130 = vmatpush.bf16.msra.mxu3 %v5790_v40 }
 0x403   :  { %v3266_v59 = vmul.f32 0.2, %v3148_v3  ;;  %vm3202_vm8 = vcmp.gt.f32.partialorder %v3148_v3, 0.0 }
 0x405   :  { %v3330_v16 = vsel %vm3202_vm8, %v3148_v3, %v3266_v59  ;;  %v5595_v3 = vld [vmem:[#allocation8 + $0x18] sm:$0xf0] }
 0x406   :  { %v3100_v60 = vpop.f32.mrf.mxu2 }
 0x407   :  { %v3101_v8 = vadd.f32 %v3100_v60, %v3052_v25  ;;  %v3149_v46 = vpop.f32.mrf.mxu3  ;;  %v3005_v26 = vpop.f32.mrf.mxu0  ;;  %v6121_v25 = vld [vmem:[#allocation8 + $0x14] sm:$0xf] }
 0x408   :  { %v3054_v27 = vpop.f32.mrf.mxu1  ;;  %v3006_v41 = vadd.f32 %v3005_v26, %v7098_v11  ;;  %v5598_v48 = vor.u32 %v6121_v25, %v5595_v3  ;;  %v5587_v26 = vld [vmem:[#allocation8 + $0x8] sm:$0xf0] }
 0x409   :  { %v3150_v28 = vadd.f32 %v3149_v46, %v3101_v8  ;;  %v5662_v8 = vor.u32 %v6137_v19, %v5659_v10  ;;  %v6119_v46 = vld [vmem:[#allocation8 + $0x4] sm:$0xf] }
 0x40a   :  { %3814 = vmatmul.bf16.gmra.mxu0 %v7706_v55  ;;  %v3055_v54 = vadd.f32 %v3054_v27, %v3006_v41  ;;  %v6151_v41 = vld [vmem:[#allocation8 + $0x104] sm:$0xf] }
 0x40b   :  { %vm3206_vm9 = vcmp.gt.f32.partialorder %v3150_v28, 0.0  ;;  %v3270_v30 = vmul.f32 0.2, %v3150_v28  ;;  %3863 = vmatmul.bf16.gmra.mxu1 %v7707_v45  ;;  %3912 = vmatmul.bf16.gmra.mxu2 %v7102_v36  ;;  %v6167_v10 = vld [vmem:[#allocation8 + $0x184] sm:$0xf] }
 0x40c   :  { %3983 = vmatpush.bf16.msra.mxu0 %v5598_v48  ;;  %4032 = vmatpush.bf16.msra.mxu1 %v5662_v8  ;;  %v2964_v48 = vadd.f32 %v7122_v53, %v7120_v44 }
 0x40d   :  { %v3334_v57 = vsel %vm3206_vm9, %v3150_v28, %v3270_v30  ;;  %v5651_v30 = vld [vmem:[#allocation8 + $0x88] sm:$0xf0] }
 0x40e   :  { %v3103_v23 = vpop.f32.mrf.mxu2  ;;  %v7182_v20 = vpack.c.bf16 %v3334_v57, %v3330_v16  ;;  %v5590_v57 = vor.u32 %v6119_v46, %v5587_v26 }
 0x40f   :  { %v3152_v47 = vpop.f32.mrf.mxu3  ;;  %v3007_v15 = vpop.f32.mrf.mxu0  ;;  %v3104_v17 = vadd.f32 %v3103_v23, %v3055_v54  ;;  %v5654_v23 = vor.u32 %v6135_v9, %v5651_v30  ;;  %v7710_v30 = vld [vmem:[#allocation33_spill] sm:$0xff] }
 0x410   :  { %v3056_v31 = vpop.f32.mrf.mxu1  ;;  %3956 = vmatmul.bf16.gmra.mxu3 %v7182_v20  ;;  %v3008_v11 = vadd.f32 %v3007_v15, %v2959_v49  ;;  %v5715_v49 = vld [vmem:[#allocation8 + $0x108] sm:$0xf0]  ;;  %3984 = vmatpush.bf16.msra.mxu0 %v5590_v57  ;;  %v7711_v57 = vld [vmem:[#allocation28_spill] sm:$0xff] }
 0x411   :  { %v3153_v60 = vadd.f32 %v3152_v47, %v3104_v17  ;;  %v5718_v15 = vor.u32 %v6151_v41, %v5715_v49  ;;  %4033 = vmatpush.bf16.msra.mxu1 %v5654_v23 }
 0x412   :  { %v3057_v0 = vadd.f32 %v3056_v31, %v3008_v11  ;;  %v7708_v31 = vld [vmem:[#allocation57_spill] sm:$0xff] }
 0x413   :  { %v3274_v54 = vmul.f32 0.2, %v3153_v60  ;;  %vm3210_vm10 = vcmp.gt.f32.partialorder %v3153_v60, 0.0  ;;  %4082 = vmatpush.bf16.msra.mxu2 %v5718_v15  ;;  %v2969_v15 = vadd.f32 %v7138_v52, %v7136_v34 }
 0x415   :  { %v3338_v24 = vsel %vm3210_vm10, %v3153_v60, %v3274_v54 }
 0x416   :  { %v3105_v33 = vpop.f32.mrf.mxu2 }
 0x417   :  { %v3106_v27 = vadd.f32 %v3105_v33, %v3057_v0  ;;  %v3154_v59 = vpop.f32.mrf.mxu3  ;;  %v3010_v28 = vpop.f32.mrf.mxu0  ;;  %v5779_v33 = vld [vmem:[#allocation8 + $0x188] sm:$0xf0] }
 0x418   :  { %v3059_v16 = vpop.f32.mrf.mxu1  ;;  %v3011_v11 = vadd.f32 %v3010_v28, %v7115_v37  ;;  %v5782_v8 = vor.u32 %v6167_v10, %v5779_v33 }
 0x419   :  { %v3155_v47 = vadd.f32 %v3154_v59, %v3106_v27 }
 0x41a   :  { %3819 = vmatmul.bf16.gmra.mxu0 %v7708_v31  ;;  %v3060_v42 = vadd.f32 %v3059_v16, %v3011_v11  ;;  %4131 = vmatpush.bf16.msra.mxu3 %v5782_v8 }
 0x41b   :  { %vm3214_vm11 = vcmp.gt.f32.partialorder %v3155_v47, 0.0  ;;  %v3278_v17 = vmul.f32 0.2, %v3155_v47  ;;  %3868 = vmatmul.bf16.gmra.mxu1 %v7709_v35  ;;  %3917 = vmatmul.bf16.gmra.mxu2 %v7118_v43 }
 0x41d   :  { %v3342_v25 = vsel %vm3214_vm11, %v3155_v47, %v3278_v17 }
 0x41e   :  { %v3108_v50 = vpop.f32.mrf.mxu2  ;;  %v7191_v3 = vpack.c.bf16 %v3342_v25, %v3338_v24 }
 0x41f   :  { %v3157_v51 = vpop.f32.mrf.mxu3  ;;  %v3012_v19 = vpop.f32.mrf.mxu0  ;;  %v3109_v37 = vadd.f32 %v3108_v50, %v3060_v42 }
 0x420   :  { %v3061_v0 = vpop.f32.mrf.mxu1  ;;  %3961 = vmatmul.bf16.gmra.mxu3 %v7191_v3  ;;  %v3013_v40 = vadd.f32 %v3012_v19, %v2964_v48  ;;  %v7208_v48 = vld [vmem:[%s7488_s4] sm:$0x3] }
 0x421   :  { %v3158_v60 = vadd.f32 %v3157_v51, %v3109_v37  ;;  %v7211_v42 = vperm.slane %v7208_v48, 0 }
 0x422   :  { %v3062_v46 = vadd.f32 %v3061_v0, %v3013_v40 }
 0x423   :  { %v3282_v44 = vmul.f32 0.2, %v3158_v60  ;;  %vm3218_vm12 = vcmp.gt.f32.partialorder %v3158_v60, 0.0 }
 0x425   :  { %v3346_v23 = vsel %vm3218_vm12, %v3158_v60, %v3282_v44 }
 0x426   :  { %v3110_v26 = vpop.f32.mrf.mxu2 }
 0x427   :  { %v3111_v9 = vadd.f32 %v3110_v26, %v3062_v46  ;;  %v3159_v27 = vpop.f32.mrf.mxu3  ;;  %v3015_v59 = vpop.f32.mrf.mxu0 }
 0x428   :  { %v3064_v28 = vpop.f32.mrf.mxu1  ;;  %v3016_v16 = vadd.f32 %v3015_v59, %v7131_v32 }
 0x429   :  { %v3160_v53 = vadd.f32 %v3159_v27, %v3111_v9 }
 0x42a   :  { %3824 = vmatmul.bf16.gmra.mxu0 %v7710_v30  ;;  %v3065_v17 = vadd.f32 %v3064_v28, %v3016_v16 }
 0x42b   :  { %vm3222_vm13 = vcmp.gt.f32.partialorder %v3160_v53, 0.0  ;;  %v3286_v41 = vmul.f32 0.2, %v3160_v53  ;;  %3873 = vmatmul.bf16.gmra.mxu1 %v7711_v57  ;;  %3922 = vmatmul.bf16.gmra.mxu2 %v7134_v22 }
 0x42d   :  { %v3350_v49 = vsel %vm3222_vm13, %v3160_v53, %v3286_v41 }
 0x42e   :  { %v3113_v54 = vpop.f32.mrf.mxu2  ;;  %v7200_v47 = vpack.c.bf16 %v3350_v49, %v3346_v23 }
 0x42f   :  { %v3162_v11 = vpop.f32.mrf.mxu3  ;;  %v3017_v24 = vpop.f32.mrf.mxu0  ;;  %v3114_v50 = vadd.f32 %v3113_v54, %v3065_v17 }
 0x430   :  { %v3066_v25 = vpop.f32.mrf.mxu1  ;;  %3966 = vmatmul.bf16.gmra.mxu3 %v7200_v47  ;;  %v3018_v32 = vadd.f32 %v3017_v24, %v2969_v15 }
 0x431   :  { %v3163_v51 = vadd.f32 %v3162_v11, %v3114_v50 }
 0x432   :  { %v3067_v19 = vadd.f32 %v3066_v25, %v3018_v32 }
 0x433   :  { %v3290_v33 = vmul.f32 0.2, %v3163_v51  ;;  %vm3226_vm14 = vcmp.gt.f32.partialorder %v3163_v51, 0.0 }
 0x435   :  { %v3354_v26 = vsel %vm3226_vm14, %v3163_v51, %v3290_v33 }
 0x436   :  { %v3115_v0 = vpop.f32.mrf.mxu2 }
 0x437   :  { %v3116_v34 = vadd.f32 %v3115_v0, %v3067_v19  ;;  %v3790_v52 = vpop.f32.mrf.mxu0  ;;  %v3164_v37 = vpop.f32.mrf.mxu3 }
 0x438   :  { %v3791_v40 = vadd.f32 %v3790_v52, %v7211_v42  ;;  %v3839_v10 = vpop.f32.mrf.mxu1 }
 0x439   :  { %v3165_v8 = vadd.f32 %v3164_v37, %v3116_v34 }
 0x43a   :  { %v3840_v60 = vadd.f32 %v3839_v10, %v3791_v40  ;;  %3985 = vmatmul.bf16.vlgmr.msra.gmra.mxu0 %v7696_v62 }
 0x43b   :  { %vm3230_vm15 = vcmp.gt.f32.partialorder %v3165_v8, 0.0  ;;  %v3294_v46 = vmul.f32 0.2, %v3165_v8  ;;  %4034 = vmatmul.bf16.vlgmr.msra.gmra.mxu1 %v7697_v7  ;;  %4083 = vmatmul.bf16.vlgmr.msra.gmra.mxu2 %v7024_v18 }
 0x43d   :  { %v3358_v9 = vsel %vm3230_vm15, %v3165_v8, %v3294_v46 }
 0x43e   :  { %v3888_v27 = vpop.f32.mrf.mxu2  ;;  %v7217_v59 = vpack.c.bf16 %v3358_v9, %v3354_v26 }
 0x43f   :  { %v3889_v28 = vadd.f32 %v3888_v27, %v3840_v60  ;;  %v3792_v44 = vpop.f32.mrf.mxu0 }
 0x440   :  { %v3793_v53 = vadd.f32 %v3792_v44, %v7211_v42  ;;  %v3841_v41 = vpop.f32.mrf.mxu1  ;;  %3971 = vmatmul.bf16.gmra.mxu3 %v7217_v59 }
 0x442   :  { %v3842_v16 = vadd.f32 %v3841_v41, %v3793_v53 }
 0x446   :  { %v3890_v62 = vpop.f32.mrf.mxu2 }
 0x447   :  { %v3891_v23 = vadd.f32 %v3890_v62, %v3842_v16  ;;  %v3795_v49 = vpop.f32.mrf.mxu0 }
 0x448   :  { %v3796_v7 = vadd.f32 %v3795_v49, %v7211_v42  ;;  %v3844_v54 = vpop.f32.mrf.mxu1 }
 0x44a   :  { %v3845_v18 = vadd.f32 %v3844_v54, %v3796_v7  ;;  %3990 = vmatmul.bf16.gmra.mxu0 %v7698_v56 }
 0x44b   :  { %4039 = vmatmul.bf16.gmra.mxu1 %v7699_v6  ;;  %4088 = vmatmul.bf16.gmra.mxu2 %v7040_v58 }
 0x44e   :  { %v3893_v15 = vpop.f32.mrf.mxu2 }
 0x44f   :  { %v3894_v17 = vadd.f32 %v3893_v15, %v3845_v18  ;;  %v3797_v11 = vpop.f32.mrf.mxu0 }
 0x450   :  { %v3798_v24 = vadd.f32 %v3797_v11, %v7211_v42  ;;  %v3846_v25 = vpop.f32.mrf.mxu1  ;;  %4132 = vmatmul.bf16.vlgmr.msra.gmra.mxu3 %v7149_v5 }
 0x452   :  { %v3847_v50 = vadd.f32 %v3846_v25, %v3798_v24 }
 0x453   :  { %v3937_v32 = vpop.f32.mrf.mxu3 }
 0x454   :  { %v7227_v51 = vadd.f32 %v3937_v32, %v3889_v28 }
 0x456   :  { %v3895_v19 = vpop.f32.mrf.mxu2  ;;  %vm4173_vm0 = vcmp.gt.f32.partialorder %v7227_v51, 0.0 }
 0x457   :  { %v3896_v0 = vadd.f32 %v3895_v19, %v3847_v50  ;;  %v3800_v34 = vpop.f32.mrf.mxu0 }
 0x458   :  { %v3801_v56 = vadd.f32 %v3800_v34, %v7211_v42  ;;  %v3849_v6 = vpop.f32.mrf.mxu1 }
 0x45a   :  { %v3850_v52 = vadd.f32 %v3849_v6, %v3801_v56  ;;  %3995 = vmatmul.bf16.gmra.mxu0 %v7700_v63 }
 0x45b   :  { %v3939_v58 = vpop.f32.mrf.mxu3  ;;  %4044 = vmatmul.bf16.gmra.mxu1 %v7701_v2  ;;  %4093 = vmatmul.bf16.gmra.mxu2 %v7055_v61 }
 0x45c   :  { %v7233_v37 = vadd.f32 %v3939_v58, %v3891_v23 }
 0x45e   :  { %v3898_v5 = vpop.f32.mrf.mxu2  ;;  %vm4175_vm2 = vcmp.gt.f32.partialorder %v7233_v37, 0.0 }
 0x45f   :  { %v3899_v40 = vadd.f32 %v3898_v5, %v3850_v52  ;;  %v3802_v10 = vpop.f32.mrf.mxu0 }
 0x460   :  { %v3803_v33 = vadd.f32 %v3802_v10, %v7211_v42  ;;  %v3851_v8 = vpop.f32.mrf.mxu1  ;;  %4137 = vmatmul.bf16.gmra.mxu3 %v7157_v13 }
 0x462   :  { %v3852_v60 = vadd.f32 %v3851_v8, %v3803_v33 }
 0x463   :  { %v3942_v46 = vpop.f32.mrf.mxu3 }
 0x464   :  { %v7237_v26 = vadd.f32 %v3942_v46, %v3894_v17 }
 0x466   :  { %v3900_v63 = vpop.f32.mrf.mxu2  ;;  %vm4177_vm4 = vcmp.gt.f32.partialorder %v7237_v26, 0.0 }
 0x467   :  { %v3901_v9 = vadd.f32 %v3900_v63, %v3852_v60  ;;  %v3805_v27 = vpop.f32.mrf.mxu0 }
 0x468   :  { %v3806_v2 = vadd.f32 %v3805_v27, %v7211_v42  ;;  %v3854_v61 = vpop.f32.mrf.mxu1 }
 0x46a   :  { %v3855_v28 = vadd.f32 %v3854_v61, %v3806_v2  ;;  %4000 = vmatmul.bf16.gmra.mxu0 %v7702_v39 }
 0x46b   :  { %v3944_v44 = vpop.f32.mrf.mxu3  ;;  %4049 = vmatmul.bf16.gmra.mxu1 %v7703_v1  ;;  %4098 = vmatmul.bf16.gmra.mxu2 %v7070_v4 }
 0x46c   :  { %v7243_v53 = vadd.f32 %v3944_v44, %v3896_v0 }
 0x46e   :  { %v3903_v13 = vpop.f32.mrf.mxu2  ;;  %vm4179_vm6 = vcmp.gt.f32.partialorder %v7243_v53, 0.0 }
 0x46f   :  { %v3904_v41 = vadd.f32 %v3903_v13, %v3855_v28  ;;  %v3807_v16 = vpop.f32.mrf.mxu0 }
 0x470   :  { %v3808_v62 = vadd.f32 %v3807_v16, %v7211_v42  ;;  %v3856_v23 = vpop.f32.mrf.mxu1  ;;  %4142 = vmatmul.bf16.gmra.mxu3 %v7165_v14 }
 0x472   :  { %v3857_v49 = vadd.f32 %v3856_v23, %v3808_v62 }
 0x473   :  { %v3947_v7 = vpop.f32.mrf.mxu3 }
 0x474   :  { %v7247_v54 = vadd.f32 %v3947_v7, %v3899_v40 }
 0x476   :  { %v3905_v39 = vpop.f32.mrf.mxu2  ;;  %vm4181_vm8 = vcmp.gt.f32.partialorder %v7247_v54, 0.0 }
 0x477   :  { %v3906_v18 = vadd.f32 %v3905_v39, %v3857_v49  ;;  %v3810_v15 = vpop.f32.mrf.mxu0 }
 0x478   :  { %v3811_v1 = vadd.f32 %v3810_v15, %v7211_v42  ;;  %v3859_v4 = vpop.f32.mrf.mxu1 }
 0x47a   :  { %v3860_v17 = vadd.f32 %v3859_v4, %v3811_v1  ;;  %4005 = vmatmul.bf16.gmra.mxu0 %v7704_v38 }
 0x47b   :  { %v3949_v11 = vpop.f32.mrf.mxu3  ;;  %4054 = vmatmul.bf16.gmra.mxu1 %v7705_v12  ;;  %4103 = vmatmul.bf16.gmra.mxu2 %v7085_v21 }
 0x47c   :  { %v7253_v24 = vadd.f32 %v3949_v11, %v3901_v9 }
 0x47e   :  { %v3908_v14 = vpop.f32.mrf.mxu2  ;;  %vm4183_vm10 = vcmp.gt.f32.partialorder %v7253_v24, 0.0 }
 0x47f   :  { %v3909_v25 = vadd.f32 %v3908_v14, %v3860_v17  ;;  %v3812_v50 = vpop.f32.mrf.mxu0 }
 0x480   :  { %v3813_v32 = vadd.f32 %v3812_v50, %v7211_v42  ;;  %v3861_v19 = vpop.f32.mrf.mxu1  ;;  %4147 = vmatmul.bf16.gmra.mxu3 %v7173_v29 }
 0x482   :  { %v3862_v0 = vadd.f32 %v3861_v19, %v3813_v32 }
 0x483   :  { %v3952_v34 = vpop.f32.mrf.mxu3 }
 0x484   :  { %v7257_v56 = vadd.f32 %v3952_v34, %v3904_v41 }
 0x486   :  { %v3910_v38 = vpop.f32.mrf.mxu2  ;;  %vm4185_vm12 = vcmp.gt.f32.partialorder %v7257_v56, 0.0 }
 0x487   :  { %v3911_v6 = vadd.f32 %v3910_v38, %v3862_v0  ;;  %v3815_v52 = vpop.f32.mrf.mxu0 }
 0x488   :  { %v3816_v12 = vadd.f32 %v3815_v52, %v7211_v42  ;;  %v3864_v21 = vpop.f32.mrf.mxu1 }
 0x48a   :  { %v3865_v58 = vadd.f32 %v3864_v21, %v3816_v12  ;;  %4010 = vmatmul.bf16.gmra.mxu0 %v7706_v55 }
 0x48b   :  { %v3954_v5 = vpop.f32.mrf.mxu3  ;;  %4059 = vmatmul.bf16.gmra.mxu1 %v7707_v45  ;;  %4108 = vmatmul.bf16.gmra.mxu2 %v7102_v36 }
 0x48c   :  { %v7263_v40 = vadd.f32 %v3954_v5, %v3906_v18  ;;  %v7295_v5 = vperm.slane %v7208_v48, 1 }
 0x48e   :  { %v3913_v29 = vpop.f32.mrf.mxu2  ;;  %vm4187_vm14 = vcmp.gt.f32.partialorder %v7263_v40, 0.0 }
 0x48f   :  { %v3914_v10 = vadd.f32 %v3913_v29, %v3865_v58  ;;  %v3817_v33 = vpop.f32.mrf.mxu0 }
 0x490   :  { %v3818_v8 = vadd.f32 %v3817_v33, %v7211_v42  ;;  %v3866_v60 = vpop.f32.mrf.mxu1  ;;  %4152 = vmatmul.bf16.gmra.mxu3 %v7182_v20 }
 0x492   :  { %v3867_v46 = vadd.f32 %v3866_v60, %v3818_v8 }
 0x493   :  { %v3957_v63 = vpop.f32.mrf.mxu3 }
 0x494   :  { %v7267_v9 = vadd.f32 %v3957_v63, %v3909_v25 }
 0x496   :  { %v3915_v55 = vpop.f32.mrf.mxu2 }
 0x497   :  { %v3916_v27 = vadd.f32 %v3915_v55, %v3867_v46  ;;  %v3820_v2 = vpop.f32.mrf.mxu0 }
 0x498   :  { %v3821_v45 = vadd.f32 %v3820_v2, %v7211_v42  ;;  %v3869_v36 = vpop.f32.mrf.mxu1  ;;  %v4269_v2 = vld [vmem:[%s7489_s5] sm:$0x3] }
 0x49a   :  { %v3870_v61 = vadd.f32 %v3869_v36, %v3821_v45  ;;  %4015 = vmatmul.bf16.gmra.mxu0 %v7708_v31 }
 0x49b   :  { %v3959_v28 = vpop.f32.mrf.mxu3  ;;  %4064 = vmatmul.bf16.gmra.mxu1 %v7709_v35  ;;  %4113 = vmatmul.bf16.gmra.mxu2 %v7118_v43 }
 0x49c   :  { %v7273_v44 = vadd.f32 %v3959_v28, %v3911_v6  ;;  %v7308_v28 = vperm.slane %v4269_v2, 1 }
 0x49e   :  { %v3918_v20 = vpop.f32.mrf.mxu2 }
 0x49f   :  { %v3919_v13 = vadd.f32 %v3918_v20, %v3870_v61  ;;  %v3822_v41 = vpop.f32.mrf.mxu0  ;;  %v7306_v61 = vperm.slane %v4269_v2, 0 }
 0x4a0   :  { %v3823_v16 = vadd.f32 %v3822_v41, %v7211_v42  ;;  %v3871_v62 = vpop.f32.mrf.mxu1  ;;  %4157 = vmatmul.bf16.gmra.mxu3 %v7191_v3 }
 0x4a2   :  { %v3872_v23 = vadd.f32 %v3871_v62, %v3823_v16 }
 0x4a3   :  { %v3962_v49 = vpop.f32.mrf.mxu3 }
 0x4a4   :  { %v7277_v7 = vadd.f32 %v3962_v49, %v3914_v10 }
 0x4a6   :  { %v3920_v31 = vpop.f32.mrf.mxu2 }
 0x4a7   :  { %v3921_v39 = vadd.f32 %v3920_v31, %v3872_v23  ;;  %v3825_v18 = vpop.f32.mrf.mxu0 }
 0x4a8   :  { %v3826_v35 = vadd.f32 %v3825_v18, %v7211_v42  ;;  %v3874_v43 = vpop.f32.mrf.mxu1  ;;  %v4207_v18 = vmul.f32 0.2, %v7233_v37 }
 0x4aa   :  { %v3875_v15 = vadd.f32 %v3874_v43, %v3826_v35  ;;  %4020 = vmatmul.bf16.gmra.mxu0 %v7710_v30 }
 0x4ab   :  { %v3964_v1 = vpop.f32.mrf.mxu3  ;;  %4069 = vmatmul.bf16.gmra.mxu1 %v7711_v57  ;;  %4118 = vmatmul.bf16.gmra.mxu2 %v7134_v22 }
 0x4ac   :  { %v7283_v4 = vadd.f32 %v3964_v1, %v3916_v27 }
 0x4ae   :  { %v3923_v3 = vpop.f32.mrf.mxu2 }
 0x4af   :  { %v3924_v17 = vadd.f32 %v3923_v3, %v3875_v15  ;;  %v3827_v11 = vpop.f32.mrf.mxu0 }
 0x4b0   :  { %v3828_v14 = vadd.f32 %v3827_v11, %v7211_v42  ;;  %v3876_v25 = vpop.f32.mrf.mxu1  ;;  %4162 = vmatmul.bf16.gmra.mxu3 %v7200_v47  ;;  %v4239_v11 = vsel %vm4175_vm2, %v7233_v37, %v4207_v18  ;;  %vm4191_vm2 = vcmp.gt.f32.partialorder %v7273_v44, 0.0 }
 0x4b2   :  { %v3877_v50 = vadd.f32 %v3876_v25, %v3828_v14 }
 0x4b3   :  { %v3967_v32 = vpop.f32.mrf.mxu3 }
 0x4b4   :  { %v7287_v19 = vadd.f32 %v3967_v32, %v3919_v13  ;;  %v4277_v32 = vmul.f32 %v7306_v61, %v4239_v11 }
 0x4b6   :  { %v3925_v30 = vpop.f32.mrf.mxu2 }
 0x4b7   :  { %v3926_v0 = vadd.f32 %v3925_v30, %v3877_v50  ;;  %v3986_v34 = vpop.f32.mrf.mxu0 }
 0x4b8   :  { %v4035_v57 = vpop.f32.mrf.mxu1  ;;  %v3987_v33 = vadd.f32 %v3986_v34, %v7295_v5 }
 0x4ba   :  { %v4036_v63 = vadd.f32 %v4035_v57, %v3987_v33 }
 0x4bb   :  { %v3969_v38 = vpop.f32.mrf.mxu3 }
 0x4bc   :  { %v7289_v22 = vadd.f32 %v3969_v38, %v3921_v39 }
 0x4be   :  { %v4084_v6 = vpop.f32.mrf.mxu2 }
 0x4bf   :  { %v3988_v52 = vpop.f32.mrf.mxu0  ;;  %v4085_v27 = vadd.f32 %v4084_v6, %v4036_v63  ;;  %v4211_v63 = vmul.f32 0.2, %v7243_v53 }
 0x4c0   :  { %v4037_v12 = vpop.f32.mrf.mxu1  ;;  %4167 = vmatmul.bf16.gmra.mxu3 %v7217_v59  ;;  %v4205_v59 = vmul.f32 0.2, %v7227_v51  ;;  %v3989_v45 = vadd.f32 %v3988_v52, %v7295_v5 }
 0x4c2   :  { %v4237_v41 = vsel %vm4173_vm0, %v7227_v51, %v4205_v59  ;;  %v4038_v62 = vadd.f32 %v4037_v12, %v3989_v45  ;;  %vm4189_vm0 = vcmp.gt.f32.partialorder %v7267_v9, 0.0 }
 0x4c3   :  { %v3972_v42 = vpop.f32.mrf.mxu3  ;;  %v4275_v31 = vmul.f32 %v7306_v61, %v4237_v41 }
 0x4c4   :  { %v7292_v21 = vadd.f32 %v3972_v42, %v3924_v17 }
 0x4c6   :  { %v4086_v47 = vpop.f32.mrf.mxu2 }
 0x4c7   :  { %v3991_v58 = vpop.f32.mrf.mxu0  ;;  %v4087_v35 = vadd.f32 %v4086_v47, %v4038_v62 }
 0x4c8   :  { %v4040_v29 = vpop.f32.mrf.mxu1  ;;  %v3992_v1 = vadd.f32 %v3991_v58, %v7295_v5 }
 0x4ca   :  { %v4041_v25 = vadd.f32 %v4040_v29, %v3992_v1 }
 0x4cb   :  { %v3974_v10 = vpop.f32.mrf.mxu3 }
 0x4cc   :  { %v7298_v8 = vadd.f32 %v3974_v10, %v3926_v0  ;;  %v4209_v0 = vmul.f32 0.2, %v7237_v26 }
 0x4ce   :  { %v4089_v60 = vpop.f32.mrf.mxu2  ;;  %v4241_v47 = vsel %vm4177_vm4, %v7237_v26, %v4209_v0  ;;  %vm4193_vm4 = vcmp.gt.f32.partialorder %v7277_v7, 0.0 }
 0x4cf   :  { %v3993_v46 = vpop.f32.mrf.mxu0  ;;  %v4090_v34 = vadd.f32 %v4089_v60, %v4041_v25  ;;  %v4279_v33 = vmul.f32 %v7306_v61, %v4241_v47  ;;  %v4215_v25 = vmul.f32 0.2, %v7253_v24  ;;  %v4217_v47 = vmul.f32 0.2, %v7257_v56 }
 0x4d0   :  { %v4042_v55 = vpop.f32.mrf.mxu1  ;;  %v3994_v52 = vadd.f32 %v3993_v46, %v7295_v5 }
 0x4d2   :  { %v4043_v29 = vadd.f32 %v4042_v55, %v3994_v52 }
 0x4d3   :  { %v4133_v48 = vpop.f32.mrf.mxu3 }
 0x4d4   :  { %v4134_v36 = vadd.f32 %v4133_v48, %v4085_v27 }
 0x4d6   :  { %vm4174_vm1 = vcmp.gt.f32.partialorder %v4134_v36, 0.0  ;;  %v4206_v20 = vmul.f32 0.2, %v4134_v36  ;;  %v4091_v13 = vpop.f32.mrf.mxu2 }
 0x4d7   :  { %v3996_v16 = vpop.f32.mrf.mxu0  ;;  %v4092_v59 = vadd.f32 %v4091_v13, %v4043_v29 }
 0x4d8   :  { %v4045_v23 = vpop.f32.mrf.mxu1  ;;  %v4238_v49 = vsel %vm4174_vm1, %v4134_v36, %v4206_v20  ;;  %v3997_v2 = vadd.f32 %v3996_v16, %v7295_v5  ;;  %v4243_v36 = vsel %vm4179_vm6, %v7243_v53, %v4211_v63  ;;  %vm4195_vm6 = vcmp.gt.f32.partialorder %v7283_v4, 0.0 }
 0x4d9   :  { %v4276_v39 = vmul.f32 %v7308_v28, %v4238_v49  ;;  %v4281_v49 = vmul.f32 %v7306_v61, %v4243_v36 }
 0x4da   :  { %v4046_v20 = vadd.f32 %v4045_v23, %v3997_v2 }
 0x4db   :  { %v4135_v43 = vpop.f32.mrf.mxu3  ;;  %v4307_v15 = vadd.f32 %v4276_v39, %v4275_v31  ;;  %v4213_v31 = vmul.f32 0.2, %v7247_v54 }
 0x4dc   :  { %v4136_v3 = vadd.f32 %v4135_v43, %v4087_v35 }
 0x4dd   :  { %4308 = vadd.xlane.f32.xlu0 %v4307_v15  ;;  %v4245_v23 = vsel %vm4181_vm8, %v7247_v54, %v4213_v31  ;;  %vm4197_vm8 = vcmp.gt.f32.partialorder %v7287_v19, 0.0 }
 0x4de   :  { %vm4176_vm3 = vcmp.gt.f32.partialorder %v4136_v3, 0.0  ;;  %v4208_v51 = vmul.f32 0.2, %v4136_v3  ;;  %v4094_v17 = vpop.f32.mrf.mxu2  ;;  %v4283_v11 = vmul.f32 %v7306_v61, %v4245_v23 }
 0x4df   :  { %v3998_v14 = vpop.f32.mrf.mxu0  ;;  %v4095_v39 = vadd.f32 %v4094_v17, %v4046_v20 }
 0x4e0   :  { %v4240_v50 = vsel %vm4176_vm3, %v4136_v3, %v4208_v51  ;;  %v4047_v57 = vpop.f32.mrf.mxu1  ;;  %v3999_v35 = vadd.f32 %v3998_v14, %v7295_v5 }
 0x4e1   :  { %v4278_v30 = vmul.f32 %v7308_v28, %v4240_v50 }
 0x4e2   :  { %v4048_v3 = vadd.f32 %v4047_v57, %v3999_v35  ;;  %v4247_v57 = vsel %vm4183_vm10, %v7253_v24, %v4215_v25  ;;  %vm4199_vm10 = vcmp.gt.f32.partialorder %v7289_v22, 0.0 }
 0x4e3   :  { %v4138_v38 = vpop.f32.mrf.mxu3  ;;  %v4310_v6 = vadd.f32 %v4278_v30, %v4277_v32 }
 0x4e4   :  { %v4139_v12 = vadd.f32 %v4138_v38, %v4090_v34 }
 0x4e5   :  { %4311 = vadd.xlane.f32.xlu0 %v4310_v6 }
 0x4e6   :  { %vm4178_vm5 = vcmp.gt.f32.partialorder %v4139_v12, 0.0  ;;  %v4210_v37 = vmul.f32 0.2, %v4139_v12  ;;  %v4096_v42 = vpop.f32.mrf.mxu2 }
 0x4e7   :  { %v4001_v58 = vpop.f32.mrf.mxu0  ;;  %v4097_v50 = vadd.f32 %v4096_v42, %v4048_v3 }
 0x4e8   :  { %v4242_v10 = vsel %vm4178_vm5, %v4139_v12, %v4210_v37  ;;  %v4050_v48 = vpop.f32.mrf.mxu1  ;;  %v4002_v0 = vadd.f32 %v4001_v58, %v7295_v5  ;;  %v4285_v37 = vmul.f32 %v7306_v61, %v4247_v57 }
 0x4e9   :  { %v4280_v60 = vmul.f32 %v7308_v28, %v4242_v10 }
 0x4ea   :  { %v4051_v38 = vadd.f32 %v4050_v48, %v4002_v0  ;;  %v4223_v0 = vmul.f32 0.2, %v7273_v44 }
 0x4eb   :  { %v4140_v46 = vpop.f32.mrf.mxu3  ;;  %v4313_v27 = vadd.f32 %v4280_v60, %v4279_v33 }
 0x4ec   :  { %v4141_v45 = vadd.f32 %v4140_v46, %v4092_v59  ;;  %v4249_v59 = vsel %vm4185_vm12, %v7257_v56, %v4217_v47  ;;  %vm4201_vm12 = vcmp.gt.f32.partialorder %v7292_v21, 0.0 }
 0x4ed   :  { %4314 = vadd.xlane.f32.xlu1 %v4313_v27  ;;  %v4287_v2 = vmul.f32 %v7306_v61, %v4249_v59 }
 0x4ee   :  { %vm4180_vm7 = vcmp.gt.f32.partialorder %v4141_v45, 0.0  ;;  %v4212_v26 = vmul.f32 0.2, %v4141_v45  ;;  %v4099_v55 = vpop.f32.mrf.mxu2 }
 0x4ef   :  { %v4003_v62 = vpop.f32.mrf.mxu0  ;;  %v4100_v29 = vadd.f32 %v4099_v55, %v4051_v38 }
 0x4f0   :  { %v4244_v41 = vsel %vm4180_vm7, %v4141_v45, %v4212_v26  ;;  %v4052_v15 = vpop.f32.mrf.mxu1  ;;  %v4004_v33 = vadd.f32 %v4003_v62, %v7295_v5  ;;  %v4219_v45 = vmul.f32 0.2, %v7263_v40 }
 0x4f1   :  { %v4282_v13 = vmul.f32 %v7308_v28, %v4244_v41 }
 0x4f2   :  { %v4053_v46 = vadd.f32 %v4052_v15, %v4004_v33 }
 0x4f3   :  { %v4143_v16 = vpop.f32.mrf.mxu3  ;;  %v4316_v18 = vadd.f32 %v4282_v13, %v4281_v49  ;;  %v4251_v13 = vsel %vm4187_vm14, %v7263_v40, %v4219_v45  ;;  %vm4203_vm14 = vcmp.gt.f32.partialorder %v7298_v8, 0.0 }
 0x4f4   :  { %v4144_v43 = vadd.f32 %v4143_v16, %v4095_v39 }
 0x4f5   :  { %4317 = vadd.xlane.f32.xlu1 %v4316_v18  ;;  %v4289_v18 = vmul.f32 %v7306_v61, %v4251_v13 }
 0x4f6   :  { %vm4182_vm9 = vcmp.gt.f32.partialorder %v4144_v43, 0.0  ;;  %v4214_v53 = vmul.f32 0.2, %v4144_v43  ;;  %v4101_v1 = vpop.f32.mrf.mxu2 }
 0x4f7   :  { %v4006_v14 = vpop.f32.mrf.mxu0  ;;  %v4102_v26 = vadd.f32 %v4101_v1, %v4053_v46 }
 0x4f8   :  { %v4246_v51 = vsel %vm4182_vm9, %v4144_v43, %v4214_v53  ;;  %v4055_v6 = vpop.f32.mrf.mxu1  ;;  %v4007_v62 = vadd.f32 %v4006_v14, %v7295_v5  ;;  %v4221_v43 = vmul.f32 0.2, %v7267_v9 }
 0x4f9   :  { %v4284_v17 = vmul.f32 %v7308_v28, %v4246_v51 }
 0x4fa   :  { %v4056_v39 = vadd.f32 %v4055_v6, %v4007_v62 }
 0x4fb   :  { %v4145_v32 = vpop.f32.mrf.mxu3  ;;  %v4319_v30 = vadd.f32 %v4284_v17, %v4283_v11  ;;  %v4253_v17 = vsel %vm4189_vm0, %v7267_v9, %v4221_v43  ;;  %vm4439_vm0 = vcmask 7168  }
 0x4fc   :  { %v4146_v34 = vadd.f32 %v4145_v32, %v4097_v50  ;;  %v4291_v32 = vmul.f32 %v7306_v61, %v4253_v17 }
 0x4fd   :  { %4320 = vadd.xlane.f32.xlu2 %v4319_v30 }
 0x4fe   :  { %vm4184_vm11 = vcmp.gt.f32.partialorder %v4146_v34, 0.0  ;;  %v4216_v54 = vmul.f32 0.2, %v4146_v34  ;;  %v4104_v12 = vpop.f32.mrf.mxu2 }
 0x4ff   :  { %v4008_v63 = vpop.f32.mrf.mxu0  ;;  %v4105_v15 = vadd.f32 %v4104_v12, %v4056_v39  ;;  %v4255_v12 = vsel %vm4191_vm2, %v7273_v44, %v4223_v0  ;;  %v4231_v0 = vmul.f32 0.2, %v7289_v22 }
 0x500   :  { %v4248_v52 = vsel %vm4184_vm11, %v4146_v34, %v4216_v54  ;;  %v4057_v55 = vpop.f32.mrf.mxu1  ;;  %v4009_v1 = vadd.f32 %v4008_v63, %v7295_v5 }
 0x501   :  { %v4286_v42 = vmul.f32 %v7308_v28, %v4248_v52 }
 0x502   :  { %v4058_v25 = vadd.f32 %v4057_v55, %v4009_v1 }
 0x503   :  { %v4148_v58 = vpop.f32.mrf.mxu3  ;;  %v4322_v10 = vadd.f32 %v4286_v42, %v4285_v37 }
 0x504   :  { %v4149_v60 = vadd.f32 %v4148_v58, %v4100_v29  ;;  %v4293_v29 = vmul.f32 %v7306_v61, %v4255_v12  ;;  %v4263_v12 = vsel %vm4199_vm10, %v7289_v22, %v4231_v0 }
 0x505   :  { %4323 = vadd.xlane.f32.xlu2 %v4322_v10  ;;  %v4225_v10 = vmul.f32 0.2, %v7277_v7 }
 0x506   :  { %vm4186_vm13 = vcmp.gt.f32.partialorder %v4149_v60, 0.0  ;;  %v4218_v24 = vmul.f32 0.2, %v4149_v60  ;;  %v4106_v36 = vpop.f32.mrf.mxu2 }
 0x507   :  { %v4011_v31 = vpop.f32.mrf.mxu0  ;;  %v4107_v34 = vadd.f32 %v4106_v36, %v4058_v25 }
 0x508   :  { %v4250_v27 = vsel %vm4186_vm13, %v4149_v60, %v4218_v24  ;;  %v4060_v3 = vpop.f32.mrf.mxu1  ;;  %v4012_v38 = vadd.f32 %v4011_v31, %v7295_v5 }
 0x509   :  { %v4288_v48 = vmul.f32 %v7308_v28, %v4250_v27  ;;  %v4257_v27 = vsel %vm4193_vm4, %v7277_v7, %v4225_v10  ;;  %v4233_v10 = vmul.f32 0.2, %v7292_v21 }
 0x50a   :  { %v4061_v42 = vadd.f32 %v4060_v3, %v4012_v38  ;;  %v4295_v55 = vmul.f32 %v7306_v61, %v4257_v27 }
 0x50b   :  { %v4150_v20 = vpop.f32.mrf.mxu3  ;;  %v4325_v41 = vadd.f32 %v4288_v48, %v4287_v2 }
 0x50c   :  { %v4151_v49 = vadd.f32 %v4150_v20, %v4102_v26  ;;  %v4227_v20 = vmul.f32 0.2, %v7283_v4 }
 0x50d   :  { %4326 = vadd.xlane.f32.xlu0 %v4325_v41 }
 0x50e   :  { %vm4188_vm15 = vcmp.gt.f32.partialorder %v4151_v49, 0.0  ;;  %v4220_v56 = vmul.f32 0.2, %v4151_v49  ;;  %v4109_v11 = vpop.f32.mrf.mxu2  ;;  %v4259_v39 = vsel %vm4195_vm6, %v7283_v4, %v4227_v20 }
 0x50f   :  { %v4013_v14 = vpop.f32.mrf.mxu0  ;;  %v4110_v33 = vadd.f32 %v4109_v11, %v4061_v42 }
 0x510   :  { %v4252_v16 = vsel %vm4188_vm15, %v4151_v49, %v4220_v56  ;;  %v4062_v52 = vpop.f32.mrf.mxu1  ;;  %v4014_v59 = vadd.f32 %v4013_v14, %v7295_v5 }
 0x511   :  { %v4290_v35 = vmul.f32 %v7308_v28, %v4252_v16 }
 0x512   :  { %v4063_v2 = vadd.f32 %v4062_v52, %v4014_v59 }
 0x513   :  { %v4153_v53 = vpop.f32.mrf.mxu3  ;;  %v4328_v23 = vadd.f32 %v4290_v35, %v4289_v18  ;;  %v4297_v35 = vmul.f32 %v7306_v61, %v4259_v39 }
 0x514   :  { %v4154_v51 = vadd.f32 %v4153_v53, %v4105_v15  ;;  %v4229_v15 = vmul.f32 0.2, %v7287_v19 }
 0x515   :  { %4329 = vadd.xlane.f32.xlu1 %v4328_v23 }
 0x516   :  { %vm4190_vm1 = vcmp.gt.f32.partialorder %v4154_v51, 0.0  ;;  %v4222_v40 = vmul.f32 0.2, %v4154_v51  ;;  %v4111_v37 = vpop.f32.mrf.mxu2  ;;  %v4261_v17 = vsel %vm4197_vm8, %v7287_v19, %v4229_v15 }
 0x517   :  { %v4016_v60 = vpop.f32.mrf.mxu0  ;;  %v4112_v41 = vadd.f32 %v4111_v37, %v4063_v2 }
 0x518   :  { %v4254_v50 = vsel %vm4190_vm1, %v4154_v51, %v4222_v40  ;;  %v4065_v48 = vpop.f32.mrf.mxu1  ;;  %v4017_v56 = vadd.f32 %v4016_v60, %v7295_v5 }
 0x519   :  { %v4292_v30 = vmul.f32 %v7308_v28, %v4254_v50 }
 0x51a   :  { %v4066_v16 = vadd.f32 %v4065_v48, %v4017_v56 }
 0x51b   :  { %v4155_v54 = vpop.f32.mrf.mxu3  ;;  %v4331_v57 = vadd.f32 %v4292_v30, %v4291_v32  ;;  %v4299_v32 = vmul.f32 %v7306_v61, %v4261_v17 }
 0x51c   :  { %v4156_v6 = vadd.f32 %v4155_v54, %v4107_v34 }
 0x51d   :  { %4332 = vadd.xlane.f32.xlu2 %v4331_v57 }
 0x51e   :  { %vm4192_vm3 = vcmp.gt.f32.partialorder %v4156_v6, 0.0  ;;  %v4224_v9 = vmul.f32 0.2, %v4156_v6  ;;  %v4114_v26 = vpop.f32.mrf.mxu2 }
 0x51f   :  { %v4018_v31 = vpop.f32.mrf.mxu0  ;;  %v4115_v53 = vadd.f32 %v4114_v26, %v4066_v16 }
 0x520   :  { %v4256_v47 = vsel %vm4192_vm3, %v4156_v6, %v4224_v9  ;;  %v4067_v23 = vpop.f32.mrf.mxu1  ;;  %v4019_v11 = vadd.f32 %v4018_v31, %v7295_v5 }
 0x521   :  { %v4294_v58 = vmul.f32 %v7308_v28, %v4256_v47 }
 0x522   :  { %v4068_v50 = vadd.f32 %v4067_v23, %v4019_v11 }
 0x523   :  { %v4158_v63 = vpop.f32.mrf.mxu3  ;;  %v4334_v24 = vadd.f32 %v4294_v58, %v4293_v29  ;;  %v4301_v29 = vmul.f32 %v7306_v61, %v4263_v12 }
 0x524   :  { %v4159_v46 = vadd.f32 %v4158_v63, %v4110_v33 }
 0x525   :  { %4335 = vadd.xlane.f32.xlu0 %v4334_v24 }
 0x526   :  { %vm4194_vm5 = vcmp.gt.f32.partialorder %v4159_v46, 0.0  ;;  %v4226_v44 = vmul.f32 0.2, %v4159_v46  ;;  %v4116_v1 = vpop.f32.mrf.mxu2 }
 0x527   :  { %v4021_v25 = vpop.f32.mrf.mxu0  ;;  %v4117_v34 = vadd.f32 %v4116_v1, %v4068_v50 }
 0x528   :  { %v4258_v45 = vsel %vm4194_vm5, %v4159_v46, %v4226_v44  ;;  %v4022_v38 = vadd.f32 %v4021_v25, %v7295_v5  ;;  %v4070_v52 = vpop.f32.mrf.mxu1  ;;  %v4265_v46 = vsel %vm4201_vm12, %v7292_v21, %v4233_v10 }
 0x529   :  { %v4296_v36 = vmul.f32 %v7308_v28, %v4258_v45  ;;  %v4303_v45 = vmul.f32 %v7306_v61, %v4265_v46 }
 0x52a   :  { %v4071_v37 = vadd.f32 %v4070_v52, %v4022_v38 }
 0x52b   :  { %v4160_v62 = vpop.f32.mrf.mxu3  ;;  %v4337_v49 = vadd.f32 %v4296_v36, %v4295_v55  ;;  %v4235_v55 = vmul.f32 0.2, %v7298_v8 }
 0x52c   :  { %v4161_v13 = vadd.f32 %v4160_v62, %v4112_v41  ;;  %v7399_v62 = vld [vmem:[#allocation2] ss:$0 sm:$0xff] }
 0x52d   :  { %4338 = vadd.xlane.f32.xlu1 %v4337_v49  ;;  %v4267_v49 = vsel %vm4203_vm14, %v7298_v8, %v4235_v55 }
 0x52e   :  { %vm4196_vm7 = vcmp.gt.f32.partialorder %v4161_v13, 0.0  ;;  %v4228_v7 = vmul.f32 0.2, %v4161_v13  ;;  %v4119_v9 = vpop.f32.mrf.mxu2 }
 0x52f   :  { %v4023_v47 = vpop.f32.mrf.mxu0  ;;  %v4120_v33 = vadd.f32 %v4119_v9, %v4071_v37 }
 0x530   :  { %v4260_v18 = vsel %vm4196_vm7, %v4161_v13, %v4228_v7  ;;  %v4024_v24 = vadd.f32 %v4023_v47, %v7295_v5  ;;  %v4072_v44 = vpop.f32.mrf.mxu1  ;;  %v4305_v7 = vmul.f32 %v7306_v61, %v4267_v49 }
 0x531   :  { %v4298_v43 = vmul.f32 %v7308_v28, %v4260_v18 }
 0x532   :  { %v4073_v2 = vadd.f32 %v4072_v44, %v4024_v24 }
 0x533   :  { %v4163_v3 = vpop.f32.mrf.mxu3  ;;  %v4340_v51 = vadd.f32 %v4298_v43, %v4297_v35 }
 0x534   :  { %v4164_v40 = vadd.f32 %v4163_v3, %v4115_v53 }
 0x535   :  { %4341 = vadd.xlane.f32.xlu2 %v4340_v51 }
 0x536   :  { %vm4198_vm9 = vcmp.gt.f32.partialorder %v4164_v40, 0.0  ;;  %v4230_v4 = vmul.f32 0.2, %v4164_v40  ;;  %v4121_v27 = vpop.f32.mrf.mxu2 }
 0x537   :  { %v4122_v36 = vadd.f32 %v4121_v27, %v4073_v2 }
 0x538   :  { %v4262_v14 = vsel %vm4198_vm9, %v4164_v40, %v4230_v4 }
 0x539   :  { %v4300_v30 = vmul.f32 %v7308_v28, %v4262_v14 }
 0x53b   :  { %v4165_v54 = vpop.f32.mrf.mxu3  ;;  %v4343_v57 = vadd.f32 %v4300_v30, %v4299_v32 }
 0x53c   :  { %v4166_v6 = vadd.f32 %v4165_v54, %v4117_v34 }
 0x53d   :  { %4344 = vadd.xlane.f32.xlu0 %v4343_v57 }
 0x53e   :  { %vm4200_vm11 = vcmp.gt.f32.partialorder %v4166_v6, 0.0  ;;  %v4232_v19 = vmul.f32 0.2, %v4166_v6 }
 0x540   :  { %v4264_v42 = vsel %vm4200_vm11, %v4166_v6, %v4232_v19 }
 0x541   :  { %v4302_v58 = vmul.f32 %v7308_v28, %v4264_v42 }
 0x543   :  { %v4168_v60 = vpop.f32.mrf.mxu3  ;;  %v4346_v63 = vadd.f32 %v4302_v58, %v4301_v29 }
 0x544   :  { %v4169_v59 = vadd.f32 %v4168_v60, %v4120_v33 }
 0x545   :  { %4347 = vadd.xlane.f32.xlu1 %v4346_v63 }
 0x546   :  { %vm4202_vm13 = vcmp.gt.f32.partialorder %v4169_v59, 0.0  ;;  %v4234_v22 = vmul.f32 0.2, %v4169_v59 }
 0x548   :  { %v4266_v48 = vsel %vm4202_vm13, %v4169_v59, %v4234_v22 }
 0x549   :  { %v4304_v26 = vmul.f32 %v7308_v28, %v4266_v48 }
 0x54b   :  { %v4170_v5 = vpop.f32.mrf.mxu3  ;;  %v4349_v20 = vadd.f32 %v4304_v26, %v4303_v45 }
 0x54c   :  { %v4171_v41 = vadd.f32 %v4170_v5, %v4122_v36 }
 0x54d   :  { %4350 = vadd.xlane.f32.xlu2 %v4349_v20 }
 0x54e   :  { %vm4204_vm15 = vcmp.gt.f32.partialorder %v4171_v41, 0.0  ;;  %v4236_v21 = vmul.f32 0.2, %v4171_v41 }
 0x550   :  { %v4309_v56 = vpop.xlane.xlu0 %4308  ;;  %v4268_v13 = vsel %vm4204_vm15, %v4171_v41, %v4236_v21 }
 0x551   :  { %v4359_v31 = vadd.f32 %v7399_v62, %v4309_v56  ;;  %v4306_v39 = vmul.f32 %v7308_v28, %v4268_v13 }
 0x553   :  { %v4375_v16 = vmul.f32 0.5, %v4359_v31  ;;  %v4352_v18 = vadd.f32 %v4306_v39, %v4305_v7 }
 0x555   :  { %6194 = vtanh.f32 %v4375_v16  ;;  %4353 = vadd.xlane.f32.xlu0 %v4352_v18 }
 0x558   :  { %v4312_v35 = vpop.xlane.xlu0 %4311 }
 0x559   :  { %v4360_v43 = vadd.f32 %v7399_v62, %v4312_v35 }
 0x55b   :  { %v6195_v15 = vpop.eup %6194  ;;  %v4376_v53 = vmul.f32 0.5, %v4360_v43 }
 0x55c   :  { %v4407_v23 = vadd.f32 1.0, %v6195_v15 }
 0x55d   :  { %6196 = vtanh.f32 %v4376_v53 }
 0x55e   :  { %v4423_v8 = vmul.f32 0.5, %v4407_v23 }
 0x560   :  { %4440 = vst.msk [vmem:[%s7491_s7] sm:$0xff] %vm4439_vm0, %v4423_v8  ;;  %v4315_v61 = vpop.xlane.xlu1 %4314 }
 0x561   :  { %v4361_v28 = vadd.f32 %v7399_v62, %v4315_v61 }
 0x563   :  { %v6197_v1 = vpop.eup %6196  ;;  %v4377_v3 = vmul.f32 0.5, %v4361_v28 }
 0x564   :  { %v4408_v51 = vadd.f32 1.0, %v6197_v1 }
 0x565   :  { %6198 = vtanh.f32 %v4377_v3 }
 0x566   :  { %v4424_v11 = vmul.f32 0.5, %v4408_v51 }
 0x568   :  { %4441 = vst.msk [vmem:[%s7491_s7 + $0x8] sm:$0xff] %vm4439_vm0, %v4424_v11  ;;  %v4318_v40 = vpop.xlane.xlu1 %4317 }
 0x569   :  { %v4362_v4 = vadd.f32 %v7399_v62, %v4318_v40 }
 0x56b   :  { %v6199_v17 = vpop.eup %6198  ;;  %v4378_v25 = vmul.f32 0.5, %v4362_v4 }
 0x56c   :  { %v4409_v50 = vadd.f32 1.0, %v6199_v17 }
 0x56d   :  { %6200 = vtanh.f32 %v4378_v25 }
 0x56e   :  { %v4425_v14 = vmul.f32 0.5, %v4409_v50 }
 0x570   :  { %4442 = vst.msk [vmem:[%s7491_s7 + $0x10] sm:$0xff] %vm4439_vm0, %v4425_v14  ;;  %v4321_v32 = vpop.xlane.xlu2 %4320 }
 0x571   :  { %v4363_v30 = vadd.f32 %v7399_v62, %v4321_v32 }
 0x573   :  { %v6201_v0 = vpop.eup %6200  ;;  %v4379_v34 = vmul.f32 0.5, %v4363_v30 }
 0x574   :  { %v4410_v54 = vadd.f32 1.0, %v6201_v0 }
 0x575   :  { %6202 = vtanh.f32 %v4379_v34 }
 0x576   :  { %v4426_v57 = vmul.f32 0.5, %v4410_v54 }
 0x578   :  { %4443 = vst.msk [vmem:[%s7491_s7 + $0x18] sm:$0xff] %vm4439_vm0, %v4426_v57  ;;  %v4324_v38 = vpop.xlane.xlu2 %4323 }
 0x579   :  { %v4364_v6 = vadd.f32 %v7399_v62, %v4324_v38 }
 0x57b   :  { %v6203_v52 = vpop.eup %6202  ;;  %v4380_v9 = vmul.f32 0.5, %v4364_v6 }
 0x57c   :  { %v4411_v19 = vadd.f32 1.0, %v6203_v52 }
 0x57d   :  { %6204 = vtanh.f32 %v4380_v9 }
 0x57e   :  { %v4427_v12 = vmul.f32 0.5, %v4411_v19 }
 0x580   :  { %4444 = vst.msk [vmem:[%s7491_s7 + $0x20] sm:$0xff] %vm4439_vm0, %v4427_v12  ;;  %v4327_v37 = vpop.xlane.xlu0 %4326 }
 0x581   :  { %v4365_v42 = vadd.f32 %v7399_v62, %v4327_v37 }
 0x583   :  { %v6205_v47 = vpop.eup %6204  ;;  %v4381_v29 = vmul.f32 0.5, %v4365_v42 }
 0x584   :  { %v4412_v58 = vadd.f32 1.0, %v6205_v47 }
 0x585   :  { %6206 = vtanh.f32 %v4381_v29 }
 0x586   :  { %v4428_v10 = vmul.f32 0.5, %v4412_v58 }
 0x588   :  { %4445 = vst.msk [vmem:[%s7491_s7 + $0x28] sm:$0xff] %vm4439_vm0, %v4428_v10  ;;  %v4330_v33 = vpop.xlane.xlu1 %4329 }
 0x589   :  { %v4366_v60 = vadd.f32 %v7399_v62, %v4330_v33 }
 0x58b   :  { %v6207_v63 = vpop.eup %6206  ;;  %v4382_v24 = vmul.f32 0.5, %v4366_v60 }
 0x58c   :  { %v4413_v59 = vadd.f32 1.0, %v6207_v63 }
 0x58d   :  { %6208 = vtanh.f32 %v4382_v24 }
 0x58e   :  { %v4429_v22 = vmul.f32 0.5, %v4413_v59 }
 0x590   :  { %4446 = vst.msk [vmem:[%s7491_s7 + $0x30] sm:$0xff] %vm4439_vm0, %v4429_v22  ;;  %v4333_v46 = vpop.xlane.xlu2 %4332 }
 0x591   :  { %v4367_v44 = vadd.f32 %v7399_v62, %v4333_v46 }
 0x593   :  { %v6209_v27 = vpop.eup %6208  ;;  %v4383_v2 = vmul.f32 0.5, %v4367_v44 }
 0x594   :  { %v4414_v48 = vadd.f32 1.0, %v6209_v27 }
 0x595   :  { %6210 = vtanh.f32 %v4383_v2 }
 0x596   :  { %v4430_v45 = vmul.f32 0.5, %v4414_v48 }
 0x598   :  { %4447 = vst.msk [vmem:[%s7491_s7 + $0x38] sm:$0xff] %vm4439_vm0, %v4430_v45  ;;  %v4336_v26 = vpop.xlane.xlu0 %4335 }
 0x599   :  { %v4368_v55 = vadd.f32 %v7399_v62, %v4336_v26 }
 0x59b   :  { %v6211_v36 = vpop.eup %6210  ;;  %v4384_v5 = vmul.f32 0.5, %v4368_v55 }
 0x59c   :  { %v4415_v20 = vadd.f32 1.0, %v6211_v36 }
 0x59d   :  { %6212 = vtanh.f32 %v4384_v5 }
 0x59e   :  { %v4431_v41 = vmul.f32 0.5, %v4415_v20 }
 0x5a0   :  { %4448 = vst.msk [vmem:[%s7491_s7 + $0x40] sm:$0xff] %vm4439_vm0, %v4431_v41  ;;  %v4339_v21 = vpop.xlane.xlu1 %4338 }
 0x5a1   :  { %v4369_v49 = vadd.f32 %v7399_v62, %v4339_v21 }
 0x5a3   :  { %v6213_v56 = vpop.eup %6212  ;;  %v4385_v13 = vmul.f32 0.5, %v4369_v49 }
 0x5a4   :  { %v4416_v31 = vadd.f32 1.0, %v6213_v56 }
 0x5a5   :  { %6214 = vtanh.f32 %v4385_v13 }
 0x5a6   :  { %v4432_v7 = vmul.f32 0.5, %v4416_v31 }
 0x5a8   :  { %4449 = vst.msk [vmem:[%s7491_s7 + $0x48] sm:$0xff] %vm4439_vm0, %v4432_v7  ;;  %v4342_v39 = vpop.xlane.xlu2 %4341 }
 0x5a9   :  { %v4370_v16 = vadd.f32 %v7399_v62, %v4342_v39 }
 0x5ab   :  { %v6215_v18 = vpop.eup %6214  ;;  %v4386_v35 = vmul.f32 0.5, %v4370_v16 }
 0x5ac   :  { %v4417_v43 = vadd.f32 1.0, %v6215_v18 }
 0x5ad   :  { %6216 = vtanh.f32 %v4386_v35 }
 0x5ae   :  { %v4433_v15 = vmul.f32 0.5, %v4417_v43 }
 0x5b0   :  { %4450 = vst.msk [vmem:[%s7491_s7 + $0x50] sm:$0xff] %vm4439_vm0, %v4433_v15  ;;  %v4345_v53 = vpop.xlane.xlu0 %4344 }
 0x5b1   :  { %v4371_v23 = vadd.f32 %v7399_v62, %v4345_v53 }
 0x5b3   :  { %v6217_v8 = vpop.eup %6216  ;;  %v4387_v61 = vmul.f32 0.5, %v4371_v23 }
 0x5b4   :  { %v4418_v28 = vadd.f32 1.0, %v6217_v8 }
 0x5b5   :  { %6218 = vtanh.f32 %v4387_v61 }
 0x5b6   :  { %v4434_v1 = vmul.f32 0.5, %v4418_v28 }
 0x5b8   :  { %4451 = vst.msk [vmem:[%s7491_s7 + $0x58] sm:$0xff] %vm4439_vm0, %v4434_v1  ;;  %v4348_v3 = vpop.xlane.xlu1 %4347 }
 0x5b9   :  { %v4372_v51 = vadd.f32 %v7399_v62, %v4348_v3 }
 0x5bb   :  { %v6219_v11 = vpop.eup %6218  ;;  %v4388_v40 = vmul.f32 0.5, %v4372_v51 }
 0x5bc   :  { %v4419_v4 = vadd.f32 1.0, %v6219_v11 }
 0x5bd   :  { %6220 = vtanh.f32 %v4388_v40 }
 0x5be   :  { %v4435_v17 = vmul.f32 0.5, %v4419_v4 }
 0x5c0   :  { %4452 = vst.msk [vmem:[%s7491_s7 + $0x60] sm:$0xff] %vm4439_vm0, %v4435_v17  ;;  %v4351_v25 = vpop.xlane.xlu2 %4350 }
 0x5c1   :  { %v4373_v50 = vadd.f32 %v7399_v62, %v4351_v25 }
 0x5c3   :  { %v6221_v14 = vpop.eup %6220  ;;  %v4389_v32 = vmul.f32 0.5, %v4373_v50 }
 0x5c4   :  { %v4420_v30 = vadd.f32 1.0, %v6221_v14 }
 0x5c5   :  { %6222 = vtanh.f32 %v4389_v32 }
 0x5c6   :  { %v4436_v0 = vmul.f32 0.5, %v4420_v30 }
 0x5c8   :  { %4453 = vst.msk [vmem:[%s7491_s7 + $0x68] sm:$0xff] %vm4439_vm0, %v4436_v0  ;;  %v4354_v34 = vpop.xlane.xlu0 %4353 }
 0x5c9   :  { %v4374_v54 = vadd.f32 %v7399_v62, %v4354_v34 }
 0x5cb   :  { %v6223_v57 = vpop.eup %6222  ;;  %v4390_v38 = vmul.f32 0.5, %v4374_v54 }
 0x5cc   :  { %v4421_v6 = vadd.f32 1.0, %v6223_v57 }
 0x5cd   :  { %6224 = vtanh.f32 %v4390_v38 }
 0x5ce   :  { %v4437_v52 = vmul.f32 0.5, %v4421_v6 }
 0x5d0   :  { %4454 = vst.msk [vmem:[%s7491_s7 + $0x70] sm:$0xff] %vm4439_vm0, %v4437_v52 }
 0x5d3   :  { %v6225_v9 = vpop.eup %6224 }
 0x5d4   :  { %v4422_v19 = vadd.f32 1.0, %v6225_v9 }
 0x5d6   :  { %v4438_v12 = vmul.f32 0.5, %v4422_v19 }
 0x5d8   :  { %4455 = vst.msk [vmem:[%s7491_s7 + $0x78] sm:$0xff] %vm4439_vm0, %v4438_v12 }
 0x5d9   :  { %4460 = vsyncpa [#allocation4], 1 }
 0x5da   :  { %4461 = vsyncpa [#allocation6], 1 }
 0x5db   :  { %4462 = vsyncpa [#allocation9], 1 }

</bundles_post_ra>
